<compile_context>
chip_gen: v5e
topology: v5e:2x2
jax: 0.10.0
libtpu: 0.0.40
codegen_flags: <defaults>
</compile_context>

<pallas_src>
import math
import jax
import jax.numpy as jnp
from jax import lax
from jax.experimental import pallas as pl
from jax.experimental.pallas import tpu as pltpu

# ---- module-consistent hyperparameters --------------------------------------
VOCAB = 50            # input_size
VOCAB_PAD = 64        # embedding table padded to a sublane multiple
D_MODEL = 128         # module global hidden_size = 128
NHEAD = 2             # from nhead = [2, 4]
HEAD_DIM = D_MODEL // NHEAD
DFF = 2048            # nn.TransformerEncoderLayer default dim_feedforward
NUM_LAYERS = 2        # from num_layers = [1, 2, 4]
SEQ = 8
BATCH = 2
ROWS = SEQ * BATCH    # activations processed as one (ROWS, D_MODEL) slab
EPS = 1e-5            # nn.LayerNorm default eps
NEG_INF = -1e30
EMB_SCALE = math.sqrt(D_MODEL)
ATTN_SCALE = 1.0 / math.sqrt(HEAD_DIM)
# TODO(synk): dropout (p=0.1 in PositionalEncoding and the encoder layers) is
# implemented as identity (eval-mode semantics).


def _layer_norm(x, gamma, beta):
    # single-pass statistics (E[x], E[x^2]) -> biased variance, like PyTorch.
    # NOTE: less stable than two-pass if mean >> std; fine in f32 here.
    mu = jnp.mean(x, axis=-1, keepdims=True)
    ms = jnp.mean(x * x, axis=-1, keepdims=True)
    inv = lax.rsqrt(ms - mu * mu + EPS)
    return (x - mu) * inv * gamma + beta


def encoder_stack_kernel(ids_ref,                       # SMEM (ROWS,) int32
                         emb_ref, pe_ref, bias_ref,     # layer-invariant VMEM
                         w_in_ref, b_in_ref, w_out_ref,
                         w1_ref, b1_ref, w2_ref, vec_ref,
                         o_ref, h_ref):
    """Whole encoder stack; grid axis = layer, activations resident in h_ref."""
    layer = pl.program_id(0)

    @pl.when(layer == 0)
    def _():
        # Fused front-end: embedding gather, *sqrt(d_model), + positional enc.
        # Rows are (seq, batch)-ordered; ids come from SMEM scalar prefetch.
        for r in range(ROWS):
            h_ref[pl.ds(r, 1), :] = emb_ref[pl.ds(ids_ref[r], 1), :]
        h_ref[...] = h_ref[...] * EMB_SCALE + pe_ref[...]

    x = h_ref[...]                                     # (ROWS, D) f32

    # packed per-layer vectors: one DMA instead of six tiny ones
    b_out = vec_ref[0:1, :]
    g1, be1 = vec_ref[1:2, :], vec_ref[2:3, :]
    b2 = vec_ref[3:4, :]
    g2, be2 = vec_ref[4:5, :], vec_ref[5:6, :]

    # ---- multi-head self-attention (2 heads, statically unrolled) ----------
    qkv = jnp.dot(x.astype(jnp.bfloat16), w_in_ref[...],
                  preferred_element_type=jnp.float32) + b_in_ref[...]   # (16,384)

    bias = bias_ref[...]                               # (ROWS, ROWS) f32
    attn = None
    for h in range(NHEAD):
        lo = h * HEAD_DIM
        q_h = qkv[:, lo:lo + HEAD_DIM].astype(jnp.bfloat16)                    # (16,64)
        k_h = qkv[:, D_MODEL + lo:D_MODEL + lo + HEAD_DIM].astype(jnp.bfloat16)
        v_h = qkv[:, 2 * D_MODEL + lo:2 * D_MODEL + lo + HEAD_DIM].astype(jnp.bfloat16)

        s = lax.dot_general(q_h, k_h, (((1,), (1,)), ((), ())),
                            preferred_element_type=jnp.float32) * ATTN_SCALE   # (16,16)
        s = s + bias                                   # -inf on cross-batch keys
        s = s - jnp.max(s, axis=-1, keepdims=True)     # stable softmax (f32)
        p = jnp.exp(s)
        p = p * pl.reciprocal(jnp.sum(p, axis=-1, keepdims=True), approx=True)

        ctx = jnp.dot(p.astype(jnp.bfloat16), v_h,
                      preferred_element_type=jnp.float32)                      # (16,64)
        contrib = jnp.dot(ctx.astype(jnp.bfloat16),
                          w_out_ref[lo:lo + HEAD_DIM, :],
                          preferred_element_type=jnp.float32)                  # (16,128)
        attn = contrib if attn is None else attn + contrib
    attn = attn + b_out

    x = _layer_norm(x + attn, g1, be1)                 # residual + LayerNorm1

    # ---- feed-forward: Linear -> ReLU -> Linear -----------------------------
    h1 = jnp.dot(x.astype(jnp.bfloat16), w1_ref[...],
                 preferred_element_type=jnp.float32) + b1_ref[...]
    h1 = jnp.maximum(h1, 0.0)
    ffn = jnp.dot(h1.astype(jnp.bfloat16), w2_ref[...],
                  preferred_element_type=jnp.float32) + b2

    x = _layer_norm(x + ffn, g2, be2)                  # residual + LayerNorm2

    h_ref[...] = x                                     # stays resident in VMEM

    @pl.when(layer == pl.num_programs(0) - 1)
    def _():
        o_ref[...] = x                                 # single lane-dense store


def run_encoder_stack(src_flat, params):
    """src_flat: (ROWS,) int32 token ids, rows ordered (seq, batch)."""

    def lw(shape):    # per-layer streamed weight (leading layer axis squeezed)
        nd = len(shape)
        return pl.BlockSpec((None,) + tuple(shape),
                            lambda l, ids, _nd=nd: (l,) + (0,) * _nd)

    def const(shape):  # layer-invariant input (fetched once)
        nd = len(shape)
        return pl.BlockSpec(tuple(shape), lambda l, ids, _nd=nd: (0,) * _nd)

    grid_spec = pltpu.PrefetchScalarGridSpec(
        num_scalar_prefetch=1,
        grid=(NUM_LAYERS,),
        in_specs=[
            const((VOCAB_PAD, D_MODEL)),     # embedding table (padded)
            const((ROWS, D_MODEL)),          # positional-encoding rows
            const((ROWS, ROWS)),             # cross-batch additive mask
            lw((D_MODEL, 3 * D_MODEL)),      # w_in   (bf16)
            lw((1, 3 * D_MODEL)),            # b_in   (f32)
            lw((D_MODEL, D_MODEL)),          # w_out  (bf16)
            lw((D_MODEL, DFF)),              # w1     (bf16)
            lw((1, DFF)),                    # b1     (f32)
            lw((DFF, D_MODEL)),              # w2     (bf16)
            lw((8, D_MODEL)),                # packed small vectors
        ],
        out_specs=pl.BlockSpec((ROWS, D_MODEL), lambda l, ids: (0, 0)),
        scratch_shapes=[pltpu.VMEM((ROWS, D_MODEL), jnp.float32)],
    )

    return pl.pallas_call(
        encoder_stack_kernel,
        out_shape=jax.ShapeDtypeStruct((ROWS, D_MODEL), jnp.float32),
        grid_spec=grid_spec,
        compiler_params=pltpu.CompilerParams(
            dimension_semantics=("arbitrary",),        # layer axis carries state
            vmem_limit_bytes=16 * 1024 * 1024),
    )(src_flat,
      params["emb_pad"], params["pe_rows"], params["attn_bias"],
      params["w_in"], params["b_in"], params["w_out"],
      params["w1"], params["b1"], params["w2"], params["vecs"])


def make_positional_encoding(max_len, d_model):
    position = jnp.arange(max_len, dtype=jnp.float32)[:, None]
    div_term = jnp.exp(jnp.arange(0, d_model, 2, dtype=jnp.float32)
                       * (-math.log(10000.0) / d_model))
    pe = jnp.zeros((max_len, d_model), jnp.float32)
    pe = pe.at[:, 0::2].set(jnp.sin(position * div_term))
    pe = pe.at[:, 1::2].set(jnp.cos(position * div_term))
    return pe                                          # (max_len, d_model)


def make_attn_bias(seq, batch):
    # Rows of the flattened (seq*batch, d) slab are (seq, batch)-ordered; keys
    # belonging to a different batch element get -inf before softmax.
    r = jnp.arange(seq * batch, dtype=jnp.int32)
    same = (r[:, None] % batch) == (r[None, :] % batch)
    return jnp.where(same, 0.0, NEG_INF).astype(jnp.float32)


def init_params(key):
    """Deterministic synthetic parameters (shapes match nn.TransformerEncoderLayer)."""
    params = {}
    key, k_emb = jax.random.split(key)
    emb = jax.random.normal(k_emb, (VOCAB, D_MODEL), jnp.float32) * 0.1
    params["embedding"] = emb
    # padded copy used by the fused in-kernel gather
    params["emb_pad"] = jnp.zeros((VOCAB_PAD, D_MODEL), jnp.float32).at[:VOCAB].set(emb)

    # host-side constants (built once, passed into the kernel as plain inputs)
    pe = make_positional_encoding(500, D_MODEL)
    params["pe_rows"] = jnp.repeat(pe[:SEQ], BATCH, axis=0)      # (ROWS, D)
    params["attn_bias"] = make_attn_bias(SEQ, BATCH)             # (ROWS, ROWS)

    w_in, b_in, w_out, w1, b1, w2, vecs = ([] for _ in range(7))
    for _ in range(NUM_LAYERS):
        key, *ks = jax.random.split(key, 5)
        w_in.append(jax.random.normal(ks[0], (D_MODEL, 3 * D_MODEL), jnp.float32) * 0.05)
        b_in.append(jnp.zeros((1, 3 * D_MODEL), jnp.float32))
        w_out.append(jax.random.normal(ks[1], (D_MODEL, D_MODEL), jnp.float32) * 0.05)
        w1.append(jax.random.normal(ks[2], (D_MODEL, DFF), jnp.float32) * 0.05)
        b1.append(jnp.zeros((1, DFF), jnp.float32))
        w2.append(jax.random.normal(ks[3], (DFF, D_MODEL), jnp.float32) * 0.05)
        vecs.append(jnp.stack([
            jnp.zeros((D_MODEL,), jnp.float32),   # 0: b_out
            jnp.ones((D_MODEL,), jnp.float32),    # 1: ln1 gamma
            jnp.zeros((D_MODEL,), jnp.float32),   # 2: ln1 beta
            jnp.zeros((D_MODEL,), jnp.float32),   # 3: b2
            jnp.ones((D_MODEL,), jnp.float32),    # 4: ln2 gamma
            jnp.zeros((D_MODEL,), jnp.float32),   # 5: ln2 beta
            jnp.zeros((D_MODEL,), jnp.float32),   # 6: pad
            jnp.zeros((D_MODEL,), jnp.float32),   # 7: pad
        ], axis=0))

    # matmul weights stored in bf16 (f32 accumulation in-kernel); rest f32
    params["w_in"] = jnp.stack(w_in).astype(jnp.bfloat16)
    params["b_in"] = jnp.stack(b_in)
    params["w_out"] = jnp.stack(w_out).astype(jnp.bfloat16)
    params["w1"] = jnp.stack(w1).astype(jnp.bfloat16)
    params["b1"] = jnp.stack(b1)
    params["w2"] = jnp.stack(w2).astype(jnp.bfloat16)
    params["vecs"] = jnp.stack(vecs)
    return params


def transformer_encoder_forward(src, params):
    """src: (seq, batch) int32 -> memory: (seq, batch, d_model) f32."""
    src_flat = src.reshape(ROWS)                       # row r = s*BATCH + b
    out2d = run_encoder_stack(src_flat, params)        # (ROWS, D) lane-dense
    return out2d.reshape(SEQ, BATCH, D_MODEL)          # free metadata reshape


if __name__ == "__main__":
    key = jax.random.PRNGKey(0)
    key, k_src, k_params = jax.random.split(key, 3)

    src = jax.random.randint(k_src, (SEQ, BATCH), 0, VOCAB, dtype=jnp.int32)
    params = init_params(k_params)

    fwd = jax.jit(transformer_encoder_forward)
    memory = fwd(src, params)
    jax.block_until_ready(memory)

    assert memory.shape == (SEQ, BATCH, D_MODEL)
    assert memory.dtype == jnp.float32
    assert bool(jnp.all(jnp.isfinite(memory)))
    print("KERNEL_OK")
</pallas_src>

<mosaic_0001>
module attributes {stable_mosaic.version = 11 : i64} {
  func.func @encoder_stack_kernel(%arg0: i32, %arg1: memref<16xi32, #tpu.memory_space<smem>>, %arg2: memref<64x128xf32, #tpu.memory_space<vmem>>, %arg3: memref<16x128xf32, #tpu.memory_space<vmem>>, %arg4: memref<16x16xf32, #tpu.memory_space<vmem>>, %arg5: memref<1x128x384xbf16, #tpu.memory_space<vmem>>, %arg6: memref<1x1x384xf32, #tpu.memory_space<vmem>>, %arg7: memref<1x128x128xbf16, #tpu.memory_space<vmem>>, %arg8: memref<1x128x2048xbf16, #tpu.memory_space<vmem>>, %arg9: memref<1x1x2048xf32, #tpu.memory_space<vmem>>, %arg10: memref<1x2048x128xbf16, #tpu.memory_space<vmem>>, %arg11: memref<1x8x128xf32, #tpu.memory_space<vmem>>, %arg12: memref<16x128xf32, #tpu.memory_space<vmem>>, %arg13: memref<16x128xf32, #tpu.memory_space<vmem>>) attributes {dimension_semantics = [#tpu.dimension_semantics<arbitrary>], iteration_bounds = array<i64: 2>, scalar_prefetch = 1 : i64, scratch_operands = 1 : i64, tpu.core_type = #tpu.core_type<tc>, window_params = [{pipeline_mode = #tpu.pipeline_mode<synchronous>, transform_indices = @transform_0, window_bounds = array<i64: 64, 128>}, {pipeline_mode = #tpu.pipeline_mode<synchronous>, transform_indices = @transform_1, window_bounds = array<i64: 16, 128>}, {pipeline_mode = #tpu.pipeline_mode<synchronous>, transform_indices = @transform_2, window_bounds = array<i64: 16, 16>}, {transform_indices = @transform_3, window_bounds = array<i64: 1, 128, 384>}, {transform_indices = @transform_4, window_bounds = array<i64: 1, 1, 384>}, {transform_indices = @transform_5, window_bounds = array<i64: 1, 128, 128>}, {transform_indices = @transform_6, window_bounds = array<i64: 1, 128, 2048>}, {transform_indices = @transform_7, window_bounds = array<i64: 1, 1, 2048>}, {transform_indices = @transform_8, window_bounds = array<i64: 1, 2048, 128>}, {transform_indices = @transform_9, window_bounds = array<i64: 1, 8, 128>}, {pipeline_mode = #tpu.pipeline_mode<synchronous>, transform_indices = @transform_10, window_bounds = array<i64: 16, 128>}]} {
    %c0_i32 = arith.constant 0 : i32
    %0 = arith.cmpi eq, %arg0, %c0_i32 : i32
    %1 = arith.extui %0 : i1 to i32
    %c0_i32_0 = arith.constant 0 : i32
    %2 = arith.cmpi ne, %1, %c0_i32_0 : i32
    scf.if %2 {
      %c0_65 = arith.constant 0 : index
      %146 = memref.load %arg1[%c0_65] : memref<16xi32, #tpu.memory_space<smem>>
      %147 = arith.index_cast %146 : i32 to index
      %c0_66 = arith.constant 0 : index
      %148 = vector.load %arg2[%147, %c0_66] : memref<64x128xf32, #tpu.memory_space<vmem>>, vector<1x128xf32>
      %c0_67 = arith.constant 0 : index
      %c0_68 = arith.constant 0 : index
      %149 = vector.load %arg13[%c0_67, %c0_68] : memref<16x128xf32, #tpu.memory_space<vmem>>, vector<1x128xf32>
      tpu.vector_store %arg13[%c0_67, %c0_68], %148 {strides = array<i32>} : memref<16x128xf32, #tpu.memory_space<vmem>>, vector<1x128xf32>,
      %c1_69 = arith.constant 1 : index
      %150 = memref.load %arg1[%c1_69] : memref<16xi32, #tpu.memory_space<smem>>
      %151 = arith.index_cast %150 : i32 to index
      %c0_70 = arith.constant 0 : index
      %152 = vector.load %arg2[%151, %c0_70] : memref<64x128xf32, #tpu.memory_space<vmem>>, vector<1x128xf32>
      %c1_71 = arith.constant 1 : index
      %c0_72 = arith.constant 0 : index
      %153 = vector.load %arg13[%c1_71, %c0_72] : memref<16x128xf32, #tpu.memory_space<vmem>>, vector<1x128xf32>
      tpu.vector_store %arg13[%c1_71, %c0_72], %152 {strides = array<i32>} : memref<16x128xf32, #tpu.memory_space<vmem>>, vector<1x128xf32>,
      %c2_73 = arith.constant 2 : index
      %154 = memref.load %arg1[%c2_73] : memref<16xi32, #tpu.memory_space<smem>>
      %155 = arith.index_cast %154 : i32 to index
      %c0_74 = arith.constant 0 : index
      %156 = vector.load %arg2[%155, %c0_74] : memref<64x128xf32, #tpu.memory_space<vmem>>, vector<1x128xf32>
      %c2_75 = arith.constant 2 : index
      %c0_76 = arith.constant 0 : index
      %157 = vector.load %arg13[%c2_75, %c0_76] : memref<16x128xf32, #tpu.memory_space<vmem>>, vector<1x128xf32>
      tpu.vector_store %arg13[%c2_75, %c0_76], %156 {strides = array<i32>} : memref<16x128xf32, #tpu.memory_space<vmem>>, vector<1x128xf32>,
      %c3_77 = arith.constant 3 : index
      %158 = memref.load %arg1[%c3_77] : memref<16xi32, #tpu.memory_space<smem>>
      %159 = arith.index_cast %158 : i32 to index
      %c0_78 = arith.constant 0 : index
      %160 = vector.load %arg2[%159, %c0_78] : memref<64x128xf32, #tpu.memory_space<vmem>>, vector<1x128xf32>
      %c3_79 = arith.constant 3 : index
      %c0_80 = arith.constant 0 : index
      %161 = vector.load %arg13[%c3_79, %c0_80] : memref<16x128xf32, #tpu.memory_space<vmem>>, vector<1x128xf32>
      tpu.vector_store %arg13[%c3_79, %c0_80], %160 {strides = array<i32>} : memref<16x128xf32, #tpu.memory_space<vmem>>, vector<1x128xf32>,
      %c4_81 = arith.constant 4 : index
      %162 = memref.load %arg1[%c4_81] : memref<16xi32, #tpu.memory_space<smem>>
      %163 = arith.index_cast %162 : i32 to index
      %c0_82 = arith.constant 0 : index
      %164 = vector.load %arg2[%163, %c0_82] : memref<64x128xf32, #tpu.memory_space<vmem>>, vector<1x128xf32>
      %c4_83 = arith.constant 4 : index
      %c0_84 = arith.constant 0 : index
      %165 = vector.load %arg13[%c4_83, %c0_84] : memref<16x128xf32, #tpu.memory_space<vmem>>, vector<1x128xf32>
      tpu.vector_store %arg13[%c4_83, %c0_84], %164 {strides = array<i32>} : memref<16x128xf32, #tpu.memory_space<vmem>>, vector<1x128xf32>,
      %c5_85 = arith.constant 5 : index
      %166 = memref.load %arg1[%c5_85] : memref<16xi32, #tpu.memory_space<smem>>
      %167 = arith.index_cast %166 : i32 to index
      %c0_86 = arith.constant 0 : index
      %168 = vector.load %arg2[%167, %c0_86] : memref<64x128xf32, #tpu.memory_space<vmem>>, vector<1x128xf32>
      %c5_87 = arith.constant 5 : index
      %c0_88 = arith.constant 0 : index
      %169 = vector.load %arg13[%c5_87, %c0_88] : memref<16x128xf32, #tpu.memory_space<vmem>>, vector<1x128xf32>
      tpu.vector_store %arg13[%c5_87, %c0_88], %168 {strides = array<i32>} : memref<16x128xf32, #tpu.memory_space<vmem>>, vector<1x128xf32>,
      %c6 = arith.constant 6 : index
      %170 = memref.load %arg1[%c6] : memref<16xi32, #tpu.memory_space<smem>>
      %171 = arith.index_cast %170 : i32 to index
      %c0_89 = arith.constant 0 : index
      %172 = vector.load %arg2[%171, %c0_89] : memref<64x128xf32, #tpu.memory_space<vmem>>, vector<1x128xf32>
      %c6_90 = arith.constant 6 : index
      %c0_91 = arith.constant 0 : index
      %173 = vector.load %arg13[%c6_90, %c0_91] : memref<16x128xf32, #tpu.memory_space<vmem>>, vector<1x128xf32>
      tpu.vector_store %arg13[%c6_90, %c0_91], %172 {strides = array<i32>} : memref<16x128xf32, #tpu.memory_space<vmem>>, vector<1x128xf32>,
      %c7 = arith.constant 7 : index
      %174 = memref.load %arg1[%c7] : memref<16xi32, #tpu.memory_space<smem>>
      %175 = arith.index_cast %174 : i32 to index
      %c0_92 = arith.constant 0 : index
      %176 = vector.load %arg2[%175, %c0_92] : memref<64x128xf32, #tpu.memory_space<vmem>>, vector<1x128xf32>
      %c7_93 = arith.constant 7 : index
      %c0_94 = arith.constant 0 : index
      %177 = vector.load %arg13[%c7_93, %c0_94] : memref<16x128xf32, #tpu.memory_space<vmem>>, vector<1x128xf32>
      tpu.vector_store %arg13[%c7_93, %c0_94], %176 {strides = array<i32>} : memref<16x128xf32, #tpu.memory_space<vmem>>, vector<1x128xf32>,
      %c8 = arith.constant 8 : index
      %178 = memref.load %arg1[%c8] : memref<16xi32, #tpu.memory_space<smem>>
      %179 = arith.index_cast %178 : i32 to index
      %c0_95 = arith.constant 0 : index
      %180 = vector.load %arg2[%179, %c0_95] : memref<64x128xf32, #tpu.memory_space<vmem>>, vector<1x128xf32>
      %c8_96 = arith.constant 8 : index
      %c0_97 = arith.constant 0 : index
      %181 = vector.load %arg13[%c8_96, %c0_97] : memref<16x128xf32, #tpu.memory_space<vmem>>, vector<1x128xf32>
      tpu.vector_store %arg13[%c8_96, %c0_97], %180 {strides = array<i32>} : memref<16x128xf32, #tpu.memory_space<vmem>>, vector<1x128xf32>,
      %c9 = arith.constant 9 : index
      %182 = memref.load %arg1[%c9] : memref<16xi32, #tpu.memory_space<smem>>
      %183 = arith.index_cast %182 : i32 to index
      %c0_98 = arith.constant 0 : index
      %184 = vector.load %arg2[%183, %c0_98] : memref<64x128xf32, #tpu.memory_space<vmem>>, vector<1x128xf32>
      %c9_99 = arith.constant 9 : index
      %c0_100 = arith.constant 0 : index
      %185 = vector.load %arg13[%c9_99, %c0_100] : memref<16x128xf32, #tpu.memory_space<vmem>>, vector<1x128xf32>
      tpu.vector_store %arg13[%c9_99, %c0_100], %184 {strides = array<i32>} : memref<16x128xf32, #tpu.memory_space<vmem>>, vector<1x128xf32>,
      %c10 = arith.constant 10 : index
      %186 = memref.load %arg1[%c10] : memref<16xi32, #tpu.memory_space<smem>>
      %187 = arith.index_cast %186 : i32 to index
      %c0_101 = arith.constant 0 : index
      %188 = vector.load %arg2[%187, %c0_101] : memref<64x128xf32, #tpu.memory_space<vmem>>, vector<1x128xf32>
      %c10_102 = arith.constant 10 : index
      %c0_103 = arith.constant 0 : index
      %189 = vector.load %arg13[%c10_102, %c0_103] : memref<16x128xf32, #tpu.memory_space<vmem>>, vector<1x128xf32>
      tpu.vector_store %arg13[%c10_102, %c0_103], %188 {strides = array<i32>} : memref<16x128xf32, #tpu.memory_space<vmem>>, vector<1x128xf32>,
      %c11 = arith.constant 11 : index
      %190 = memref.load %arg1[%c11] : memref<16xi32, #tpu.memory_space<smem>>
      %191 = arith.index_cast %190 : i32 to index
      %c0_104 = arith.constant 0 : index
      %192 = vector.load %arg2[%191, %c0_104] : memref<64x128xf32, #tpu.memory_space<vmem>>, vector<1x128xf32>
      %c11_105 = arith.constant 11 : index
      %c0_106 = arith.constant 0 : index
      %193 = vector.load %arg13[%c11_105, %c0_106] : memref<16x128xf32, #tpu.memory_space<vmem>>, vector<1x128xf32>
      tpu.vector_store %arg13[%c11_105, %c0_106], %192 {strides = array<i32>} : memref<16x128xf32, #tpu.memory_space<vmem>>, vector<1x128xf32>,
      %c12 = arith.constant 12 : index
      %194 = memref.load %arg1[%c12] : memref<16xi32, #tpu.memory_space<smem>>
      %195 = arith.index_cast %194 : i32 to index
      %c0_107 = arith.constant 0 : index
      %196 = vector.load %arg2[%195, %c0_107] : memref<64x128xf32, #tpu.memory_space<vmem>>, vector<1x128xf32>
      %c12_108 = arith.constant 12 : index
      %c0_109 = arith.constant 0 : index
      %197 = vector.load %arg13[%c12_108, %c0_109] : memref<16x128xf32, #tpu.memory_space<vmem>>, vector<1x128xf32>
      tpu.vector_store %arg13[%c12_108, %c0_109], %196 {strides = array<i32>} : memref<16x128xf32, #tpu.memory_space<vmem>>, vector<1x128xf32>,
      %c13 = arith.constant 13 : index
      %198 = memref.load %arg1[%c13] : memref<16xi32, #tpu.memory_space<smem>>
      %199 = arith.index_cast %198 : i32 to index
      %c0_110 = arith.constant 0 : index
      %200 = vector.load %arg2[%199, %c0_110] : memref<64x128xf32, #tpu.memory_space<vmem>>, vector<1x128xf32>
      %c13_111 = arith.constant 13 : index
      %c0_112 = arith.constant 0 : index
      %201 = vector.load %arg13[%c13_111, %c0_112] : memref<16x128xf32, #tpu.memory_space<vmem>>, vector<1x128xf32>
      tpu.vector_store %arg13[%c13_111, %c0_112], %200 {strides = array<i32>} : memref<16x128xf32, #tpu.memory_space<vmem>>, vector<1x128xf32>,
      %c14 = arith.constant 14 : index
      %202 = memref.load %arg1[%c14] : memref<16xi32, #tpu.memory_space<smem>>
      %203 = arith.index_cast %202 : i32 to index
      %c0_113 = arith.constant 0 : index
      %204 = vector.load %arg2[%203, %c0_113] : memref<64x128xf32, #tpu.memory_space<vmem>>, vector<1x128xf32>
      %c14_114 = arith.constant 14 : index
      %c0_115 = arith.constant 0 : index
      %205 = vector.load %arg13[%c14_114, %c0_115] : memref<16x128xf32, #tpu.memory_space<vmem>>, vector<1x128xf32>
      tpu.vector_store %arg13[%c14_114, %c0_115], %204 {strides = array<i32>} : memref<16x128xf32, #tpu.memory_space<vmem>>, vector<1x128xf32>,
      %c15 = arith.constant 15 : index
      %206 = memref.load %arg1[%c15] : memref<16xi32, #tpu.memory_space<smem>>
      %207 = arith.index_cast %206 : i32 to index
      %c0_116 = arith.constant 0 : index
      %208 = vector.load %arg2[%207, %c0_116] : memref<64x128xf32, #tpu.memory_space<vmem>>, vector<1x128xf32>
      %c15_117 = arith.constant 15 : index
      %c0_118 = arith.constant 0 : index
      %209 = vector.load %arg13[%c15_117, %c0_118] : memref<16x128xf32, #tpu.memory_space<vmem>>, vector<1x128xf32>
      tpu.vector_store %arg13[%c15_117, %c0_118], %208 {strides = array<i32>} : memref<16x128xf32, #tpu.memory_space<vmem>>, vector<1x128xf32>,
      %c0_119 = arith.constant 0 : index
      %c0_120 = arith.constant 0 : index
      %210 = vector.load %arg13[%c0_119, %c0_120] : memref<16x128xf32, #tpu.memory_space<vmem>>, vector<16x128xf32>
      %cst_121 = arith.constant 11.3137083 : f32
      %211 = vector.broadcast %cst_121 : f32 to vector<16x128xf32>
      %212 = arith.mulf %210, %211 : vector<16x128xf32>
      %c0_122 = arith.constant 0 : index
      %c0_123 = arith.constant 0 : index
      %213 = vector.load %arg3[%c0_122, %c0_123] : memref<16x128xf32, #tpu.memory_space<vmem>>, vector<16x128xf32>
      %214 = arith.addf %212, %213 : vector<16x128xf32>
      %c0_124 = arith.constant 0 : index
      %c0_125 = arith.constant 0 : index
      %215 = vector.load %arg13[%c0_124, %c0_125] : memref<16x128xf32, #tpu.memory_space<vmem>>, vector<16x128xf32>
      tpu.vector_store %arg13[%c0_124, %c0_125], %214 {strides = array<i32>} : memref<16x128xf32, #tpu.memory_space<vmem>>, vector<16x128xf32>,
    } else {
    }
    %c0 = arith.constant 0 : index
    %c0_1 = arith.constant 0 : index
    %3 = vector.load %arg13[%c0, %c0_1] : memref<16x128xf32, #tpu.memory_space<vmem>>, vector<16x128xf32>
    %c0_2 = arith.constant 0 : index
    %c0_3 = arith.constant 0 : index
    %c0_4 = arith.constant 0 : index
    %4 = vector.load %arg11[%c0_2, %c0_3, %c0_4] : memref<1x8x128xf32, #tpu.memory_space<vmem>>, vector<1x1x128xf32>
    %5 = vector.shape_cast %4 : vector<1x1x128xf32> to vector<1x128xf32>
    %c0_5 = arith.constant 0 : index
    %c1 = arith.constant 1 : index
    %c0_6 = arith.constant 0 : index
    %6 = vector.load %arg11[%c0_5, %c1, %c0_6] : memref<1x8x128xf32, #tpu.memory_space<vmem>>, vector<1x1x128xf32>
    %7 = vector.shape_cast %6 : vector<1x1x128xf32> to vector<1x128xf32>
    %c0_7 = arith.constant 0 : index
    %c2 = arith.constant 2 : index
    %c0_8 = arith.constant 0 : index
    %8 = vector.load %arg11[%c0_7, %c2, %c0_8] : memref<1x8x128xf32, #tpu.memory_space<vmem>>, vector<1x1x128xf32>
    %9 = vector.shape_cast %8 : vector<1x1x128xf32> to vector<1x128xf32>
    %c0_9 = arith.constant 0 : index
    %c3 = arith.constant 3 : index
    %c0_10 = arith.constant 0 : index
    %10 = vector.load %arg11[%c0_9, %c3, %c0_10] : memref<1x8x128xf32, #tpu.memory_space<vmem>>, vector<1x1x128xf32>
    %11 = vector.shape_cast %10 : vector<1x1x128xf32> to vector<1x128xf32>
    %c0_11 = arith.constant 0 : index
    %c4 = arith.constant 4 : index
    %c0_12 = arith.constant 0 : index
    %12 = vector.load %arg11[%c0_11, %c4, %c0_12] : memref<1x8x128xf32, #tpu.memory_space<vmem>>, vector<1x1x128xf32>
    %13 = vector.shape_cast %12 : vector<1x1x128xf32> to vector<1x128xf32>
    %c0_13 = arith.constant 0 : index
    %c5 = arith.constant 5 : index
    %c0_14 = arith.constant 0 : index
    %14 = vector.load %arg11[%c0_13, %c5, %c0_14] : memref<1x8x128xf32, #tpu.memory_space<vmem>>, vector<1x1x128xf32>
    %15 = vector.shape_cast %14 : vector<1x1x128xf32> to vector<1x128xf32>
    %16 = arith.truncf %3 : vector<16x128xf32> to vector<16x128xbf16>
    %c0_15 = arith.constant 0 : index
    %c0_16 = arith.constant 0 : index
    %c0_17 = arith.constant 0 : index
    %17 = vector.load %arg5[%c0_15, %c0_16, %c0_17] : memref<1x128x384xbf16, #tpu.memory_space<vmem>>, vector<1x128x384xbf16>
    %18 = vector.shape_cast %17 : vector<1x128x384xbf16> to vector<128x384xbf16>
    %cst = arith.constant dense<0.000000e+00> : vector<16x384xf32>
    %19 = tpu.matmul %16, %18, %cst {dimension_numbers = #tpu.dot_dimension_numbers<[1], [0], [0], [1], [0, 0, 1, 1], [], []>} : vector<16x128xbf16>, vector<128x384xbf16>, vector<16x384xf32> -> vector<16x384xf32>
    %c0_18 = arith.constant 0 : index
    %c0_19 = arith.constant 0 : index
    %c0_20 = arith.constant 0 : index
    %20 = vector.load %arg6[%c0_18, %c0_19, %c0_20] : memref<1x1x384xf32, #tpu.memory_space<vmem>>, vector<1x1x384xf32>
    %21 = vector.shape_cast %20 : vector<1x1x384xf32> to vector<1x384xf32>
    %22 = vector.broadcast %21 : vector<1x384xf32> to vector<16x384xf32>
    %23 = arith.addf %19, %22 : vector<16x384xf32>
    %c0_21 = arith.constant 0 : index
    %c0_22 = arith.constant 0 : index
    %24 = vector.load %arg4[%c0_21, %c0_22] : memref<16x16xf32, #tpu.memory_space<vmem>>, vector<16x16xf32>
    %25 = vector.extract_strided_slice %23 {offsets = [0, 0], sizes = [16, 64], strides = [1, 1]} : vector<16x384xf32> to vector<16x64xf32>
    %26 = arith.truncf %25 : vector<16x64xf32> to vector<16x64xbf16>
    %27 = vector.extract_strided_slice %23 {offsets = [0, 128], sizes = [16, 64], strides = [1, 1]} : vector<16x384xf32> to vector<16x64xf32>
    %28 = arith.truncf %27 : vector<16x64xf32> to vector<16x64xbf16>
    %29 = vector.extract_strided_slice %23 {offsets = [0, 256], sizes = [16, 64], strides = [1, 1]} : vector<16x384xf32> to vector<16x64xf32>
    %30 = arith.truncf %29 : vector<16x64xf32> to vector<16x64xbf16>
    %cst_23 = arith.constant dense<0.000000e+00> : vector<16x16xf32>
    %31 = tpu.matmul %26, %28, %cst_23 {dimension_numbers = #tpu.dot_dimension_numbers<[1], [1], [0], [0], [0, 0, 1, 0], [], []>} : vector<16x64xbf16>, vector<16x64xbf16>, vector<16x16xf32> -> vector<16x16xf32>
    %cst_24 = arith.constant 1.250000e-01 : f32
    %32 = vector.broadcast %cst_24 : f32 to vector<16x16xf32>
    %33 = arith.mulf %31, %32 : vector<16x16xf32>
    %34 = arith.addf %33, %24 : vector<16x16xf32>
    %cst_25 = arith.constant dense<0xFF800000> : vector<16xf32>
    %35 = vector.multi_reduction <maximumf>, %34, %cst_25 [1] : vector<16x16xf32> to vector<16xf32>
    %36 = vector.shape_cast %35 : vector<16xf32> to vector<16x1xf32>
    %37 = vector.broadcast %36 : vector<16x1xf32> to vector<16x16xf32>
    %38 = arith.subf %34, %37 : vector<16x16xf32>
    %39 = math.exp %38 : vector<16x16xf32>
    %cst_26 = arith.constant dense<0.000000e+00> : vector<16xf32>
    %40 = vector.multi_reduction <add>, %39, %cst_26 [1] : vector<16x16xf32> to vector<16xf32>
    %41 = vector.shape_cast %40 : vector<16xf32> to vector<16x1xf32>
    %42 = tpu.reciprocal %41 {approx = true} : vector<16x1xf32> -> vector<16x1xf32>
    %43 = vector.broadcast %42 : vector<16x1xf32> to vector<16x16xf32>
    %44 = arith.mulf %39, %43 : vector<16x16xf32>
    %45 = arith.truncf %44 : vector<16x16xf32> to vector<16x16xbf16>
    %cst_27 = arith.constant dense<0.000000e+00> : vector<16x64xf32>
    %46 = tpu.matmul %45, %30, %cst_27 {dimension_numbers = #tpu.dot_dimension_numbers<[1], [0], [0], [1], [0, 0, 1, 1], [], []>} : vector<16x16xbf16>, vector<16x64xbf16>, vector<16x64xf32> -> vector<16x64xf32>
    %47 = arith.truncf %46 : vector<16x64xf32> to vector<16x64xbf16>
    %c0_28 = arith.constant 0 : index
    %c0_29 = arith.constant 0 : index
    %c0_30 = arith.constant 0 : index
    %48 = vector.load %arg7[%c0_28, %c0_29, %c0_30] : memref<1x128x128xbf16, #tpu.memory_space<vmem>>, vector<1x64x128xbf16>
    %49 = vector.shape_cast %48 : vector<1x64x128xbf16> to vector<64x128xbf16>
    %cst_31 = arith.constant dense<0.000000e+00> : vector<16x128xf32>
    %50 = tpu.matmul %47, %49, %cst_31 {dimension_numbers = #tpu.dot_dimension_numbers<[1], [0], [0], [1], [0, 0, 1, 1], [], []>} : vector<16x64xbf16>, vector<64x128xbf16>, vector<16x128xf32> -> vector<16x128xf32>
    %51 = vector.extract_strided_slice %23 {offsets = [0, 64], sizes = [16, 64], strides = [1, 1]} : vector<16x384xf32> to vector<16x64xf32>
    %52 = arith.truncf %51 : vector<16x64xf32> to vector<16x64xbf16>
    %53 = vector.extract_strided_slice %23 {offsets = [0, 192], sizes = [16, 64], strides = [1, 1]} : vector<16x384xf32> to vector<16x64xf32>
    %54 = arith.truncf %53 : vector<16x64xf32> to vector<16x64xbf16>
    %55 = vector.extract_strided_slice %23 {offsets = [0, 320], sizes = [16, 64], strides = [1, 1]} : vector<16x384xf32> to vector<16x64xf32>
    %56 = arith.truncf %55 : vector<16x64xf32> to vector<16x64xbf16>
    %cst_32 = arith.constant dense<0.000000e+00> : vector<16x16xf32>
    %57 = tpu.matmul %52, %54, %cst_32 {dimension_numbers = #tpu.dot_dimension_numbers<[1], [1], [0], [0], [0, 0, 1, 0], [], []>} : vector<16x64xbf16>, vector<16x64xbf16>, vector<16x16xf32> -> vector<16x16xf32>
    %cst_33 = arith.constant 1.250000e-01 : f32
    %58 = vector.broadcast %cst_33 : f32 to vector<16x16xf32>
    %59 = arith.mulf %57, %58 : vector<16x16xf32>
    %60 = arith.addf %59, %24 : vector<16x16xf32>
    %cst_34 = arith.constant dense<0xFF800000> : vector<16xf32>
    %61 = vector.multi_reduction <maximumf>, %60, %cst_34 [1] : vector<16x16xf32> to vector<16xf32>
    %62 = vector.shape_cast %61 : vector<16xf32> to vector<16x1xf32>
    %63 = vector.broadcast %62 : vector<16x1xf32> to vector<16x16xf32>
    %64 = arith.subf %60, %63 : vector<16x16xf32>
    %65 = math.exp %64 : vector<16x16xf32>
    %cst_35 = arith.constant dense<0.000000e+00> : vector<16xf32>
    %66 = vector.multi_reduction <add>, %65, %cst_35 [1] : vector<16x16xf32> to vector<16xf32>
    %67 = vector.shape_cast %66 : vector<16xf32> to vector<16x1xf32>
    %68 = tpu.reciprocal %67 {approx = true} : vector<16x1xf32> -> vector<16x1xf32>
    %69 = vector.broadcast %68 : vector<16x1xf32> to vector<16x16xf32>
    %70 = arith.mulf %65, %69 : vector<16x16xf32>
    %71 = arith.truncf %70 : vector<16x16xf32> to vector<16x16xbf16>
    %cst_36 = arith.constant dense<0.000000e+00> : vector<16x64xf32>
    %72 = tpu.matmul %71, %56, %cst_36 {dimension_numbers = #tpu.dot_dimension_numbers<[1], [0], [0], [1], [0, 0, 1, 1], [], []>} : vector<16x16xbf16>, vector<16x64xbf16>, vector<16x64xf32> -> vector<16x64xf32>
    %73 = arith.truncf %72 : vector<16x64xf32> to vector<16x64xbf16>
    %c0_37 = arith.constant 0 : index
    %c64 = arith.constant 64 : index
    %c0_38 = arith.constant 0 : index
    %74 = vector.load %arg7[%c0_37, %c64, %c0_38] : memref<1x128x128xbf16, #tpu.memory_space<vmem>>, vector<1x64x128xbf16>
    %75 = vector.shape_cast %74 : vector<1x64x128xbf16> to vector<64x128xbf16>
    %cst_39 = arith.constant dense<0.000000e+00> : vector<16x128xf32>
    %76 = tpu.matmul %73, %75, %cst_39 {dimension_numbers = #tpu.dot_dimension_numbers<[1], [0], [0], [1], [0, 0, 1, 1], [], []>} : vector<16x64xbf16>, vector<64x128xbf16>, vector<16x128xf32> -> vector<16x128xf32>
    %77 = arith.addf %50, %76 : vector<16x128xf32>
    %78 = vector.broadcast %5 : vector<1x128xf32> to vector<16x128xf32>
    %79 = arith.addf %77, %78 : vector<16x128xf32>
    %80 = arith.addf %3, %79 : vector<16x128xf32>
    %cst_40 = arith.constant dense<0.000000e+00> : vector<16xf32>
    %81 = vector.multi_reduction <add>, %80, %cst_40 [1] : vector<16x128xf32> to vector<16xf32>
    %82 = vector.shape_cast %81 : vector<16xf32> to vector<16x1xf32>
    %cst_41 = arith.constant 1.280000e+02 : f32
    %83 = vector.broadcast %cst_41 : f32 to vector<16x1xf32>
    %84 = arith.divf %82, %83 : vector<16x1xf32>
    %85 = arith.mulf %80, %80 : vector<16x128xf32>
    %cst_42 = arith.constant dense<0.000000e+00> : vector<16xf32>
    %86 = vector.multi_reduction <add>, %85, %cst_42 [1] : vector<16x128xf32> to vector<16xf32>
    %87 = vector.shape_cast %86 : vector<16xf32> to vector<16x1xf32>
    %cst_43 = arith.constant 1.280000e+02 : f32
    %88 = vector.broadcast %cst_43 : f32 to vector<16x1xf32>
    %89 = arith.divf %87, %88 : vector<16x1xf32>
    %90 = arith.mulf %84, %84 : vector<16x1xf32>
    %91 = arith.subf %89, %90 : vector<16x1xf32>
    %cst_44 = arith.constant 9.99999974E-6 : f32
    %92 = vector.broadcast %cst_44 : f32 to vector<16x1xf32>
    %93 = arith.addf %91, %92 : vector<16x1xf32>
    %94 = math.rsqrt %93 : vector<16x1xf32>
    %95 = vector.broadcast %84 : vector<16x1xf32> to vector<16x128xf32>
    %96 = arith.subf %80, %95 : vector<16x128xf32>
    %97 = vector.broadcast %94 : vector<16x1xf32> to vector<16x128xf32>
    %98 = arith.mulf %96, %97 : vector<16x128xf32>
    %99 = vector.broadcast %7 : vector<1x128xf32> to vector<16x128xf32>
    %100 = arith.mulf %98, %99 : vector<16x128xf32>
    %101 = vector.broadcast %9 : vector<1x128xf32> to vector<16x128xf32>
    %102 = arith.addf %100, %101 : vector<16x128xf32>
    %103 = arith.truncf %102 : vector<16x128xf32> to vector<16x128xbf16>
    %c0_45 = arith.constant 0 : index
    %c0_46 = arith.constant 0 : index
    %c0_47 = arith.constant 0 : index
    %104 = vector.load %arg8[%c0_45, %c0_46, %c0_47] : memref<1x128x2048xbf16, #tpu.memory_space<vmem>>, vector<1x128x2048xbf16>
    %105 = vector.shape_cast %104 : vector<1x128x2048xbf16> to vector<128x2048xbf16>
    %cst_48 = arith.constant dense<0.000000e+00> : vector<16x2048xf32>
    %106 = tpu.matmul %103, %105, %cst_48 {dimension_numbers = #tpu.dot_dimension_numbers<[1], [0], [0], [1], [0, 0, 1, 1], [], []>} : vector<16x128xbf16>, vector<128x2048xbf16>, vector<16x2048xf32> -> vector<16x2048xf32>
    %c0_49 = arith.constant 0 : index
    %c0_50 = arith.constant 0 : index
    %c0_51 = arith.constant 0 : index
    %107 = vector.load %arg9[%c0_49, %c0_50, %c0_51] : memref<1x1x2048xf32, #tpu.memory_space<vmem>>, vector<1x1x2048xf32>
    %108 = vector.shape_cast %107 : vector<1x1x2048xf32> to vector<1x2048xf32>
    %109 = vector.broadcast %108 : vector<1x2048xf32> to vector<16x2048xf32>
    %110 = arith.addf %106, %109 : vector<16x2048xf32>
    %cst_52 = arith.constant 0.000000e+00 : f32
    %111 = vector.broadcast %cst_52 : f32 to vector<16x2048xf32>
    %112 = arith.maximumf %110, %111 : vector<16x2048xf32>
    %113 = arith.truncf %112 : vector<16x2048xf32> to vector<16x2048xbf16>
    %c0_53 = arith.constant 0 : index
    %c0_54 = arith.constant 0 : index
    %c0_55 = arith.constant 0 : index
    %114 = vector.load %arg10[%c0_53, %c0_54, %c0_55] : memref<1x2048x128xbf16, #tpu.memory_space<vmem>>, vector<1x2048x128xbf16>
    %115 = vector.shape_cast %114 : vector<1x2048x128xbf16> to vector<2048x128xbf16>
    %cst_56 = arith.constant dense<0.000000e+00> : vector<16x128xf32>
    %116 = tpu.matmul %113, %115, %cst_56 {dimension_numbers = #tpu.dot_dimension_numbers<[1], [0], [0], [1], [0, 0, 1, 1], [], []>} : vector<16x2048xbf16>, vector<2048x128xbf16>, vector<16x128xf32> -> vector<16x128xf32>
    %117 = vector.broadcast %11 : vector<1x128xf32> to vector<16x128xf32>
    %118 = arith.addf %116, %117 : vector<16x128xf32>
    %119 = arith.addf %102, %118 : vector<16x128xf32>
    %cst_57 = arith.constant dense<0.000000e+00> : vector<16xf32>
    %120 = vector.multi_reduction <add>, %119, %cst_57 [1] : vector<16x128xf32> to vector<16xf32>
    %121 = vector.shape_cast %120 : vector<16xf32> to vector<16x1xf32>
    %cst_58 = arith.constant 1.280000e+02 : f32
    %122 = vector.broadcast %cst_58 : f32 to vector<16x1xf32>
    %123 = arith.divf %121, %122 : vector<16x1xf32>
    %124 = arith.mulf %119, %119 : vector<16x128xf32>
    %cst_59 = arith.constant dense<0.000000e+00> : vector<16xf32>
    %125 = vector.multi_reduction <add>, %124, %cst_59 [1] : vector<16x128xf32> to vector<16xf32>
    %126 = vector.shape_cast %125 : vector<16xf32> to vector<16x1xf32>
    %cst_60 = arith.constant 1.280000e+02 : f32
    %127 = vector.broadcast %cst_60 : f32 to vector<16x1xf32>
    %128 = arith.divf %126, %127 : vector<16x1xf32>
    %129 = arith.mulf %123, %123 : vector<16x1xf32>
    %130 = arith.subf %128, %129 : vector<16x1xf32>
    %cst_61 = arith.constant 9.99999974E-6 : f32
    %131 = vector.broadcast %cst_61 : f32 to vector<16x1xf32>
    %132 = arith.addf %130, %131 : vector<16x1xf32>
    %133 = math.rsqrt %132 : vector<16x1xf32>
    %134 = vector.broadcast %123 : vector<16x1xf32> to vector<16x128xf32>
    %135 = arith.subf %119, %134 : vector<16x128xf32>
    %136 = vector.broadcast %133 : vector<16x1xf32> to vector<16x128xf32>
    %137 = arith.mulf %135, %136 : vector<16x128xf32>
    %138 = vector.broadcast %13 : vector<1x128xf32> to vector<16x128xf32>
    %139 = arith.mulf %137, %138 : vector<16x128xf32>
    %140 = vector.broadcast %15 : vector<1x128xf32> to vector<16x128xf32>
    %141 = arith.addf %139, %140 : vector<16x128xf32>
    %c0_62 = arith.constant 0 : index
    %c0_63 = arith.constant 0 : index
    %142 = vector.load %arg13[%c0_62, %c0_63] : memref<16x128xf32, #tpu.memory_space<vmem>>, vector<16x128xf32>
    tpu.vector_store %arg13[%c0_62, %c0_63], %141 {strides = array<i32>} : memref<16x128xf32, #tpu.memory_space<vmem>>, vector<16x128xf32>,
    %c1_i32 = arith.constant 1 : i32
    %143 = arith.cmpi eq, %arg0, %c1_i32 : i32
    %144 = arith.extui %143 : i1 to i32
    %c0_i32_64 = arith.constant 0 : i32
    %145 = arith.cmpi ne, %144, %c0_i32_64 : i32
    scf.if %145 {
      %c0_65 = arith.constant 0 : index
      %c0_66 = arith.constant 0 : index
      %146 = vector.load %arg12[%c0_65, %c0_66] : memref<16x128xf32, #tpu.memory_space<vmem>>, vector<16x128xf32>
      tpu.vector_store %arg12[%c0_65, %c0_66], %141 {strides = array<i32>} : memref<16x128xf32, #tpu.memory_space<vmem>>, vector<16x128xf32>,
    } else {
    }
    return
  }
  func.func @transform_0(%arg0: i32, %arg1: memref<16xi32, #tpu.memory_space<smem>>) -> (i32, i32) {
    %c0_i32 = arith.constant 0 : i32
    %c0_i32_0 = arith.constant 0 : i32
    %c0_i32_1 = arith.constant 0 : i32
    return %c0_i32, %c0_i32_0 : i32, i32
  }
  func.func @transform_1(%arg0: i32, %arg1: memref<16xi32, #tpu.memory_space<smem>>) -> (i32, i32) {
    %c0_i32 = arith.constant 0 : i32
    %c0_i32_0 = arith.constant 0 : i32
    %c0_i32_1 = arith.constant 0 : i32
    return %c0_i32, %c0_i32_0 : i32, i32
  }
  func.func @transform_2(%arg0: i32, %arg1: memref<16xi32, #tpu.memory_space<smem>>) -> (i32, i32) {
    %c0_i32 = arith.constant 0 : i32
    %c0_i32_0 = arith.constant 0 : i32
    %c0_i32_1 = arith.constant 0 : i32
    return %c0_i32, %c0_i32_0 : i32, i32
  }
  func.func @transform_3(%arg0: i32, %arg1: memref<16xi32, #tpu.memory_space<smem>>) -> (i32, i32, i32) {
    %c0_i32 = arith.constant 0 : i32
    %c0_i32_0 = arith.constant 0 : i32
    %c0_i32_1 = arith.constant 0 : i32
    return %arg0, %c0_i32, %c0_i32_0 : i32, i32, i32
  }
  func.func @transform_4(%arg0: i32, %arg1: memref<16xi32, #tpu.memory_space<smem>>) -> (i32, i32, i32) {
    %c0_i32 = arith.constant 0 : i32
    %c0_i32_0 = arith.constant 0 : i32
    %c0_i32_1 = arith.constant 0 : i32
    return %arg0, %c0_i32, %c0_i32_0 : i32, i32, i32
  }
  func.func @transform_5(%arg0: i32, %arg1: memref<16xi32, #tpu.memory_space<smem>>) -> (i32, i32, i32) {
    %c0_i32 = arith.constant 0 : i32
    %c0_i32_0 = arith.constant 0 : i32
    %c0_i32_1 = arith.constant 0 : i32
    return %arg0, %c0_i32, %c0_i32_0 : i32, i32, i32
  }
  func.func @transform_6(%arg0: i32, %arg1: memref<16xi32, #tpu.memory_space<smem>>) -> (i32, i32, i32) {
    %c0_i32 = arith.constant 0 : i32
    %c0_i32_0 = arith.constant 0 : i32
    %c0_i32_1 = arith.constant 0 : i32
    return %arg0, %c0_i32, %c0_i32_0 : i32, i32, i32
  }
  func.func @transform_7(%arg0: i32, %arg1: memref<16xi32, #tpu.memory_space<smem>>) -> (i32, i32, i32) {
    %c0_i32 = arith.constant 0 : i32
    %c0_i32_0 = arith.constant 0 : i32
    %c0_i32_1 = arith.constant 0 : i32
    return %arg0, %c0_i32, %c0_i32_0 : i32, i32, i32
  }
  func.func @transform_8(%arg0: i32, %arg1: memref<16xi32, #tpu.memory_space<smem>>) -> (i32, i32, i32) {
    %c0_i32 = arith.constant 0 : i32
    %c0_i32_0 = arith.constant 0 : i32
    %c0_i32_1 = arith.constant 0 : i32
    return %arg0, %c0_i32, %c0_i32_0 : i32, i32, i32
  }
  func.func @transform_9(%arg0: i32, %arg1: memref<16xi32, #tpu.memory_space<smem>>) -> (i32, i32, i32) {
    %c0_i32 = arith.constant 0 : i32
    %c0_i32_0 = arith.constant 0 : i32
    %c0_i32_1 = arith.constant 0 : i32
    return %arg0, %c0_i32, %c0_i32_0 : i32, i32, i32
  }
  func.func @transform_10(%arg0: i32, %arg1: memref<16xi32, #tpu.memory_space<smem>>) -> (i32, i32) {
    %c0_i32 = arith.constant 0 : i32
    %c0_i32_0 = arith.constant 0 : i32
    %c0_i32_1 = arith.constant 0 : i32
    return %c0_i32, %c0_i32_0 : i32, i32
  }
}

</mosaic_0001>

<bundles_post_ra>
// kernel: transformer_encoder_forward.1
= control target key start
LH: loop header
LB: loop body
LE: loop exit
PB: predicated region body
PF: predicated region fallthrough
CT: control target
= control target key end

     0   :  { %s5780_s20 = smov [#allocation4]   ;;  %s6683_s0 = inlined_call_operand.vmem [shape: s32[16], index: 0, kind: input, shape index: {}]   ;;  %s6684_s1 = inlined_call_operand.hbm [shape: f32[64,128], index: 1, kind: input, shape index: {}]   ;;  %s6685_s2 = inlined_call_operand.vmem [shape: f32[16,128], index: 2, kind: input, shape index: {}]   ;;  %s6686_s3 = inlined_call_operand.hbm [shape: f32[16,16], index: 3, kind: input, shape index: {}]   ;;  %s6687_s4 = inlined_call_operand.hbm [shape: bf16[2,128,384], index: 4, kind: input, shape index: {}]   ;;  %s6688_s5 = inlined_call_operand.vmem [shape: f32[2,1,384], index: 5, kind: input, shape index: {}]   ;;  %s6689_s6 = inlined_call_operand.hbm [shape: bf16[2,128,128], index: 6, kind: input, shape index: {}]   ;;  %s6690_s7 = inlined_call_operand.hbm [shape: bf16[2,128,2048], index: 7, kind: input, shape index: {}]   ;;  %s6691_s8 = inlined_call_operand.hbm [shape: f32[2,1,2048], index: 8, kind: input, shape index: {}]   ;;  %s6692_s9 = inlined_call_operand.hbm [shape: bf16[2,2048,128], index: 9, kind: input, shape index: {}]   ;;  %s6693_s10 = inlined_call_operand.hbm [shape: f32[2,8,128], index: 10, kind: input, shape index: {}]   ;;  %s6694_s11 = inlined_call_operand.hbm [shape: f32[16,128], index: 11, kind: output, shape index: {}]  }
   0x1   :  { %6704 = sst [smem:[#allocation25_spill]] %s6684_s1  ;;  %s17_s19 = sshll.u32 %s6683_s0, 4  ;;  %s18_s19 = int_to_ptr.vmem [resolvable:$true] %s17_s19 }
   0x2   :  { %6705 = sst [smem:[#allocation26_spill]] %s6685_s2 }
   0x3   :  { %6706 = sst [smem:[#allocation27_spill]] %s6687_s4 }
   0x4   :  { %6707 = sst [smem:[#allocation28_spill]] %s6688_s5 }
   0x5   :  { %6708 = sst [smem:[#allocation29_spill]] %s6689_s6 }
   0x6   :  { %6709 = sst [smem:[#allocation30_spill]] %s6694_s11 }
   0x7   :  { %20 = dma.vmem_to_smem %s18_s19, 16, %s5780_s20, [#allocation3] }
   0x8   :  { %5746 = dma.done.wait [#allocation3], 16 }
   0x9   :  { %5747 = vsyncadd [#allocation3], 4294967280 }
   0xa   :  { %23 = sfence }
   0xb   :  { %24 = vsyncpa [#allocation6], 0 }
   0xc   :  { %25 = vsyncpa [#allocation9], 0 }
   0xd   :  { %26 = vsyncpa [#allocation7], 0  ;;  %s5858_s21 = smov 0   ;;  %s5860_s22 = smov 0  }
   0xe   :  { %s5862_s23 = smov 0   ;;  %s5864_s24 = smov 0  }
   0xf LB: > { %6710 = sst [smem:[#allocation22_spill]] %s5774_s23  ;;  %s5877_s0 = sadd.s32 4294967295, %s5778_s24   ;;  %s5778_s24 = sphi %s5864_s24, %s6730_s24   ;;  %s5774_s23 = sphi %s5862_s23, %s6732_s23   ;;  %s5770_s22 = sphi %s5860_s22, %s6734_s22   ;;  %s5766_s21 = sphi %s5858_s21, %s6733_s21  }
  0x10   : > { %s5880_s25 = sadd.s32 1, %s5778_s24   ;;  %s102_s27 = sadd.s32 1, %s5774_s23 }
  0x11   : > { %6711 = sst [smem:[#allocation23_spill]] %s5880_s25  ;;  %s99_s26 = ssub.s32 %s5778_s24, %s5880_s25 }
  0x12   : > { %p100_p0 = scmp.eq.s32.totalorder %s99_s26, 0  ;;  %p109_p1 = scmp.ne.s32.totalorder %s5774_s23, %s5770_s22 }
  0x13   : > { %p110_p2 = scmp.eq.s32.totalorder %s5778_s24, 0  ;;  %p115_p3 = scmp.ne.s32.totalorder %s5770_s22, %s5766_s21 }
  0x14   : > { %s5890_s28 = scalar_select %p100_p0, %s5774_s23, %s102_s27  }
  0x15   : > { %p5892_p4 = por %p110_p2, %p109_p1  ;;  %p116_p5 = scmp.eq.s32.totalorder %s5877_s0, 0 }
  0x16   : > { %6712 = sst [smem:[#allocation24_spill]] %s5890_s28  ;;  %p3814_p6 = scmp.ge.s32.totalorder %s5778_s24, 1 }
  0x17   : > { %p303_p7 = scmp.lt.s32.totalorder %s5778_s24, 3  ;;  %p5901_p8 = por %p116_p5, %p115_p3 }
  0x18   : > { %p3815_p9 = scmp.ne.s32.totalorder %s5877_s0, 0  ;;  %s6716_s1 = sld [smem:[#allocation25_spill]] }
  0x19   : > { %p5906_p10 = pnand %p3814_p6, %p303_p7  ;;  %s5781_s16 = smov [#allocation5]  }
  0x1a   : > { %s316_s17 = sshll.u32 %s5781_s16, 4  ;;  %p5366_p13 = scmp.lt.s32.totalorder %s5778_s24, 2  ;;  %s317_s17 = int_to_ptr.vmem [resolvable:$true] %s316_s17 }
  0x1b   : > { %p5338_p11 = pneg %p5906_p10  ;;  %s347_s19 = sand.u32 1, %s5778_s24  }
  0x1c   : > { %s6698_s20 = smov 128   ;;  %s6699_s21 = smov 8  }
  0x1d   : > { %p5917_p12 = pnand %p5338_p11, %p116_p5  ;;  %s5929_s26 = sand.u32 1, %s5774_s23  }
  0x1e   : > { %s314_s15 = sshll.u32 %s6716_s1, 4  ;;  %s5310_s27 = smul.u32 192, %s5929_s26  ;;  %s315_s15 = int_to_ptr.hbm [resolvable:$true] %s314_s15 }
  0x1f   : > { %5341 = dma.hbm_to_vmem [thread:$0]  (!%p5917_p12), %s315_s15, 1024, %s317_s17, [#allocation6], %s6698_s20, %s6698_s20, %s6699_s21  }
  0x20   : > { %p5934_p0 = pnand %p5366_p13, %p5892_p4  ;;  %s5311_s14 = smul.u32 192, %s5778_s24 }
  0x21   : > { %s6719_s4 = sld [smem:[#allocation27_spill]]  ;;  %s351_s25 = scalar_lea.vmem [#allocation10], %s5310_s27 }
  0x22   : > { %s359_s11 = sshll.u32 %s351_s25, 4  ;;  %s5942_s15 = scalar_lea.sflag [#allocation6], %s347_s19  ;;  %s360_s11 = int_to_ptr.vmem [resolvable:$true] %s359_s11 }
  0x23   : > { %p5946_p2 = pneg %p5934_p0 }
  0x27   : > { %s356_s28 = scalar_lea.hbm %s6719_s4, %s5311_s14 }
  0x28   : > { %s357_s2 = sshll.u32 %s356_s28, 4  ;;  %s5499_s28 = scalar_lea.hbm %s6719_s4, 384  ;;  %s358_s2 = int_to_ptr.hbm [resolvable:$true] %s357_s2 }
  0x29   : > { %s5492_s17 = sshra.s32 %s358_s2, 4  ;;  %s5493_s17 = int_to_ptr.hbm [resolvable:$true] %s5492_s17 }
  0x2a   : > { %s5494_s29 = scalar_lea.hbm %s5493_s17, 192  ;;  %p5500_p6 = scmp.lt.s32.totalorder %s5493_s17, %s6719_s4 }
  0x2b   : > { %p5495_p1 = scmp.ne.s32.totalorder %s5493_s17, %s5494_s29  ;;  %p5501_p7 = scmp.lt.s32.totalorder %s5499_s28, %s5494_s29 }
  0x2d   : > { %p5497_p3 = pnand %p5946_p2, %p5495_p1  ;;  %p5502_p11 = por %p5501_p7, %p5500_p6 }
  0x2f   : > { %p5498_p4 = pneg %p5497_p3 }
  0x31   : > { %p5503_p13 = pnand %p5502_p11, %p5498_p4 }
  0x33   : > { %5506 = shalt.err (!%p5503_p13)
}
  0x34   : > { %s5784_s14 = smov 192   ;;  %s5785_s16 = smov 12  }
  0x35   : > { %5348 = dma.hbm_to_vmem [thread:$0]  (!%p5934_p0), %s358_s2, 3072, %s360_s11, %s5942_s15, %s5784_s14, %s5784_s14, %s5785_s16  }
  0x36   : > { %s3819_s21 = sshll.u32 %s5929_s26, 6  ;;  %s5019_s1 = sshll.u32 %s5778_s24, 6 }
  0x37   : > { %s6721_s6 = sld [smem:[#allocation29_spill]]  ;;  %s380_s29 = scalar_lea.vmem [#allocation11], %s3819_s21 }
  0x38   : > { %s388_s28 = sshll.u32 %s380_s29, 4  ;;  %s389_s28 = int_to_ptr.vmem [resolvable:$true] %s388_s28 }
  0x3d   : > { %s385_s27 = scalar_lea.hbm %s6721_s6, %s5019_s1  ;;  %s5529_s11 = scalar_lea.hbm %s6721_s6, 128 }
  0x3e   : > { %s386_s17 = sshll.u32 %s385_s27, 4  ;;  %s387_s17 = int_to_ptr.hbm [resolvable:$true] %s386_s17 }
  0x3f   : > { %s5522_s19 = sshra.s32 %s387_s17, 4  ;;  %s5523_s19 = int_to_ptr.hbm [resolvable:$true] %s5522_s19 }
  0x40   : > { %s5524_s4 = scalar_lea.hbm %s5523_s19, 64  ;;  %p5530_p6 = scmp.lt.s32.totalorder %s5523_s19, %s6721_s6 }
  0x41   : > { %p5525_p1 = scmp.ne.s32.totalorder %s5523_s19, %s5524_s4  ;;  %p5531_p7 = scmp.lt.s32.totalorder %s5529_s11, %s5524_s4 }
  0x43   : > { %p5527_p3 = pnand %p5525_p1, %p5946_p2  ;;  %p5532_p11 = por %p5531_p7, %p5530_p6 }
  0x45   : > { %p5528_p4 = pneg %p5527_p3 }
  0x47   : > { %p5533_p13 = pnand %p5532_p11, %p5528_p4 }
  0x49   : > { %5536 = shalt.err (!%p5533_p13)
}
  0x4a   : > { %s5786_s23 = smov 64   ;;  %s6701_s21 = smov 4  }
  0x4b   : > { %5351 = dma.hbm_to_vmem [thread:$0]  (!%p5934_p0), %s387_s17, 1024, %s389_s28, %s5942_s15, %s5786_s23, %s5786_s23, %s6701_s21  }
  0x4c   : > { %s6702_s5 = sshll.u32 %s5929_s26, 10  ;;  %s6703_s4 = sshll.u32 %s5778_s24, 10 }
  0x4d   : > { %s407_s27 = scalar_lea.hbm %s6690_s7, %s6703_s4  ;;  %s402_s19 = scalar_lea.vmem [#allocation12], %s6702_s5 }
  0x4e   : > { %s408_s29 = sshll.u32 %s407_s27, 4  ;;  %s410_s2 = sshll.u32 %s402_s19, 4  ;;  %s409_s29 = int_to_ptr.hbm [resolvable:$true] %s408_s29  ;;  %s411_s2 = int_to_ptr.vmem [resolvable:$true] %s410_s2 }
  0x4f   : > { %s3825_s11 = sshll.u32 %s5929_s26, 4  ;;  %s5552_s14 = sshra.s32 %s409_s29, 4  ;;  %s5553_s14 = int_to_ptr.hbm [resolvable:$true] %s5552_s14 }
  0x50   : > { %s5554_s16 = scalar_lea.hbm %s5553_s14, 1024  ;;  %s5559_s21 = scalar_lea.hbm %s6690_s7, 2048 }
  0x51   : > { %p5555_p1 = scmp.ne.s32.totalorder %s5553_s14, %s5554_s16  ;;  %p5560_p6 = scmp.lt.s32.totalorder %s5553_s14, %s6690_s7 }
  0x52   : > { %p5561_p7 = scmp.lt.s32.totalorder %s5559_s21, %s5554_s16 }
  0x53   : > { %p5557_p3 = pnand %p5555_p1, %p5946_p2 }
  0x54   : > { %p5562_p11 = por %p5561_p7, %p5560_p6 }
  0x55   : > { %p5558_p4 = pneg %p5557_p3 }
  0x57   : > { %p5563_p13 = pnand %p5562_p11, %p5558_p4 }
  0x59   : > { %5566 = shalt.err (!%p5563_p13)
}
  0x5a   : > { %s5788_s27 = smov 1024   ;;  %s3826_s19 = sshll.u32 %s5778_s24, 4 }
  0x5b   : > { %5354 = dma.hbm_to_vmem [thread:$0]  (!%p5934_p0), %s409_s29, 16384, %s411_s2, %s5942_s15, %s5788_s27, %s5788_s27, %s5786_s23  }
  0x5c   : > { %s428_s28 = scalar_lea.hbm %s6691_s8, %s3826_s19  ;;  %s424_s4 = scalar_lea.vmem [#allocation13], %s3825_s11 }
  0x5d   : > { %s432_s1 = sshll.u32 %s424_s4, 4  ;;  %s430_s14 = sshll.u32 %s428_s28, 4  ;;  %s433_s1 = int_to_ptr.vmem [resolvable:$true] %s432_s1  ;;  %s431_s14 = int_to_ptr.hbm [resolvable:$true] %s430_s14 }
  0x5e   : > { %s5582_s21 = sshra.s32 %s431_s14, 4  ;;  %s5589_s29 = scalar_lea.hbm %s6691_s8, 32  ;;  %s5583_s21 = int_to_ptr.hbm [resolvable:$true] %s5582_s21 }
  0x5f   : > { %s5584_s16 = scalar_lea.hbm %s5583_s21, 16  ;;  %p5590_p6 = scmp.lt.s32.totalorder %s5583_s21, %s6691_s8 }
  0x60   : > { %p5585_p1 = scmp.ne.s32.totalorder %s5583_s21, %s5584_s16  ;;  %p5591_p7 = scmp.lt.s32.totalorder %s5589_s29, %s5584_s16 }
  0x62   : > { %p5587_p3 = pnand %p5585_p1, %p5946_p2  ;;  %p5592_p11 = por %p5591_p7, %p5590_p6 }
  0x64   : > { %p5588_p4 = pneg %p5587_p3 }
  0x66   : > { %p5593_p13 = pnand %p5592_p11, %p5588_p4 }
  0x68   : > { %5596 = shalt.err (!%p5593_p13)
}
  0x69   : > { %5357 = dma.hbm_to_vmem [thread:$0]  (!%p5934_p0), %s431_s14, 256, %s433_s1, %s5942_s15  }
  0x6a   : > { %s6722_s5 = sshll.u32 %s5778_s24, 10  ;;  %s6723_s19 = sshll.u32 %s5929_s26, 10 }
  0x6b   : > { %s448_s6 = scalar_lea.hbm %s6692_s9, %s6722_s5  ;;  %s443_s17 = scalar_lea.vmem [#allocation14], %s6723_s19 }
  0x6c   : > { %s451_s28 = sshll.u32 %s443_s17, 4  ;;  %s449_s21 = sshll.u32 %s448_s6, 4  ;;  %s452_s28 = int_to_ptr.vmem [resolvable:$true] %s451_s28  ;;  %s450_s21 = int_to_ptr.hbm [resolvable:$true] %s449_s21 }
  0x6d   : > { %s331_s29 = sshll.u32 %s6686_s3, 4  ;;  %s5612_s2 = sshra.s32 %s450_s21, 4  ;;  %s5613_s2 = int_to_ptr.hbm [resolvable:$true] %s5612_s2  ;;  %s332_s29 = int_to_ptr.hbm [resolvable:$true] %s331_s29 }
  0x6e   : > { %s5614_s27 = scalar_lea.hbm %s5613_s2, 1024  ;;  %s5619_s5 = scalar_lea.hbm %s6692_s9, 2048 }
  0x6f   : > { %p5615_p1 = scmp.ne.s32.totalorder %s5613_s2, %s5614_s27  ;;  %p5620_p6 = scmp.lt.s32.totalorder %s5613_s2, %s6692_s9 }
  0x70   : > { %p5621_p7 = scmp.lt.s32.totalorder %s5619_s5, %s5614_s27 }
  0x71   : > { %p5617_p3 = pnand %p5615_p1, %p5946_p2 }
  0x72   : > { %p5622_p11 = por %p5621_p7, %p5620_p6 }
  0x73   : > { %p5618_p4 = pneg %p5617_p3 }
  0x75   : > { %p5623_p13 = pnand %p5622_p11, %p5618_p4 }
  0x77   : > { %5626 = shalt.err (!%p5623_p13)
}
  0x78   : > { %s6724_s6 = smov 4   ;;  %s5789_s19 = smov [#allocation8]  }
  0x79   : > { %5360 = dma.hbm_to_vmem [thread:$0]  (!%p5934_p0), %s450_s21, 16384, %s452_s28, %s5942_s15, %s5786_s23, %s5786_s23, %s6724_s6  }
  0x7a   : > { %s333_s17 = sshll.u32 %s5789_s19, 4  ;;  %s3830_s16 = sshll.u32 %s5929_s26, 3  ;;  %s334_s17 = int_to_ptr.vmem [resolvable:$true] %s333_s17 }
  0x7b   : > { %s6725_s25 = smov 8   ;;  %s6726_s2 = smov 128  }
  0x7c   : > { %5344 = dma.hbm_to_vmem [thread:$0]  (!%p5917_p12), %s332_s29, 256, %s334_s17, [#allocation9], %s6726_s2, %s6726_s2, %s6725_s25  }
  0x7d   : > { %s3831_s27 = sshll.u32 %s5778_s24, 3  ;;  %s465_s1 = scalar_lea.vmem [#allocation15], %s3830_s16 }
  0x7e   : > { %s473_s14 = sshll.u32 %s465_s1, 4  ;;  %s469_s11 = scalar_lea.hbm %s6693_s10, %s3831_s27  ;;  %s474_s14 = int_to_ptr.vmem [resolvable:$true] %s473_s14 }
  0x7f   : > { %s471_s23 = sshll.u32 %s469_s11, 4  ;;  %s5679_s24 = scalar_lea.hbm %s6693_s10, 16  ;;  %s472_s23 = int_to_ptr.hbm [resolvable:$true] %s471_s23 }
  0x80   : > { %s5672_s28 = sshra.s32 %s472_s23, 4  ;;  %s5673_s28 = int_to_ptr.hbm [resolvable:$true] %s5672_s28 }
  0x81   : > { %s5674_s21 = scalar_lea.hbm %s5673_s28, 8  ;;  %p5680_p12 = scmp.lt.s32.totalorder %s5673_s28, %s6693_s10 }
  0x82   : > { %p5675_p1 = scmp.ne.s32.totalorder %s5673_s28, %s5674_s21  ;;  %p5681_p6 = scmp.lt.s32.totalorder %s5679_s24, %s5674_s21 }
  0x84   : > { %p5677_p3 = pnand %p5675_p1, %p5946_p2  ;;  %p5682_p7 = por %p5681_p6, %p5680_p12 }
  0x86   : > { %p5678_p4 = pneg %p5677_p3 }
  0x88   : > { %p5683_p11 = pnand %p5682_p7, %p5678_p4 }
  0x8a   : > { %5686 = shalt.err (!%p5683_p11)
}
  0x8b   : > { %5363 = dma.hbm_to_vmem [thread:$0]  (!%p5934_p0), %s472_s23, 128, %s474_s14, %s5942_s15  }
  0x8c   : > { %482 = sbr.rel (%p5906_p10) target bundleno = 2156 (0x86c), region = 60 }
  0x91   : > { %5749 = dma.done.wait (%p116_p5), [#allocation6], 1024  }
  0x92   : > { %5751 = vsyncadd (%p116_p5), [#allocation6], 4294966272 }
  0x93   : > { %5753 = dma.done.wait (%p116_p5), [#allocation9], 256  }
  0x94   : > { %5755 = vsyncadd (%p116_p5), [#allocation9], 4294967040  ;;  %s494_s20 = sand.u32 1, %s5877_s0   ;;  %s496_s13 = sand.u32 1, %s5770_s22  }
  0x95   : > { %s5312_s15 = smul.u32 192, %s496_s13  ;;  %s495_s12 = scalar_lea.sflag [#allocation6], %s494_s20 }
  0x97   : > { %s6074_s19 = scalar_lea.vmem [#allocation10], %s5312_s15 }
  0x98   : > { %5757 = dma.done.wait (%p5901_p8), %s495_s12, 37248  }
  0x99   : > { %5759 = vsyncadd (%p5901_p8), %s495_s12, 4294930048  ;;  %s3835_s17 = sshll.u32 %s496_s13, 6  ;;  %s3836_s16 = sshll.u32 %s496_s13, 10 }
  0x9a   : > { %s3837_s25 = sshll.u32 %s496_s13, 4  ;;  %s3839_s2 = sshll.u32 %s496_s13, 3 }
  0x9b   : > { %p610_p5 = scmp.lt.s32.totalorder %s5877_s0, 1  ;;  %s6727_s4 = sld [smem:[#allocation28_spill]] }
  0x9c   : > { %s6087_s23 = scalar_lea.vmem [#allocation11], %s3835_s17  ;;  %s6089_s28 = scalar_lea.vmem [#allocation12], %s3836_s16 }
  0x9d   : > { %s611_s27 = scalar_select %p610_p5, %s5877_s0, 1 }
  0x9e   : > { %s6091_s30 = scalar_lea.vmem [#allocation13], %s3837_s25  ;;  %s6093_s21 = scalar_lea.vmem [#allocation14], %s3836_s16 }
  0x9f   : > { %s5313_s1 = smul.u32 3, %s611_s27  ;;  %s6095_s18 = scalar_lea.vmem [#allocation15], %s3839_s2 }
  0xa0   : > { %618 = sbr.rel (%p3815_p9) target bundleno = 198 (0xc6), region = 96  ;;  %s619_s26 = sld [smem:[#allocation4]] (!%p3815_p9) }
  0xa1   : > { %s6085_s11 = scalar_lea.vmem %s6727_s4, %s5313_s1  ;;  %s3841_s24 = sld [smem:[#allocation4 + $0x1]] (!%p3815_p9) }
  0xa2   : > { %s3842_s29 = sld [smem:[#allocation4 + $0x2]] (!%p3815_p9) }
  0xa3   : > { %s3843_s6 = sld [smem:[#allocation4 + $0x3]] (!%p3815_p9) }
  0xa4   : > { %s3844_s20 = sld [smem:[#allocation4 + $0x4]] (!%p3815_p9) }
  0xa5   : > { %s3845_s13 = sld [smem:[#allocation4 + $0x5]] }
  0xa6   : > { %s3846_s15 = sld [smem:[#allocation4 + $0x6]]  ;;  %s620_s12 = scalar_lea.vmem [#allocation5], %s619_s26 }
  0xa7   : > { %v621_v0 = vld [vmem:[%s620_s12] sm:$0x1]  ;;  %s3847_s17 = sld [smem:[#allocation4 + $0x7]]  ;;  %s624_s25 = scalar_lea.vmem [#allocation5], %s3841_s24 }
  0xa8   : > { %622 = vst [vmem:[#allocation2] sm:$0x1] %v621_v0  ;;  %v625_v1 = vld [vmem:[%s624_s25] sm:$0x1]  ;;  %s628_s16 = scalar_lea.vmem [#allocation5], %s3842_s29  ;;  %s3848_s4 = sld [smem:[#allocation4 + $0x8]] }
  0xa9   : > { %626 = vst [vmem:[#allocation2 + $0x1] sm:$0x1] %v625_v1  ;;  %v629_v2 = vld [vmem:[%s628_s16] sm:$0x1]  ;;  %s632_s2 = scalar_lea.vmem [#allocation5], %s3843_s6  ;;  %s3849_s26 = sld [smem:[#allocation4 + $0x9]] }
  0xaa   : > { %630 = vst [vmem:[#allocation2 + $0x2] sm:$0x1] %v629_v2  ;;  %v633_v3 = vld [vmem:[%s632_s2] sm:$0x1]  ;;  %s636_s27 = scalar_lea.vmem [#allocation5], %s3844_s20  ;;  %s3850_s24 = sld [smem:[#allocation4 + $0xa]] }
  0xab   : > { %634 = vst [vmem:[#allocation2 + $0x3] sm:$0x1] %v633_v3  ;;  %v637_v4 = vld [vmem:[%s636_s27] sm:$0x1]  ;;  %s640_s1 = scalar_lea.vmem [#allocation5], %s3845_s13  ;;  %s3851_s29 = sld [smem:[#allocation4 + $0xb]] }
  0xac   : > { %638 = vst [vmem:[#allocation2 + $0x4] sm:$0x1] %v637_v4  ;;  %v641_v5 = vld [vmem:[%s640_s1] sm:$0x1]  ;;  %s644_s14 = scalar_lea.vmem [#allocation5], %s3846_s15  ;;  %s3852_s12 = sld [smem:[#allocation4 + $0xc]] }
  0xad   : > { %642 = vst [vmem:[#allocation2 + $0x5] sm:$0x1] %v641_v5  ;;  %v645_v6 = vld [vmem:[%s644_s14] sm:$0x1]  ;;  %s648_s5 = scalar_lea.vmem [#allocation5], %s3847_s17  ;;  %s3853_s6 = sld [smem:[#allocation4 + $0xd]] }
  0xae   : > { %646 = vst [vmem:[#allocation2 + $0x6] sm:$0x1] %v645_v6  ;;  %v649_v7 = vld [vmem:[%s648_s5] sm:$0x1]  ;;  %s3854_s25 = sld [smem:[#allocation4 + $0xe]]  ;;  %s652_s16 = scalar_lea.vmem [#allocation5], %s3848_s4 }
  0xaf   : > { %650 = vst [vmem:[#allocation2 + $0x7] sm:$0x1] %v649_v7  ;;  %v653_v8 = vld [vmem:[%s652_s16] sm:$0x1]  ;;  %s3855_s20 = sld [smem:[#allocation4 + $0xf]]  ;;  %s656_s13 = scalar_lea.vmem [#allocation5], %s3849_s26 }
  0xb0   : > { %654 = vst [vmem:[#allocation2 + $0x8] sm:$0x1] %v653_v8  ;;  %v657_v9 = vld [vmem:[%s656_s13] sm:$0x1]  ;;  %s660_s15 = scalar_lea.vmem [#allocation5], %s3850_s24  ;;  %s6728_s4 = sld [smem:[#allocation26_spill]] }
  0xb1   : > { %658 = vst [vmem:[#allocation2 + $0x9] sm:$0x1] %v657_v9  ;;  %v661_v10 = vld [vmem:[%s660_s15] sm:$0x1]  ;;  %s664_s17 = scalar_lea.vmem [#allocation5], %s3851_s29 }
  0xb2   : > { %662 = vst [vmem:[#allocation2 + $0xa] sm:$0x1] %v661_v10  ;;  %v665_v11 = vld [vmem:[%s664_s17] sm:$0x1]  ;;  %s668_s2 = scalar_lea.vmem [#allocation5], %s3852_s12 }
  0xb3   : > { %666 = vst [vmem:[#allocation2 + $0xb] sm:$0x1] %v665_v11  ;;  %v669_v12 = vld [vmem:[%s668_s2] sm:$0x1]  ;;  %s672_s27 = scalar_lea.vmem [#allocation5], %s3853_s6 }
  0xb4   : > { %670 = vst [vmem:[#allocation2 + $0xc] sm:$0x1] %v669_v12  ;;  %v673_v14 = vld [vmem:[%s672_s27] sm:$0x1]  ;;  %s676_s1 = scalar_lea.vmem [#allocation5], %s3854_s25 }
  0xb5   : > { %674 = vst [vmem:[#allocation2 + $0xd] sm:$0x1] %v673_v14  ;;  %v677_v15 = vld [vmem:[%s676_s1] sm:$0x1]  ;;  %s680_s26 = scalar_lea.vmem [#allocation5], %s3855_s20 }
  0xb6   : > { %v683_v13 = vld [vmem:[#allocation2] sm:$0xff]  ;;  %678 = vst [vmem:[#allocation2 + $0xe] sm:$0x1] %v677_v15  ;;  %v688_v21 = vld [vmem:[%s6728_s4 + $0x8] sm:$0xff] }
  0xb7   : > { %v687_v16 = vld [vmem:[%s6728_s4] sm:$0xff]  ;;  %v685_v18 = vmul.f32 11.313708, %v683_v13 }
  0xb8   : > { %v681_v17 = vld [vmem:[%s680_s26] sm:$0x1] }
  0xb9   : > { %682 = vst [vmem:[#allocation2 + $0xf] sm:$0x1] %v681_v17  ;;  %v689_v19 = vadd.f32 %v687_v16, %v685_v18 }
  0xbb   : > { %691 = vst [vmem:[#allocation2] sm:$0xff] %v689_v19 }
  0xc0   : > { %v684_v20 = vld [vmem:[#allocation2 + $0x8] sm:$0xff] }
  0xc1   : > { %v686_v22 = vmul.f32 11.313708, %v684_v20 }
  0xc3   : > { %v690_v23 = vadd.f32 %v688_v21, %v686_v22 }
  0xc5   : > { %692 = vst [vmem:[#allocation2 + $0x8] sm:$0xff] %v690_v23 }
  0xc6 PF: > { %v3942_v24 = vld [vmem:[%s6074_s19 + $0xa8] sm:$0xf]  ;;  %v5044_v25 = vld [vmem:[%s6074_s19 + $0xb0] sm:$0xf0]  ;;  %v5043_v26 = vld [vmem:[%s6074_s19 + $0xac] sm:$0xf] }
  0xc7   : > { %v3943_v27 = vor.u32 %v5044_v25, %v3942_v24  ;;  %v3944_v28 = vld [vmem:[%s6074_s19 + $0xb4] sm:$0xf0]  ;;  %v3930_v29 = vld [vmem:[%s6074_s19 + $0x90] sm:$0xf]  ;;  %v5041_v30 = vld [vmem:[%s6074_s19 + $0x98] sm:$0xf0] }
  0xc8   : > { %v3947_v31 = vor.u32 %v5043_v26, %v3944_v28  ;;  %v5040_v32 = vld [vmem:[%s6074_s19 + $0x94] sm:$0xf]  ;;  %v3932_v33 = vld [vmem:[%s6074_s19 + $0x9c] sm:$0xf0]  ;;  %v3931_v34 = vor.u32 %v5041_v30, %v3930_v29  ;;  %v3918_v36 = vld [vmem:[%s6074_s19 + $0x78] sm:$0xf] }
  0xc9   : > { %870 = vmatpush.bf16.msra.mxu0 %v3943_v27  ;;  %v3935_v35 = vor.u32 %v5040_v32, %v3932_v33  ;;  %v5038_v37 = vld [vmem:[%s6074_s19 + $0x80] sm:$0xf0]  ;;  %v5037_v38 = vld [vmem:[%s6074_s19 + $0x7c] sm:$0xf]  ;;  %v3920_v39 = vld [vmem:[%s6074_s19 + $0x84] sm:$0xf0] }
  0xca   : > { %884 = vmatpush.bf16.msra.mxu1 %v3947_v31  ;;  %v3919_v40 = vor.u32 %v5038_v37, %v3918_v36  ;;  %v3923_v41 = vor.u32 %v5037_v38, %v3920_v39  ;;  %v3906_v42 = vld [vmem:[%s6074_s19 + $0x60] sm:$0xf]  ;;  %v5035_v43 = vld [vmem:[%s6074_s19 + $0x68] sm:$0xf0]  ;;  %v5034_v44 = vld [vmem:[%s6074_s19 + $0x64] sm:$0xf] }
  0xcb   : > { %v3908_v45 = vld [vmem:[%s6074_s19 + $0x6c] sm:$0xf0]  ;;  %v3907_v46 = vor.u32 %v5035_v43, %v3906_v42  ;;  %v3894_v47 = vld [vmem:[%s6074_s19 + $0x48] sm:$0xf]  ;;  %v5045_v49 = vld [vmem:[%s6074_s19 + $0xb8] sm:$0xf0] }
  0xcc   : > { %v3950_v48 = vld [vmem:[%s6074_s19 + $0xb0] sm:$0xf]  ;;  %v3911_v50 = vor.u32 %v5034_v44, %v3908_v45  ;;  %v5032_v51 = vld [vmem:[%s6074_s19 + $0x50] sm:$0xf0]  ;;  %v3938_v53 = vld [vmem:[%s6074_s19 + $0x98] sm:$0xf] }
  0xcd   : > { %871 = vmatpush.bf16.msra.mxu0 %v3931_v34  ;;  %v3951_v52 = vor.u32 %v5045_v49, %v3950_v48  ;;  %v5042_v54 = vld [vmem:[%s6074_s19 + $0xa0] sm:$0xf0]  ;;  %v5031_v55 = vld [vmem:[%s6074_s19 + $0x4c] sm:$0xf]  ;;  %v3896_v56 = vld [vmem:[%s6074_s19 + $0x54] sm:$0xf0]  ;;  %v3895_v58 = vor.u32 %v5032_v51, %v3894_v47 }
  0xce   : > { %885 = vmatpush.bf16.msra.mxu1 %v3935_v35  ;;  %v3939_v57 = vor.u32 %v5042_v54, %v3938_v53  ;;  %v3926_v59 = vld [vmem:[%s6074_s19 + $0x80] sm:$0xf]  ;;  %v5039_v60 = vld [vmem:[%s6074_s19 + $0x88] sm:$0xf0]  ;;  %v3899_v61 = vor.u32 %v5031_v55, %v3896_v56  ;;  %v3882_v62 = vld [vmem:[%s6074_s19 + $0x30] sm:$0xf] }
  0xcf   : > { %898 = vmatpush.bf16.msra.mxu2 %v3951_v52  ;;  %v5029_v63 = vld [vmem:[%s6074_s19 + $0x38] sm:$0xf0]  ;;  %v5028_v0 = vld [vmem:[%s6074_s19 + $0x34] sm:$0xf]  ;;  %v3884_v1 = vld [vmem:[%s6074_s19 + $0x3c] sm:$0xf0]  ;;  %v3927_v2 = vor.u32 %v5039_v60, %v3926_v59 }
  0xd0   : > { %v3883_v3 = vor.u32 %v5029_v63, %v3882_v62  ;;  %v3914_v4 = vld [vmem:[%s6074_s19 + $0x68] sm:$0xf]  ;;  %v5036_v5 = vld [vmem:[%s6074_s19 + $0x70] sm:$0xf0]  ;;  %v3887_v6 = vor.u32 %v5028_v0, %v3884_v1  ;;  %v3870_v7 = vld [vmem:[%s6074_s19 + $0x18] sm:$0xf] }
  0xd1   : > { %872 = vmatpush.bf16.msra.mxu0 %v3919_v40  ;;  %v5026_v8 = vld [vmem:[%s6074_s19 + $0x20] sm:$0xf0]  ;;  %v5025_v9 = vld [vmem:[%s6074_s19 + $0x1c] sm:$0xf]  ;;  %v3872_v10 = vld [vmem:[%s6074_s19 + $0x24] sm:$0xf0]  ;;  %v3915_v11 = vor.u32 %v5036_v5, %v3914_v4 }
  0xd2   : > { %886 = vmatpush.bf16.msra.mxu1 %v3923_v41  ;;  %v3871_v12 = vor.u32 %v5026_v8, %v3870_v7  ;;  %v3902_v13 = vld [vmem:[%s6074_s19 + $0x50] sm:$0xf]  ;;  %v5033_v14 = vld [vmem:[%s6074_s19 + $0x58] sm:$0xf0]  ;;  %v3875_v15 = vor.u32 %v5025_v9, %v3872_v10  ;;  %v3858_v16 = vld [vmem:[%s6074_s19] sm:$0xf] }
  0xd3   : > { %899 = vmatpush.bf16.msra.mxu2 %v3939_v57  ;;  %v5023_v17 = vld [vmem:[%s6074_s19 + $0x8] sm:$0xf0]  ;;  %v5022_v18 = vld [vmem:[%s6074_s19 + $0x4] sm:$0xf]  ;;  %v3860_v19 = vld [vmem:[%s6074_s19 + $0xc] sm:$0xf0]  ;;  %v3903_v21 = vor.u32 %v5033_v14, %v3902_v13 }
  0xd4   : > { %v6147_v20 = vld [vmem:[#allocation2] sm:$0xff]  ;;  %v3859_v22 = vor.u32 %v5023_v17, %v3858_v16  ;;  %v6149_v23 = vld [vmem:[#allocation2 + $0x8] sm:$0xff]  ;;  %v3890_v24 = vld [vmem:[%s6074_s19 + $0x38] sm:$0xf]  ;;  %v3863_v26 = vor.u32 %v5022_v18, %v3860_v19  ;;  %vm917_vm0 = vcmask 523264   ;;  %s5790_s12 = smov 64  }
  0xd5   : > { %873 = vmatpush.bf16.msra.mxu0 %v3907_v46  ;;  %v5030_v25 = vld [vmem:[%s6074_s19 + $0x40] sm:$0xf0]  ;;  %v701_v27 = vpack.c.bf16 %v6149_v23, %v6147_v20  ;;  %v3878_v29 = vld [vmem:[%s6074_s19 + $0x20] sm:$0xf]  ;;  %v5027_v30 = vld [vmem:[%s6074_s19 + $0x28] sm:$0xf0] }
  0xd6   : > { %887 = vmatpush.bf16.msra.mxu1 %v3911_v50  ;;  %v3891_v28 = vor.u32 %v5030_v25, %v3890_v24  ;;  %v3879_v31 = vor.u32 %v5027_v30, %v3878_v29  ;;  %v3866_v32 = vld [vmem:[%s6074_s19 + $0x8] sm:$0xf]  ;;  %v5024_v33 = vld [vmem:[%s6074_s19 + $0x10] sm:$0xf0]  ;;  %v734_v36 = vld [vmem:[%s6085_s11] sm:$0x7] }
  0xd7   : > { %900 = vmatpush.bf16.msra.mxu2 %v3927_v2  ;;  %v3867_v34 = vor.u32 %v5024_v33, %v3866_v32  ;;  %v737_v38 = vperm.slane %v734_v36, 1  ;;  %v736_v42 = vperm.slane %v734_v36, 0  ;;  %v738_v50 = vperm.slane %v734_v36, 2  ;;  %v913_v63 = vld [vmem:[#allocation8 + $0x8] sm:$0xff]  ;;  %v5048_v24 = vld [vmem:[%s6087_s23 + $0x10] sm:$0xff]  ;;  %v5047_v25 = vld [vmem:[%s6087_s23 + $0x8] sm:$0xff] }
  0xd8   : > { %vm942_vm1 = vcmask 130048   ;;  %v5049_v14 = vld [vmem:[%s6087_s23 + $0x18] sm:$0xff]  ;;  %p5014_p8 = scmp.ne.s32.totalorder %s5877_s0, 1 }
  0xd9   : > { %874 = vmatpush.bf16.msra.mxu0 %v3895_v58  ;;  %v912_v58 = vld [vmem:[#allocation8] sm:$0xff] }
  0xda   : > { %888 = vmatpush.bf16.msra.mxu1 %v3899_v61 }
  0xdb   : > { %901 = vmatpush.bf16.msra.mxu2 %v3915_v11 }
  0xdd   : > { %875 = vmatpush.bf16.msra.mxu0 %v3883_v3 }
  0xde   : > { %889 = vmatpush.bf16.msra.mxu1 %v3887_v6 }
  0xdf   : > { %902 = vmatpush.bf16.msra.mxu2 %v3903_v21 }
  0xe1   : > { %876 = vmatpush.bf16.msra.mxu0 %v3871_v12 }
  0xe2   : > { %890 = vmatpush.bf16.msra.mxu1 %v3875_v15 }
  0xe3   : > { %903 = vmatpush.bf16.msra.mxu2 %v3891_v28 }
  0xe5   : > { %877 = vmatpush.bf16.msra.mxu0 %v3859_v22 }
  0xe6   : > { %891 = vmatpush.bf16.msra.mxu1 %v3863_v26  ;;  %v5046_v26 = vld [vmem:[%s6087_s23] sm:$0xff] }
  0xe7   : > { %904 = vmatpush.bf16.msra.mxu2 %v3879_v31 }
  0xe8   : > { %878 = vmatmul.bf16.vlgmr.msra.gmra.mxu0 %v701_v27 }
  0xe9   : > { %892 = vmatmul.bf16.vlgmr.msra.gmra.mxu1 %v701_v27 }
  0xeb   : > { %905 = vmatpush.bf16.msra.mxu2 %v3867_v34 }
  0xee   : > { %906 = vmatmul.bf16.vlgmr.msra.gmra.mxu2 %v701_v27 }
  0xef   : > { %1147 = vmatpush.bf16.msrb.mxu2 %v5049_v14  ;;  %v4378_v14 = vld [vmem:[%s6089_s28 + $0x340] sm:$0xf0] }
  0xf3   : > { %1148 = vmatpush.bf16.msrb.mxu2 %v5048_v24  ;;  %v4312_v24 = vld [vmem:[%s6089_s28 + $0x280] sm:$0xf] }
  0xf7   : > { %1149 = vmatpush.bf16.msrb.mxu2 %v5047_v25  ;;  %v5142_v25 = vld [vmem:[%s6089_s28 + $0x2bc] sm:$0xf0] }
  0xfb   : > { %1150 = vmatpush.bf16.msrb.mxu2 %v5046_v26 }
 0x165   : > { %v879_v37 = vpop.f32.mrf.mxu0 }
 0x166   : > { %v893_v35 = vpop.f32.mrf.mxu1  ;;  %v880_v46 = vadd.f32 %v879_v37, %v736_v42 }
 0x167   : > { %v894_v40 = vadd.f32 %v893_v35, %v737_v38 }
 0x16d   : > { %v881_v44 = vpop.f32.mrf.mxu0 }
 0x16e   : > { %v895_v39 = vpop.f32.mrf.mxu1  ;;  %v882_v47 = vadd.f32 %v881_v44, %v736_v42 }
 0x16f   : > { %v896_v41 = vadd.f32 %v895_v39, %v737_v38 }
 0x170   : > { %v914_v48 = vpack.c.bf16 %v882_v47, %v880_v46 }
 0x171   : > { %v915_v43 = vpack.c.bf16 %v896_v41, %v894_v40  ;;  %v907_v49 = vpop.f32.mrf.mxu2 }
 0x172   : > { %v908_v52 = vadd.f32 %v907_v49, %v738_v50  ;;  %v5053_v49 = vld [vmem:[%s6087_s23 + $0x38] sm:$0xff] }
 0x173   : > { %996 = vrot.lane.b32.xlu2 %v915_v43, %s5790_s12  ;;  %v922_v45 = vsel %vm917_vm0, %v915_v43, 0  ;;  %1106 = vmatpush.bf16.msrb.mxu1 %v5053_v49  ;;  %v4248_v49 = vld [vmem:[%s6089_s28 + $0x200] sm:$0xf] }
 0x174   : > { %931 = vmatpush.bf16.xpose.msra.mxu3 %v922_v45 }
 0x179   : > { %v909_v51 = vpop.f32.mrf.mxu2 }
 0x17a   : > { %v910_v53 = vadd.f32 %v909_v51, %v738_v50 }
 0x17b   : > { %993 = vrot.lane.b32.xlu2 %v914_v48, %s5790_s12  ;;  %3952 = vmatmul.msk.bf16.vlgmr.msra.gmra.mxu3 %vm917_vm0, %v914_v48 }
 0x17c   : > { %v6164_v54 = vpack.c.bf16 %v910_v53, %v908_v52 }
 0x17e   : > { %976 = vmatpush.bf16.msrb.mxu3 %v6164_v54 }
 0x1cd   : > { %v997_v55 = vpop.permute.xlu2 %996 }
 0x1ce   : > { %v1002_v56 = vsel %vm917_vm0, %v997_v55, 0 }
 0x1cf   : > { %1011 = vmatpush.bf16.xpose.msra.mxu3 %v1002_v56 }
 0x1d5   : > { %v994_v22 = vpop.permute.xlu2 %993 }
 0x1fe   : > { %v933_v57 = vpop.f32.mrf.mxu3 }
 0x1ff   : > { %v938_v59 = vmul.f32 0.125, %v933_v57  ;;  %v5052_v57 = vld [vmem:[%s6087_s23 + $0x30] sm:$0xff] }
 0x200   : > { %1107 = vmatpush.bf16.msrb.mxu1 %v5052_v57  ;;  %v5119_v57 = vld [vmem:[%s6089_s28 + $0x20c] sm:$0xf] }
 0x201   : > { %v940_v60 = vadd.f32 %v938_v59, %v912_v58  ;;  %v5050_v59 = vld [vmem:[%s6087_s23 + $0x20] sm:$0xff] }
 0x203   : > { %v943_v61 = vsel %vm942_vm1, %v940_v60, -inf }
 0x204   : > { %944 = vmax.xlane.f32.xlu0 %v943_v61 }
 0x206   : > { %v935_v62 = vpop.f32.mrf.mxu3 }
 0x207   : > { %v939_v0 = vmul.f32 0.125, %v935_v62 }
 0x209   : > { %v941_v1 = vadd.f32 %v939_v0, %v913_v63  ;;  %v5174_v0 = vld [vmem:[%s6089_s28 + $0x3bc] sm:$0xf0] }
 0x20b   : > { %v946_v2 = vsel %vm942_vm1, %v941_v1, -inf }
 0x20c   : > { %947 = vmax.xlane.f32.xlu0 %v946_v2 }
 0x277   : > { %v945_v3 = vpop.xlane.xlu0 %944 }
 0x278   : > { %v949_v4 = vsub.f32 %v940_v60, %v945_v3  ;;  %v4442_v3 = vld [vmem:[%s6089_s28 + $0x3c0] sm:$0xf0] }
 0x27a   : > { %v951_v5 = vmul.f32 1.442695, %v949_v4  ;;  %v4448_v4 = vld [vmem:[%s6089_s28 + $0x388] sm:$0xf] }
 0x27c   : > { %5424 = vpow2.f32 %v951_v5  ;;  %v5175_v5 = vld [vmem:[%s6089_s28 + $0x3c4] sm:$0xf0] }
 0x27f   : > { %v948_v6 = vpop.xlane.xlu0 %947 }
 0x280   : > { %v950_v7 = vsub.f32 %v941_v1, %v948_v6  ;;  %v5166_v1 = vld [vmem:[%s6089_s28 + $0x384] sm:$0xf] }
 0x281   : > { %v4445_v6 = vor.u32 %v5166_v1, %v4442_v3  ;;  %v4192_v1 = vld [vmem:[%s6089_s28 + $0x188] sm:$0xf] }
 0x282   : > { %v5425_v8 = vpop.eup %5424  ;;  %v953_v9 = vmul.f32 1.442695, %v950_v7  ;;  %v4449_v7 = vor.u32 %v5175_v5, %v4448_v4  ;;  %v5103_v5 = vld [vmem:[%s6089_s28 + $0x18c] sm:$0xf] }
 0x283   : > { %v955_v10 = vsel %vm942_vm1, %v5425_v8, 0.0 }
 0x284   : > { %5426 = vpow2.f32 %v953_v9  ;;  %956 = vadd.xlane.f32.xlu1 %v955_v10  ;;  %v4450_v9 = vld [vmem:[%s6089_s28 + $0x3c8] sm:$0xf0]  ;;  %v4376_v10 = vld [vmem:[%s6089_s28 + $0x300] sm:$0xf] }
 0x28a   : > { %v5427_v11 = vpop.eup %5426 }
 0x28b   : > { %v958_v12 = vsel %vm942_vm1, %v5427_v11, 0.0 }
 0x28c   : > { %959 = vadd.xlane.f32.xlu1 %v958_v12  ;;  %v5158_v12 = vld [vmem:[%s6089_s28 + $0x33c] sm:$0xf0] }
 0x2f7   : > { %v957_v13 = vpop.xlane.xlu1 %956 }
 0x2f8   : > { %5428 = vrcp.f32 %v957_v13  ;;  %v5150_v13 = vld [vmem:[%s6089_s28 + $0x304] sm:$0xf] }
 0x2fe   : > { %v5429_v16 = vpop.eup %5428 }
 0x2ff   : > { %v960_v15 = vpop.xlane.xlu1 %959  ;;  %v963_v18 = vmul.f32 %v5429_v16, %v5425_v8  ;;  %v5167_v8 = vld [vmem:[%s6089_s28 + $0x38c] sm:$0xf]  ;;  %v4381_v16 = vor.u32 %v5150_v13, %v4378_v14  ;;  %v4128_v13 = vld [vmem:[%s6089_s28 + $0x108] sm:$0xf] }
 0x300   : > { %5430 = vrcp.f32 %v960_v15  ;;  %v4377_v15 = vor.u32 %v5158_v12, %v4376_v10  ;;  %v5086_v10 = vld [vmem:[%s6089_s28 + $0x104] sm:$0xf]  ;;  %v5095_v14 = vld [vmem:[%s6089_s28 + $0x144] sm:$0xf0] }
 0x301   : > { %v4122_v12 = vld [vmem:[%s6089_s28 + $0x140] sm:$0xf0] }
 0x306   : > { %v5431_v17 = vpop.eup %5430 }
 0x307   : > { %v964_v19 = vmul.f32 %v5431_v17, %v5427_v11  ;;  %v4453_v11 = vor.u32 %v5167_v8, %v4450_v9  ;;  %v4384_v17 = vld [vmem:[%s6089_s28 + $0x308] sm:$0xf]  ;;  %v4120_v8 = vld [vmem:[%s6089_s28 + $0x100] sm:$0xf] }
 0x308   : > { %v5094_v9 = vld [vmem:[%s6089_s28 + $0x13c] sm:$0xf0] }
 0x309   : > { %v965_v21 = vpack.c.bf16 %v964_v19, %v963_v18  ;;  %v5159_v18 = vld [vmem:[%s6089_s28 + $0x344] sm:$0xf0]  ;;  %v5151_v19 = vld [vmem:[%s6089_s28 + $0x30c] sm:$0xf]  ;;  %2066 = vmatpush.bf16.msra.mxu2 %v4453_v11  ;;  %v4121_v11 = vor.u32 %v5094_v9, %v4120_v8  ;;  %v4328_v9 = vld [vmem:[%s6089_s28 + $0x290] sm:$0xf] }
 0x30b   : > { %3953 = vmatmul.msk.bf16.vlgmr.msrb.gmra.mxu3 %vm942_vm1, %v965_v21  ;;  %v4385_v21 = vor.u32 %v5159_v18, %v4384_v17  ;;  %v5087_v17 = vld [vmem:[%s6089_s28 + $0x10c] sm:$0xf] }
 0x30c   : > { %v4130_v18 = vld [vmem:[%s6089_s28 + $0x148] sm:$0xf0] }
 0x31b   : > { %3954 = vmatmul.msk.bf16.vlgmr.msra.gmra.mxu3 %vm917_vm0, %v994_v22  ;;  %v4386_v22 = vld [vmem:[%s6089_s28 + $0x348] sm:$0xf0] }
 0x31c   : > { %v4389_v26 = vor.u32 %v5151_v19, %v4386_v22  ;;  %v4133_v19 = vor.u32 %v5087_v17, %v4130_v18  ;;  %v5078_v22 = vld [vmem:[%s6089_s28 + $0xbc] sm:$0xf0]  ;;  %v5137_v18 = vld [vmem:[%s6089_s28 + $0x29c] sm:$0xf] }
 0x31e   : > { %2067 = vmatpush.bf16.msra.mxu2 %v4389_v26  ;;  %v4058_v26 = vld [vmem:[%s6089_s28 + $0xc0] sm:$0xf0] }
 0x38e   : > { %v978_v27 = vpop.f32.mrf.mxu3 }
 0x396   : > { %v980_v28 = vpop.f32.mrf.mxu3 }
 0x397   : > { %v983_v29 = vpack.c.bf16 %v980_v28, %v978_v27  ;;  %v5134_v27 = vld [vmem:[%s6089_s28 + $0x284] sm:$0xf] }
 0x398   : > { %v4314_v28 = vld [vmem:[%s6089_s28 + $0x2c0] sm:$0xf0] }
 0x399   : > { %3989 = vmatmul.msk.bf16.vlgmr.msrb.gmra.mxu2 %vm917_vm0, %v983_v29  ;;  %v4320_v29 = vld [vmem:[%s6089_s28 + $0x288] sm:$0xf] }
 0x39e   : > { %v1013_v30 = vpop.f32.mrf.mxu3 }
 0x39f   : > { %v1018_v31 = vmul.f32 0.125, %v1013_v30 }
 0x3a1   : > { %v1020_v32 = vadd.f32 %v1018_v31, %v912_v58  ;;  %v5051_v58 = vld [vmem:[%s6087_s23 + $0x28] sm:$0xff]  ;;  %v4313_v31 = vor.u32 %v5142_v25, %v4312_v24  ;;  %v5070_v24 = vld [vmem:[%s6089_s28 + $0x84] sm:$0xf] }
 0x3a2   : > { %1108 = vmatpush.bf16.msrb.mxu1 %v5051_v58  ;;  %v4258_v58 = vld [vmem:[%s6089_s28 + $0x248] sm:$0xf0] }
 0x3a3   : > { %v1022_v33 = vsel %vm942_vm1, %v1020_v32, -inf }
 0x3a4   : > { %1023 = vmax.xlane.f32.xlu0 %v1022_v33  ;;  %v5135_v33 = vld [vmem:[%s6089_s28 + $0x28c] sm:$0xf] }
 0x3a6   : > { %v1015_v34 = vpop.f32.mrf.mxu3  ;;  %1109 = vmatpush.bf16.msrb.mxu1 %v5050_v59  ;;  %v4261_v59 = vor.u32 %v5119_v57, %v4258_v58  ;;  %v4466_v58 = vld [vmem:[%s6089_s28 + $0x3d8] sm:$0xf0] }
 0x3a7   : > { %v1019_v35 = vmul.f32 0.125, %v1015_v34  ;;  %v4322_v34 = vld [vmem:[%s6089_s28 + $0x2c8] sm:$0xf0] }
 0x3a9   : > { %v1021_v36 = vadd.f32 %v1019_v35, %v913_v63  ;;  %v4440_v63 = vld [vmem:[%s6089_s28 + $0x380] sm:$0xf] }
 0x3aa   : > { %v4441_v2 = vor.u32 %v5174_v0, %v4440_v63  ;;  %2052 = vmatpush.bf16.msra.mxu1 %v4449_v7  ;;  %v5418_v35 = vld [vmem:[%s6095_s18] ss:$0 sm:$0xff]  ;;  %v4186_v0 = vld [vmem:[%s6089_s28 + $0x1c0] sm:$0xf0] }
 0x3ab   : > { %v1025_v37 = vsel %vm942_vm1, %v1021_v36, -inf }
 0x3ac   : > { %1026 = vmax.xlane.f32.xlu1 %v1025_v37  ;;  %2024 = vmatpush.bf16.msrb.mxu3 %v4441_v2  ;;  %v5111_v2 = vld [vmem:[%s6089_s28 + $0x1c4] sm:$0xf0] }
 0x3ad   : > { %v4193_v4 = vor.u32 %v5111_v2, %v4192_v1  ;;  %v4400_v1 = vld [vmem:[%s6089_s28 + $0x318] sm:$0xf] }
 0x3ae   : > { %2053 = vmatpush.bf16.msra.mxu1 %v4385_v21  ;;  %v4056_v21 = vld [vmem:[%s6089_s28 + $0x80] sm:$0xf] }
 0x3af   : > { %v4057_v25 = vor.u32 %v5078_v22, %v4056_v21 }
 0x3b0   : > { %2025 = vmatpush.bf16.msrb.mxu3 %v4377_v15  ;;  %v4125_v15 = vor.u32 %v5086_v10, %v4122_v12  ;;  %v5144_v10 = vld [vmem:[%s6089_s28 + $0x2cc] sm:$0xf0] }
 0x3b1   : > { %v4329_v12 = vor.u32 %v5144_v10, %v4328_v9  ;;  %v5081_v9 = vld [vmem:[%s6089_s28 + $0xd4] sm:$0xf0] }
 0x3b4   : > { %2026 = vmatpush.bf16.msrb.mxu3 %v4313_v31  ;;  %v5071_v31 = vld [vmem:[%s6089_s28 + $0x8c] sm:$0xf] }
 0x3c5   : > { %1046 = vrot.lane.b32.xlu1 %v6164_v54, %s5790_s12 }
 0x417   : > { %v1024_v38 = vpop.xlane.xlu0 %1023 }
 0x418   : > { %v1028_v39 = vsub.f32 %v1020_v32, %v1024_v38  ;;  %v5143_v32 = vld [vmem:[%s6089_s28 + $0x2c4] sm:$0xf0] }
 0x419   : > { %v4321_v37 = vor.u32 %v5143_v32, %v4320_v29  ;;  %v4061_v29 = vor.u32 %v5070_v24, %v4058_v26  ;;  %v4066_v32 = vld [vmem:[%s6089_s28 + $0xc8] sm:$0xf0]  ;;  %v4264_v24 = vld [vmem:[%s6089_s28 + $0x210] sm:$0xf]  ;;  %v5120_v26 = vld [vmem:[%s6089_s28 + $0x214] sm:$0xf] }
 0x41a   : > { %v1030_v40 = vmul.f32 1.442695, %v1028_v39  ;;  %v4325_v39 = vor.u32 %v5135_v33, %v4322_v34  ;;  %v5791_v33 = vmov 128.0   ;;  %v4069_v34 = vor.u32 %v5071_v31, %v4066_v32 }
 0x41b   : > { %2054 = vmatpush.bf16.msra.mxu1 %v4321_v37  ;;  %v5054_v37 = vld [vmem:[%s6089_s28 + $0x4] sm:$0xf] }
 0x41c   : > { %5432 = vpow2.f32 %v1030_v40  ;;  %v1152_v30 = vpop.f32.mrf.mxu2  ;;  %2068 = vmatpush.bf16.msra.mxu2 %v4325_v39  ;;  %v3994_v39 = vld [vmem:[%s6089_s28 + $0x40] sm:$0xf0] }
 0x41f   : > { %v1027_v41 = vpop.xlane.xlu1 %1026 }
 0x420   : > { %v1029_v42 = vsub.f32 %v1021_v36, %v1027_v41  ;;  %v4317_v36 = vor.u32 %v5134_v27, %v4314_v28  ;;  %2069 = vmatpush.bf16.msra.mxu2 %v4261_v59  ;;  %v4064_v27 = vld [vmem:[%s6089_s28 + $0x88] sm:$0xf]  ;;  %v4392_v59 = vld [vmem:[%s6089_s28 + $0x310] sm:$0xf] }
 0x421   : > { %v5079_v28 = vld [vmem:[%s6089_s28 + $0xc4] sm:$0xf0] }
 0x422   : > { %v5433_v43 = vpop.eup %5432  ;;  %v1032_v44 = vmul.f32 1.442695, %v1029_v42 }
 0x423   : > { %v1034_v45 = vsel %vm942_vm1, %v5433_v43, 0.0 }
 0x424   : > { %5434 = vpow2.f32 %v1032_v44  ;;  %1035 = vadd.xlane.f32.xlu2 %v1034_v45 }
 0x42a   : > { %v5435_v46 = vpop.eup %5434 }
 0x42b   : > { %v1037_v47 = vsel %vm942_vm1, %v5435_v46, 0.0 }
 0x42c   : > { %1038 = vadd.xlane.f32.xlu0 %v1037_v47 }
 0x437   : > { %v1047_v48 = vpop.permute.xlu1 %1046 }
 0x438   : > { %1059 = vmatpush.bf16.msrb.mxu0 %v1047_v48 }
 0x43c   : > { %2038 = vmatpush.bf16.msra.mxu0 %v4445_v6  ;;  %v4194_v6 = vld [vmem:[%s6089_s28 + $0x1c8] sm:$0xf0] }
 0x43d   : > { %v4197_v7 = vor.u32 %v5103_v5, %v4194_v6  ;;  %v4402_v5 = vld [vmem:[%s6089_s28 + $0x358] sm:$0xf0] }
 0x43f   : > { %2070 = vmatpush.bf16.msra.mxu2 %v4197_v7 }
 0x440   : > { %2039 = vmatpush.bf16.msra.mxu0 %v4381_v16  ;;  %v4129_v16 = vor.u32 %v5095_v14, %v4128_v13  ;;  %v4330_v13 = vld [vmem:[%s6089_s28 + $0x2d0] sm:$0xf0]  ;;  %v4336_v14 = vld [vmem:[%s6089_s28 + $0x298] sm:$0xf] }
 0x443   : > { %2071 = vmatpush.bf16.msra.mxu2 %v4133_v19  ;;  %v4338_v19 = vld [vmem:[%s6089_s28 + $0x2d8] sm:$0xf0] }
 0x444   : > { %2040 = vmatpush.bf16.msra.mxu0 %v4317_v36  ;;  %v5062_v36 = vld [vmem:[%s6089_s28 + $0x3c] sm:$0xf0]  ;;  %v4341_v22 = vor.u32 %v5137_v18, %v4338_v19  ;;  %v4008_v19 = vld [vmem:[%s6089_s28 + $0x10] sm:$0xf] }
 0x447   : > { %2072 = vmatpush.bf16.msra.mxu2 %v4069_v34  ;;  %v4274_v34 = vld [vmem:[%s6089_s28 + $0x258] sm:$0xf0] }
 0x497   : > { %v1036_v50 = vpop.xlane.xlu2 %1035 }
 0x498   : > { %5436 = vrcp.f32 %v1036_v50  ;;  %v5126_v50 = vld [vmem:[%s6089_s28 + $0x23c] sm:$0xf0] }
 0x49e   : > { %v5437_v52 = vpop.eup %5436 }
 0x49f   : > { %v1039_v51 = vpop.xlane.xlu0 %1038  ;;  %v1042_v54 = vmul.f32 %v5437_v52, %v5433_v43  ;;  %v1154_v43 = vpop.f32.mrf.mxu2  ;;  %v4249_v52 = vor.u32 %v5126_v50, %v4248_v49  ;;  %v5176_v49 = vld [vmem:[%s6089_s28 + $0x3cc] sm:$0xf0]  ;;  %v5168_v50 = vld [vmem:[%s6089_s28 + $0x394] sm:$0xf] }
 0x4a0   : > { %5438 = vrcp.f32 %v1039_v51  ;;  %v5118_v51 = vld [vmem:[%s6089_s28 + $0x204] sm:$0xf] }
 0x4a1   : > { %2027 = vmatpush.bf16.msrb.mxu3 %v4249_v52  ;;  %5440 = vrcp.f32 %v5791_v33  ;;  %v5121_v33 = vld [vmem:[%s6089_s28 + $0x21c] sm:$0xf] }
 0x4a6   : > { %v5439_v53 = vpop.eup %5438 }
 0x4a7   : > { %v1043_v55 = vmul.f32 %v5439_v53, %v5435_v46  ;;  %v4256_v53 = vld [vmem:[%s6089_s28 + $0x208] sm:$0xf] }
 0x4a9   : > { %v1044_v56 = vpack.c.bf16 %v1043_v55, %v1042_v54  ;;  %v5127_v54 = vld [vmem:[%s6089_s28 + $0x244] sm:$0xf0] }
 0x4ab   : > { %3955 = vmatmul.msk.bf16.vlgmr.msrb.gmra.mxu0 %vm942_vm1, %v1044_v56  ;;  %v4257_v56 = vor.u32 %v5127_v54, %v4256_v53  ;;  %v4464_v53 = vld [vmem:[%s6089_s28 + $0x398] sm:$0xf] }
 0x4ac   : > { %v5177_v54 = vld [vmem:[%s6089_s28 + $0x3d4] sm:$0xf0] }
 0x4ad   : > { %2055 = vmatpush.bf16.msra.mxu1 %v4257_v56  ;;  %v6275_v56 = vpop.eup %5440  ;;  %v4465_v57 = vor.u32 %v5177_v54, %v4464_v53  ;;  %v5088_v53 = vld [vmem:[%s6089_s28 + $0x114] sm:$0xf] }
 0x4ae   : > { %v1167_v6 = vmul.f32 128.0, %v6275_v56  ;;  %vm1171_vm2 = vweird.f32 %v6275_v56 }
 0x4b0   : > { %v1168_v21 = vsub.f32 1.0, %v1167_v6 }
 0x4b1   : > { %2056 = vmatpush.bf16.msra.mxu1 %v4193_v4  ;;  %v5153_v4 = vld [vmem:[%s6089_s28 + $0x31c] sm:$0xf] }
 0x4b2   : > { %v4405_v8 = vor.u32 %v5153_v4, %v4402_v5  ;;  %v5080_v4 = vld [vmem:[%s6089_s28 + $0xcc] sm:$0xf0]  ;;  %v5072_v5 = vld [vmem:[%s6089_s28 + $0x94] sm:$0xf] }
 0x4b5   : > { %2057 = vmatpush.bf16.msra.mxu1 %v4129_v16 }
 0x528   : > { %v1061_v60 = vpop.f32.mrf.mxu0 }
 0x530   : > { %v1063_v61 = vpop.f32.mrf.mxu0 }
 0x531   : > { %v1066_v62 = vpack.c.bf16 %v1063_v61, %v1061_v60  ;;  %v4184_v60 = vld [vmem:[%s6089_s28 + $0x180] sm:$0xf] }
 0x532   : > { %v5110_v61 = vld [vmem:[%s6089_s28 + $0x1bc] sm:$0xf0] }
 0x533   : > { %3972 = vmatmul.msk.bf16.vlgmr.msrb.gmra.mxu1 %vm917_vm0, %v1066_v62  ;;  %v5102_v62 = vld [vmem:[%s6089_s28 + $0x184] sm:$0xf]  ;;  %v4185_v63 = vor.u32 %v5110_v61, %v4184_v60  ;;  %v5160_v60 = vld [vmem:[%s6089_s28 + $0x34c] sm:$0xf0] }
 0x534   : > { %v4189_v3 = vor.u32 %v5102_v62, %v4186_v0  ;;  %v4393_v62 = vor.u32 %v5160_v60, %v4392_v59  ;;  %v4394_v0 = vld [vmem:[%s6089_s28 + $0x350] sm:$0xf0] }
 0x535   : > { %2028 = vmatpush.bf16.msrb.mxu3 %v4185_v63  ;;  %v5152_v63 = vld [vmem:[%s6089_s28 + $0x314] sm:$0xf] }
 0x536   : > { %v4397_v2 = vor.u32 %v5152_v63, %v4394_v0 }
 0x539   : > { %2029 = vmatpush.bf16.msrb.mxu3 %v4121_v11  ;;  %v5136_v11 = vld [vmem:[%s6089_s28 + $0x294] sm:$0xf] }
 0x53a   : > { %v4333_v16 = vor.u32 %v5136_v11, %v4330_v13  ;;  %v5073_v13 = vld [vmem:[%s6089_s28 + $0x9c] sm:$0xf] }
 0x53d   : > { %2030 = vmatpush.bf16.msrb.mxu3 %v4057_v25  ;;  %v5128_v25 = vld [vmem:[%s6089_s28 + $0x24c] sm:$0xf0] }
 0x5b0   : > { %v1111_v38 = vpop.f32.mrf.mxu1 }
 0x5b1   : > { %v1153_v40 = vadd.f32 %v1152_v30, %v1111_v38  ;;  %v4065_v30 = vor.u32 %v5079_v28, %v4064_v27  ;;  %v4265_v27 = vor.u32 %v5128_v25, %v4264_v24  ;;  %v4266_v28 = vld [vmem:[%s6089_s28 + $0x250] sm:$0xf0] }
 0x5b2   : > { %v4269_v31 = vor.u32 %v5120_v26, %v4266_v28  ;;  %v4010_v25 = vld [vmem:[%s6089_s28 + $0x50] sm:$0xf0]  ;;  %v4016_v26 = vld [vmem:[%s6089_s28 + $0x18] sm:$0xf] }
 0x5b3   : > { %v1158_v41 = vadd.f32 %v5418_v35, %v1153_v40  ;;  %2058 = vmatpush.bf16.msra.mxu1 %v4065_v30  ;;  %v4000_v40 = vld [vmem:[%s6089_s28 + $0x8] sm:$0xf]  ;;  %v5129_v30 = vld [vmem:[%s6089_s28 + $0x254] sm:$0xf0] }
 0x5b5   : > { %v6217_v42 = vadd.f32 %v1158_v41, %v6147_v20  ;;  %v5063_v41 = vld [vmem:[%s6089_s28 + $0x44] sm:$0xf0] }
 0x5b7   : > { %1162 = vadd.xlane.f32.xlu0 %v6217_v42  ;;  %v1175_v48 = vmul.f32 %v6217_v42, %v6217_v42 }
 0x5b8   : > { %v1113_v44 = vpop.f32.mrf.mxu1 }
 0x5b9   : > { %v1155_v45 = vadd.f32 %v1154_v43, %v1113_v44  ;;  %v3997_v43 = vor.u32 %v5054_v37, %v3994_v39  ;;  %v4001_v44 = vor.u32 %v5063_v41, %v4000_v40  ;;  %v4277_v37 = vor.u32 %v5121_v33, %v4274_v34  ;;  %v5112_v39 = vld [vmem:[%s6089_s28 + $0x1cc] sm:$0xf0]  ;;  %v5104_v40 = vld [vmem:[%s6089_s28 + $0x194] sm:$0xf] }
 0x5bb   : > { %v1159_v46 = vadd.f32 %v5418_v35, %v1155_v45  ;;  %v3992_v35 = vld [vmem:[%s6089_s28] sm:$0xf]  ;;  %v5055_v45 = vld [vmem:[%s6089_s28 + $0xc] sm:$0xf]  ;;  %2059 = vmatpush.bf16.msra.mxu1 %v4001_v44  ;;  %v4208_v44 = vld [vmem:[%s6089_s28 + $0x198] sm:$0xf] }
 0x5bc   : > { %v3993_v38 = vor.u32 %v5062_v36, %v3992_v35  ;;  %v1169_v35 = vmul.f32 %v6275_v56, %v1168_v21  ;;  %v5064_v21 = vld [vmem:[%s6089_s28 + $0x4c] sm:$0xf0] }
 0x5bd   : > { %v6221_v47 = vadd.f32 %v1159_v46, %v6149_v23  ;;  %v4250_v23 = vld [vmem:[%s6089_s28 + $0x240] sm:$0xf0]  ;;  %v4002_v46 = vld [vmem:[%s6089_s28 + $0x48] sm:$0xf0]  ;;  %v4009_v24 = vor.u32 %v5064_v21, %v4008_v19 }
 0x5be   : > { %v4253_v55 = vor.u32 %v5118_v51, %v4250_v23  ;;  %2031 = vmatpush.bf16.msrb.mxu3 %v3993_v38  ;;  %v4458_v51 = vld [vmem:[%s6089_s28 + $0x3d0] sm:$0xf0]  ;;  %v4200_v38 = vld [vmem:[%s6089_s28 + $0x190] sm:$0xf] }
 0x5bf   : > { %1164 = vadd.xlane.f32.xlu0 %v6221_v47  ;;  %v1176_v20 = vmul.f32 %v6221_v47, %v6221_v47  ;;  %v4461_v23 = vor.u32 %v5168_v50, %v4458_v51  ;;  %2108 = vmatpush.bf16.msrb.mxu1 %v4465_v57  ;;  %v4201_v41 = vor.u32 %v5112_v39, %v4200_v38  ;;  %v4144_v57 = vld [vmem:[%s6089_s28 + $0x118] sm:$0xf] }
 0x5c0   : > { %2041 = vmatpush.bf16.msra.mxu0 %v4253_v55  ;;  %v5169_v55 = vld [vmem:[%s6089_s28 + $0x39c] sm:$0xf]  ;;  %v1170_v50 = vadd.f32 %v6275_v56, %v1169_v35 }
 0x5c1   : > { %1179 = vadd.xlane.f32.xlu1 %v1176_v20  ;;  %v4456_v20 = vld [vmem:[%s6089_s28 + $0x390] sm:$0xf]  ;;  %v4469_v61 = vor.u32 %v5169_v55, %v4466_v58  ;;  %v4138_v55 = vld [vmem:[%s6089_s28 + $0x150] sm:$0xf0]  ;;  %v5097_v58 = vld [vmem:[%s6089_s28 + $0x154] sm:$0xf0] }
 0x5c2   : > { %v4457_v52 = vor.u32 %v5176_v49, %v4456_v20  ;;  %v4210_v49 = vld [vmem:[%s6089_s28 + $0x1d8] sm:$0xf0]  ;;  %v4141_v59 = vor.u32 %v5088_v53, %v4138_v55  ;;  %v4145_v60 = vor.u32 %v5097_v58, %v4144_v57  ;;  %v6323_v63 = vsel %vm1171_vm2, %v6275_v56, %v1170_v50  ;;  %v4080_v56 = vld [vmem:[%s6089_s28 + $0x98] sm:$0xf]  ;;  %v5420_v58 = vld [vmem:[%s6095_s18 + $0x2] ss:$0 sm:$0xff] }
 0x5c4   : > { %2042 = vmatpush.bf16.msra.mxu0 %v4189_v3  ;;  %2080 = vmatpush.bf16.msra.mxu3 %v4457_v52  ;;  %v5161_v3 = vld [vmem:[%s6089_s28 + $0x354] sm:$0xf0]  ;;  %v4136_v52 = vld [vmem:[%s6089_s28 + $0x110] sm:$0xf] }
 0x5c5   : > { %v4401_v7 = vor.u32 %v5161_v3, %v4400_v1  ;;  %v4072_v3 = vld [vmem:[%s6089_s28 + $0x90] sm:$0xf] }
 0x5c7   : > { %1177 = vadd.xlane.f32.xlu0 %v1175_v48  ;;  %v4005_v48 = vor.u32 %v5055_v45, %v4002_v46  ;;  %2109 = vmatpush.bf16.msrb.mxu1 %v4401_v7  ;;  %v5113_v45 = vld [vmem:[%s6089_s28 + $0x1d4] sm:$0xf0]  ;;  %v4073_v7 = vor.u32 %v5080_v4, %v4072_v3  ;;  %v5179_v4 = vld [vmem:[%s6089_s28 + $0x3e4] sm:$0xf0] }
 0x5c8   : > { %2043 = vmatpush.bf16.msra.mxu0 %v4125_v15  ;;  %2081 = vmatpush.bf16.msra.mxu3 %v4393_v62  ;;  %v5145_v15 = vld [vmem:[%s6089_s28 + $0x2d4] sm:$0xf0]  ;;  %v4209_v20 = vor.u32 %v5113_v45, %v4208_v44  ;;  %v4146_v62 = vld [vmem:[%s6089_s28 + $0x158] sm:$0xf0] }
 0x5c9   : > { %2073 = vmatpush.bf16.msra.mxu2 %v4005_v48  ;;  %v4337_v17 = vor.u32 %v5145_v15, %v4336_v14  ;;  %v5105_v48 = vld [vmem:[%s6089_s28 + $0x19c] sm:$0xf]  ;;  %v4081_v15 = vor.u32 %v5081_v9, %v4080_v56  ;;  %v4408_v9 = vld [vmem:[%s6089_s28 + $0x320] sm:$0xf] }
 0x5ca   : > { %v4213_v51 = vor.u32 %v5105_v48, %v4210_v49  ;;  %v4082_v14 = vld [vmem:[%s6089_s28 + $0xd8] sm:$0xf0] }
 0x5cb   : > { %2110 = vmatpush.bf16.msrb.mxu1 %v4337_v17 }
 0x5cc   : > { %2044 = vmatpush.bf16.msra.mxu0 %v4061_v29  ;;  %2082 = vmatpush.bf16.msra.mxu3 %v4329_v12  ;;  %v4272_v29 = vld [vmem:[%s6089_s28 + $0x218] sm:$0xf] }
 0x5cd   : > { %2122 = vmatpush.bf16.msrb.mxu2 %v4469_v61  ;;  %v4273_v32 = vor.u32 %v5129_v30, %v4272_v29  ;;  %v5089_v61 = vld [vmem:[%s6089_s28 + $0x11c] sm:$0xf] }
 0x5ce   : > { %v4149_v1 = vor.u32 %v5089_v61, %v4146_v62  ;;  %v4472_v61 = vld [vmem:[%s6089_s28 + $0x3a0] sm:$0xf] }
 0x5cf   : > { %2111 = vmatpush.bf16.msrb.mxu1 %v4273_v32  ;;  %v4018_v32 = vld [vmem:[%s6089_s28 + $0x58] sm:$0xf0]  ;;  %v5178_v62 = vld [vmem:[%s6089_s28 + $0x3dc] sm:$0xf0] }
 0x5d0   : > { %2045 = vmatpush.bf16.msra.mxu0 %v3997_v43  ;;  %2083 = vmatpush.bf16.msra.mxu3 %v4265_v27  ;;  %v4202_v43 = vld [vmem:[%s6089_s28 + $0x1d0] sm:$0xf0]  ;;  %v5065_v27 = vld [vmem:[%s6089_s28 + $0x54] sm:$0xf0] }
 0x5d1   : > { %2123 = vmatpush.bf16.msrb.mxu2 %v4405_v8  ;;  %v4205_v46 = vor.u32 %v5104_v40, %v4202_v43  ;;  %v4074_v8 = vld [vmem:[%s6089_s28 + $0xd0] sm:$0xf0]  ;;  %v4017_v30 = vor.u32 %v5065_v27, %v4016_v26  ;;  %v5138_v27 = vld [vmem:[%s6089_s28 + $0x2a4] sm:$0xf] }
 0x5d2   : > { %v4077_v12 = vor.u32 %v5072_v5, %v4074_v8  ;;  %v5171_v5 = vld [vmem:[%s6089_s28 + $0x3ac] sm:$0xf]  ;;  %v4473_v8 = vor.u32 %v5178_v62, %v4472_v61 }
 0x5d3   : > { %2112 = vmatpush.bf16.msrb.mxu1 %v4209_v20 }
 0x5d4   : > { %2094 = vmatpush.bf16.msrb.mxu0 %v4461_v23  ;;  %v5096_v23 = vld [vmem:[%s6089_s28 + $0x14c] sm:$0xf0]  ;;  %2084 = vmatpush.bf16.msra.mxu3 %v4201_v41 }
 0x5d5   : > { %2124 = vmatpush.bf16.msrb.mxu2 %v4341_v22  ;;  %v4137_v54 = vor.u32 %v5096_v23, %v4136_v52  ;;  %v5056_v22 = vld [vmem:[%s6089_s28 + $0x14] sm:$0xf]  ;;  %v5419_v23 = vld [vmem:[%s6095_s18 + $0x1] ss:$0 sm:$0xff] }
 0x5d6   : > { %v4013_v29 = vor.u32 %v5056_v22, %v4010_v25  ;;  %v4344_v22 = vld [vmem:[%s6089_s28 + $0x2a0] sm:$0xf] }
 0x5d7   : > { %2113 = vmatpush.bf16.msrb.mxu1 %v4145_v60 }
 0x5d8   : > { %2095 = vmatpush.bf16.msrb.mxu0 %v4397_v2  ;;  %2085 = vmatpush.bf16.msra.mxu3 %v4137_v54 }
 0x5d9   : > { %2125 = vmatpush.bf16.msrb.mxu2 %v4277_v37 }
 0x5db   : > { %2114 = vmatpush.bf16.msrb.mxu1 %v4081_v15  ;;  %v4416_v15 = vld [vmem:[%s6089_s28 + $0x328] sm:$0xf] }
 0x5dc   : > { %2096 = vmatpush.bf16.msrb.mxu0 %v4333_v16  ;;  %v4085_v16 = vor.u32 %v5073_v13, %v4082_v14  ;;  %2086 = vmatpush.bf16.msra.mxu3 %v4073_v7  ;;  %v5154_v13 = vld [vmem:[%s6089_s28 + $0x324] sm:$0xf] }
 0x5dd   : > { %2126 = vmatpush.bf16.msrb.mxu2 %v4213_v51  ;;  %v4410_v14 = vld [vmem:[%s6089_s28 + $0x360] sm:$0xf0] }
 0x5de   : > { %v4413_v21 = vor.u32 %v5154_v13, %v4410_v14  ;;  %v5074_v13 = vld [vmem:[%s6089_s28 + $0xa4] sm:$0xf] }
 0x5df   : > { %2115 = vmatpush.bf16.msrb.mxu1 %v4017_v30  ;;  %v5147_v30 = vld [vmem:[%s6089_s28 + $0x2e4] sm:$0xf0]  ;;  %v4090_v14 = vld [vmem:[%s6089_s28 + $0xe0] sm:$0xf0] }
 0x5e0   : > { %2097 = vmatpush.bf16.msrb.mxu0 %v4269_v31  ;;  %v5057_v31 = vld [vmem:[%s6089_s28 + $0x1c] sm:$0xf]  ;;  %2087 = vmatpush.bf16.msra.mxu3 %v4009_v24  ;;  %v5146_v24 = vld [vmem:[%s6089_s28 + $0x2dc] sm:$0xf0] }
 0x5e1   : > { %2127 = vmatpush.bf16.msrb.mxu2 %v4149_v1  ;;  %v4021_v34 = vor.u32 %v5057_v31, %v4018_v32  ;;  %v4474_v1 = vld [vmem:[%s6089_s28 + $0x3e0] sm:$0xf0]  ;;  %v5139_v31 = vld [vmem:[%s6089_s28 + $0x2ac] sm:$0xf] }
 0x5e2   : > { %v4354_v32 = vld [vmem:[%s6089_s28 + $0x2e8] sm:$0xf0] }
 0x5e4   : > { %2098 = vmatpush.bf16.msrb.mxu0 %v4205_v46 }
 0x5e5   : > { %2128 = vmatpush.bf16.msrb.mxu2 %v4085_v16  ;;  %v5163_v16 = vld [vmem:[%s6089_s28 + $0x364] sm:$0xf0] }
 0x5e6   : > { %v4417_v25 = vor.u32 %v5163_v16, %v4416_v15  ;;  %v4096_v15 = vld [vmem:[%s6089_s28 + $0xa8] sm:$0xf] }
 0x5e7   : > { %v5083_v16 = vld [vmem:[%s6089_s28 + $0xe4] sm:$0xf0] }
 0x5e8   : > { %2099 = vmatpush.bf16.msrb.mxu0 %v4141_v59 }
 0x5e9   : > { %2129 = vmatpush.bf16.msrb.mxu2 %v4021_v34 }
 0x5ec   : > { %2100 = vmatpush.bf16.msrb.mxu0 %v4077_v12 }
 0x5f0   : > { %2101 = vmatpush.bf16.msrb.mxu0 %v4013_v29  ;;  %v4352_v29 = vld [vmem:[%s6089_s28 + $0x2a8] sm:$0xf] }
 0x62a   : > { %v1163_v36 = vpop.xlane.xlu0 %1162 }
 0x62b   : > { %v1173_v17 = vmul.f32 %v6323_v63, %v1163_v36 }
 0x62d   : > { %v1183_v35 = vmul.f32 %v1173_v17, %v1173_v17  ;;  %v1209_v55 = vsub.f32 %v6217_v42, %v1173_v17  ;;  %v5155_v17 = vld [vmem:[%s6089_s28 + $0x32c] sm:$0xf] }
 0x632   : > { %v1165_v0 = vpop.xlane.xlu0 %1164 }
 0x633   : > { %v6326_v2 = vmul.f32 %v6323_v63, %v1165_v0  ;;  %v5170_v0 = vld [vmem:[%s6089_s28 + $0x3a4] sm:$0xf] }
 0x634   : > { %v1180_v6 = vpop.xlane.xlu1 %1179  ;;  %v4477_v56 = vor.u32 %v5170_v0, %v4474_v1  ;;  %v5090_v0 = vld [vmem:[%s6089_s28 + $0x124] sm:$0xf] }
 0x635   : > { %v1184_v10 = vmul.f32 %v6326_v2, %v6326_v2  ;;  %v1182_v11 = vmul.f32 %v1180_v6, %v6323_v63  ;;  %v1210_v51 = vsub.f32 %v6221_v47, %v6326_v2  ;;  %v4480_v2 = vld [vmem:[%s6089_s28 + $0x3a8] sm:$0xf]  ;;  %v4482_v6 = vld [vmem:[%s6089_s28 + $0x3e8] sm:$0xf0]  ;;  %v4154_v1 = vld [vmem:[%s6089_s28 + $0x160] sm:$0xf0] }
 0x636   : > { %v4485_v12 = vor.u32 %v5171_v5, %v4482_v6  ;;  %v5091_v5 = vld [vmem:[%s6089_s28 + $0x12c] sm:$0xf] }
 0x637   : > { %v1186_v18 = vsub.f32 %v1182_v11, %v1184_v10  ;;  %v5162_v10 = vld [vmem:[%s6089_s28 + $0x35c] sm:$0xf0]  ;;  %v4481_v11 = vor.u32 %v5179_v4, %v4480_v2  ;;  %v4160_v2 = vld [vmem:[%s6089_s28 + $0x128] sm:$0xf]  ;;  %v4162_v6 = vld [vmem:[%s6089_s28 + $0x168] sm:$0xf0] }
 0x638   : > { %v4409_v19 = vor.u32 %v5162_v10, %v4408_v9  ;;  %v5099_v4 = vld [vmem:[%s6089_s28 + $0x164] sm:$0xf0]  ;;  %v4088_v9 = vld [vmem:[%s6089_s28 + $0xa0] sm:$0xf] }
 0x639   : > { %v1188_v28 = vadd.f32 1e-05, %v1186_v18  ;;  %v4418_v18 = vld [vmem:[%s6089_s28 + $0x368] sm:$0xf0]  ;;  %v5082_v10 = vld [vmem:[%s6089_s28 + $0xdc] sm:$0xf0] }
 0x63a   : > { %v1178_v33 = vpop.xlane.xlu0 %1177  ;;  %v4421_v26 = vor.u32 %v5155_v17, %v4418_v18  ;;  %v5075_v17 = vld [vmem:[%s6089_s28 + $0xac] sm:$0xf] }
 0x63b   : > { %5442 = vrsqrt.f32 %v1188_v28  ;;  %v1181_v36 = vmul.f32 %v1178_v33, %v6323_v63  ;;  %vm1205_vm4 = vweird.f32 %v1188_v28  ;;  %v4345_v33 = vor.u32 %v5146_v24, %v4344_v22  ;;  %v4098_v18 = vld [vmem:[%s6089_s28 + $0xe8] sm:$0xf0]  ;;  %v5066_v24 = vld [vmem:[%s6089_s28 + $0x5c] sm:$0xf0] }
 0x63c   : > { %v4093_v22 = vor.u32 %v5074_v13, %v4090_v14  ;;  %v5124_v13 = vld [vmem:[%s6089_s28 + $0x234] sm:$0xf] }
 0x63d   : > { %v1185_v37 = vsub.f32 %v1181_v36, %v1183_v35  ;;  %v4280_v35 = vld [vmem:[%s6089_s28 + $0x220] sm:$0xf]  ;;  %v4298_v14 = vld [vmem:[%s6089_s28 + $0x270] sm:$0xf0] }
 0x63e   : > { %v5130_v36 = vld [vmem:[%s6089_s28 + $0x25c] sm:$0xf0] }
 0x63f   : > { %v1187_v38 = vadd.f32 1e-05, %v1185_v37  ;;  %v4353_v37 = vor.u32 %v5147_v30, %v4352_v29  ;;  %v4032_v29 = vld [vmem:[%s6089_s28 + $0x28] sm:$0xf] }
 0x640   : > { %v5067_v30 = vld [vmem:[%s6089_s28 + $0x64] sm:$0xf0] }
 0x641   : > { %v5443_v39 = vpop.eup %5442  ;;  %5444 = vrsqrt.f32 %v1187_v38  ;;  %vm1195_vm7 = vweird.f32 %v1187_v38 }
 0x642   : > { %v1200_v40 = vmul.f32 %v5443_v39, %v1188_v28  ;;  %vm1206_vm3 = vweird.f32 %v5443_v39  ;;  %v4346_v28 = vld [vmem:[%s6089_s28 + $0x2e0] sm:$0xf0] }
 0x643   : > { %vm1207_vm5 = vmor %vm1205_vm4, %vm1206_vm3  ;;  %v4349_v34 = vor.u32 %v5138_v27, %v4346_v28  ;;  %v4097_v27 = vor.u32 %v5083_v16, %v4096_v15  ;;  %v4101_v28 = vor.u32 %v5075_v17, %v4098_v18  ;;  %v4304_v15 = vld [vmem:[%s6089_s28 + $0x238] sm:$0xf]  ;;  %v5125_v17 = vld [vmem:[%s6089_s28 + $0x23c] sm:$0xf] }
 0x644   : > { %v1201_v41 = vmul.f32 %v5443_v39, %v1200_v40  ;;  %v4282_v40 = vld [vmem:[%s6089_s28 + $0x260] sm:$0xf0]  ;;  %v5133_v16 = vld [vmem:[%s6089_s28 + $0x274] sm:$0xf0]  ;;  %v4306_v18 = vld [vmem:[%s6089_s28 + $0x278] sm:$0xf0] }
 0x646   : > { %v1202_v43 = vmul.f32 0.5, %v1201_v41  ;;  %v4288_v41 = vld [vmem:[%s6089_s28 + $0x228] sm:$0xf] }
 0x647   : > { %v5445_v44 = vpop.eup %5444 }
 0x648   : > { %v1203_v45 = vsub.f32 1.5, %v1202_v43  ;;  %v1190_v46 = vmul.f32 %v5445_v44, %v1187_v38  ;;  %vm1196_vm6 = vweird.f32 %v5445_v44  ;;  %v4357_v38 = vor.u32 %v5139_v31, %v4354_v32  ;;  %v5131_v43 = vld [vmem:[%s6089_s28 + $0x264] sm:$0xf0]  ;;  %v5059_v31 = vld [vmem:[%s6089_s28 + $0x2c] sm:$0xf] }
 0x649   : > { %vm1197_vm8 = vmor %vm1195_vm7, %vm1196_vm6  ;;  %v4034_v32 = vld [vmem:[%s6089_s28 + $0x68] sm:$0xf0] }
 0x64a   : > { %v1204_v20 = vmul.f32 %v5443_v39, %v1203_v45  ;;  %v1191_v48 = vmul.f32 %v5445_v44, %v1190_v46  ;;  %v4290_v45 = vld [vmem:[%s6089_s28 + $0x268] sm:$0xf0]  ;;  %v4281_v46 = vor.u32 %v5130_v36, %v4280_v35  ;;  %v5172_v35 = vld [vmem:[%s6089_s28 + $0x3b4] sm:$0xf] }
 0x64b   : > { %v4490_v36 = vld [vmem:[%s6089_s28 + $0x3f0] sm:$0xf0] }
 0x64c   : > { %v1208_v49 = vsel %vm1207_vm5, %v5443_v39, %v1204_v20  ;;  %v1192_v50 = vmul.f32 0.5, %v1191_v48  ;;  %v5122_v39 = vld [vmem:[%s6089_s28 + $0x224] sm:$0xf]  ;;  %v4216_v48 = vld [vmem:[%s6089_s28 + $0x1a0] sm:$0xf] }
 0x64d   : > { %v1212_v53 = vmul.f32 %v1210_v51, %v1208_v49  ;;  %v4285_v20 = vor.u32 %v5122_v39, %v4282_v40  ;;  %v5114_v49 = vld [vmem:[%s6089_s28 + $0x1dc] sm:$0xf0]  ;;  %v5181_v40 = vld [vmem:[%s6089_s28 + $0x3f4] sm:$0xf0] }
 0x64e   : > { %v1193_v52 = vsub.f32 1.5, %v1192_v50  ;;  %v4289_v50 = vor.u32 %v5131_v43, %v4288_v41  ;;  %v5173_v41 = vld [vmem:[%s6089_s28 + $0x3bc] sm:$0xf] }
 0x64f   : > { %v1215_v59 = vmul.f32 %v5419_v23, %v1212_v53  ;;  %v4224_v53 = vld [vmem:[%s6089_s28 + $0x1a8] sm:$0xf]  ;;  %v4498_v43 = vld [vmem:[%s6089_s28 + $0x3f8] sm:$0xf0] }
 0x650   : > { %v1194_v54 = vmul.f32 %v5445_v44, %v1193_v52  ;;  %v5106_v52 = vld [vmem:[%s6089_s28 + $0x1a4] sm:$0xf] }
 0x651   : > { %v6359_v3 = vadd.f32 %v5420_v58, %v1215_v59 }
 0x652   : > { %v1198_v57 = vsel %vm1197_vm8, %v5445_v44, %v1194_v54  ;;  %v5123_v44 = vld [vmem:[%s6089_s28 + $0x22c] sm:$0xf]  ;;  %v5115_v54 = vld [vmem:[%s6089_s28 + $0x1e4] sm:$0xf0] }
 0x653   : > { %v1211_v47 = vmul.f32 %v1209_v55, %v1198_v57  ;;  %v4293_v51 = vor.u32 %v5123_v44, %v4290_v45  ;;  %v5107_v55 = vld [vmem:[%s6089_s28 + $0x1ac] sm:$0xf]  ;;  %v4225_v61 = vor.u32 %v5115_v54, %v4224_v53  ;;  %v4033_v44 = vor.u32 %v5067_v30, %v4032_v29  ;;  %v4432_v53 = vld [vmem:[%s6089_s28 + $0x338] sm:$0xf] }
 0x654   : > { %v4226_v57 = vld [vmem:[%s6089_s28 + $0x1e8] sm:$0xf0]  ;;  %v4037_v45 = vor.u32 %v5059_v31, %v4034_v32  ;;  %v5165_v54 = vld [vmem:[%s6089_s28 + $0x374] sm:$0xf0]  ;;  %v5109_v31 = vld [vmem:[%s6089_s28 + $0x1bc] sm:$0xf] }
 0x655   : > { %v1214_v60 = vmul.f32 %v5419_v23, %v1211_v47  ;;  %v4218_v23 = vld [vmem:[%s6089_s28 + $0x1e0] sm:$0xf0]  ;;  %v4152_v47 = vld [vmem:[%s6089_s28 + $0x120] sm:$0xf]  ;;  %v4229_v62 = vor.u32 %v5107_v55, %v4226_v57  ;;  %v5157_v55 = vld [vmem:[%s6089_s28 + $0x33c] sm:$0xf] }
 0x656   : > { %v4221_v59 = vor.u32 %v5106_v52, %v4218_v23  ;;  %v5156_v52 = vld [vmem:[%s6089_s28 + $0x334] sm:$0xf]  ;;  %v4434_v57 = vld [vmem:[%s6089_s28 + $0x378] sm:$0xf0]  ;;  %v4240_v29 = vld [vmem:[%s6089_s28 + $0x1b8] sm:$0xf] }
 0x657   : > { %v6361_v42 = vadd.f32 %v5420_v58, %v1214_v60  ;;  %v4217_v58 = vor.u32 %v5114_v49, %v4216_v48  ;;  %v5098_v60 = vld [vmem:[%s6089_s28 + $0x15c] sm:$0xf0]  ;;  %v4424_v48 = vld [vmem:[%s6089_s28 + $0x330] sm:$0xf]  ;;  %v4426_v23 = vld [vmem:[%s6089_s28 + $0x370] sm:$0xf0] }
 0x658   : > { %v5164_v49 = vld [vmem:[%s6089_s28 + $0x36c] sm:$0xf0]  ;;  %v5117_v30 = vld [vmem:[%s6089_s28 + $0x1f4] sm:$0xf0]  ;;  %v4242_v32 = vld [vmem:[%s6089_s28 + $0x1f8] sm:$0xf0] }
 0x659   : > { %v6368_v7 = vpack.c.bf16 %v6359_v3, %v6361_v42 }
 0x65b   : > { %2032 = vmatmul.bf16.vlgmr.msrb.gmra.mxu3 %v6368_v7  ;;  %2046 = vmatmul.bf16.vlgmr.msra.gmra.mxu0 %v6368_v7 }
 0x65c   : > { %2060 = vmatmul.bf16.vlgmr.msra.gmra.mxu1 %v6368_v7  ;;  %2074 = vmatmul.bf16.vlgmr.msra.gmra.mxu2 %v6368_v7 }
 0x65d   : > { %2136 = vmatpush.bf16.msrb.mxu3 %v4473_v8  ;;  %2150 = vmatpush.bf16.msra.mxu0 %v4477_v56  ;;  %v4153_v8 = vor.u32 %v5098_v60, %v4152_v47  ;;  %v4157_v56 = vor.u32 %v5090_v0, %v4154_v1  ;;  %v4360_v47 = vld [vmem:[%s6089_s28 + $0x2b0] sm:$0xf]  ;;  %v5140_v0 = vld [vmem:[%s6089_s28 + $0x2b4] sm:$0xf] }
 0x65e   : > { %2164 = vmatpush.bf16.msra.mxu1 %v4481_v11  ;;  %2178 = vmatpush.bf16.msra.mxu2 %v4485_v12  ;;  %v4161_v11 = vor.u32 %v5099_v4, %v4160_v2  ;;  %v4165_v12 = vor.u32 %v5091_v5, %v4162_v6  ;;  %v5148_v60 = vld [vmem:[%s6089_s28 + $0x2ec] sm:$0xf0]  ;;  %v4362_v1 = vld [vmem:[%s6089_s28 + $0x2f0] sm:$0xf0]  ;;  %v4368_v2 = vld [vmem:[%s6089_s28 + $0x2b8] sm:$0xf] }
 0x65f   : > { %v5149_v4 = vld [vmem:[%s6089_s28 + $0x2f4] sm:$0xf0]  ;;  %v5141_v5 = vld [vmem:[%s6089_s28 + $0x2bc] sm:$0xf] }
 0x660   : > { %v4370_v6 = vld [vmem:[%s6089_s28 + $0x2f8] sm:$0xf0] }
 0x661   : > { %2137 = vmatpush.bf16.msrb.mxu3 %v4409_v19  ;;  %2151 = vmatpush.bf16.msra.mxu0 %v4413_v21  ;;  %v4024_v19 = vld [vmem:[%s6089_s28 + $0x20] sm:$0xf]  ;;  %v4089_v21 = vor.u32 %v5082_v10, %v4088_v9  ;;  %v4296_v9 = vld [vmem:[%s6089_s28 + $0x230] sm:$0xf] }
 0x662   : > { %2165 = vmatpush.bf16.msra.mxu1 %v4417_v25  ;;  %2179 = vmatpush.bf16.msra.mxu2 %v4421_v26  ;;  %v5058_v25 = vld [vmem:[%s6089_s28 + $0x24] sm:$0xf]  ;;  %v5132_v10 = vld [vmem:[%s6089_s28 + $0x26c] sm:$0xf0] }
 0x663   : > { %v4026_v26 = vld [vmem:[%s6089_s28 + $0x60] sm:$0xf0] }
 0x664   : > { %v4029_v39 = vor.u32 %v5058_v25, %v4026_v26  ;;  %v4305_v25 = vor.u32 %v5133_v16, %v4304_v15  ;;  %v4309_v26 = vor.u32 %v5125_v17, %v4306_v18  ;;  %v5196_v15 = vld [vmem:[%s6093_s21 + $0x70] sm:$0xff] }
 0x665   : > { %2138 = vmatpush.bf16.msrb.mxu3 %v4345_v33  ;;  %2152 = vmatpush.bf16.msra.mxu0 %v4349_v34  ;;  %v4488_v33 = vld [vmem:[%s6089_s28 + $0x3b0] sm:$0xf] }
 0x666   : > { %2166 = vmatpush.bf16.msra.mxu1 %v4353_v37  ;;  %2180 = vmatpush.bf16.msra.mxu2 %v4357_v38  ;;  %v5180_v34 = vld [vmem:[%s6089_s28 + $0x3ec] sm:$0xf0]  ;;  %v4496_v37 = vld [vmem:[%s6089_s28 + $0x3b8] sm:$0xf]  ;;  %v4025_v38 = vor.u32 %v5066_v24, %v4024_v19  ;;  %v4297_v19 = vor.u32 %v5132_v10, %v4296_v9 }
 0x667   : > { %v5116_v24 = vld [vmem:[%s6089_s28 + $0x1ec] sm:$0xf0] }
 0x668   : > { %v5204_v16 = vld [vmem:[%s6093_s21 + $0xb0] sm:$0xff] }
 0x669   : > { %2139 = vmatpush.bf16.msrb.mxu3 %v4281_v46  ;;  %2153 = vmatpush.bf16.msra.mxu0 %v4285_v20  ;;  %v4489_v46 = vor.u32 %v5180_v34, %v4488_v33  ;;  %v4493_v20 = vor.u32 %v5172_v35, %v4490_v36  ;;  %v4168_v35 = vld [vmem:[%s6089_s28 + $0x130] sm:$0xf] }
 0x66a   : > { %2167 = vmatpush.bf16.msra.mxu1 %v4289_v50  ;;  %2181 = vmatpush.bf16.msra.mxu2 %v4293_v51  ;;  %v4497_v50 = vor.u32 %v5181_v40, %v4496_v37  ;;  %v4501_v51 = vor.u32 %v5173_v41, %v4498_v43  ;;  %v5100_v36 = vld [vmem:[%s6089_s28 + $0x16c] sm:$0xf0]  ;;  %v4241_v37 = vor.u32 %v5117_v30, %v4240_v29  ;;  %v4170_v40 = vld [vmem:[%s6089_s28 + $0x170] sm:$0xf0]  ;;  %v4176_v41 = vld [vmem:[%s6089_s28 + $0x138] sm:$0xf] }
 0x66b   : > { %2088 = vmatmul.bf16.vlgmr.msra.gmra.mxu3 %v6368_v7  ;;  %2102 = vmatmul.bf16.vlgmr.msrb.gmra.mxu0 %v6368_v7  ;;  %v5101_v43 = vld [vmem:[%s6089_s28 + $0x174] sm:$0xf0]  ;;  %v5188_v17 = vld [vmem:[%s6093_s21 + $0x30] sm:$0xff] }
 0x66c   : > { %2116 = vmatmul.bf16.vlgmr.msrb.gmra.mxu1 %v6368_v7  ;;  %2130 = vmatmul.bf16.vlgmr.msrb.gmra.mxu2 %v6368_v7  ;;  %v5212_v18 = vld [vmem:[%s6093_s21 + $0xf0] sm:$0xff]  ;;  %v5201_v29 = vld [vmem:[%s6093_s21 + $0x98] sm:$0xff] }
 0x66d   : > { %2140 = vmatpush.bf16.msrb.mxu3 %v4217_v58  ;;  %2154 = vmatpush.bf16.msra.mxu0 %v4221_v59  ;;  %v4425_v58 = vor.u32 %v5164_v49, %v4424_v48  ;;  %v4429_v59 = vor.u32 %v5156_v52, %v4426_v23  ;;  %v4104_v48 = vld [vmem:[%s6089_s28 + $0xb0] sm:$0xf]  ;;  %v5076_v52 = vld [vmem:[%s6089_s28 + $0xb4] sm:$0xf]  ;;  %v5185_v30 = vld [vmem:[%s6093_s21 + $0x18] sm:$0xff] }
 0x66e   : > { %2168 = vmatpush.bf16.msra.mxu1 %v4225_v61  ;;  %2182 = vmatpush.bf16.msra.mxu2 %v4229_v62  ;;  %v4433_v61 = vor.u32 %v5165_v54, %v4432_v53  ;;  %v4437_v62 = vor.u32 %v5157_v55, %v4434_v57  ;;  %v5084_v49 = vld [vmem:[%s6089_s28 + $0xec] sm:$0xf0]  ;;  %v4106_v23 = vld [vmem:[%s6089_s28 + $0xf0] sm:$0xf0]  ;;  %v4112_v53 = vld [vmem:[%s6089_s28 + $0xb8] sm:$0xf] }
 0x66f   : > { %v5085_v54 = vld [vmem:[%s6089_s28 + $0xf4] sm:$0xf0]  ;;  %v5077_v55 = vld [vmem:[%s6089_s28 + $0xbc] sm:$0xf] }
 0x670   : > { %v4114_v57 = vld [vmem:[%s6089_s28 + $0xf8] sm:$0xf0] }
 0x671   : > { %2141 = vmatpush.bf16.msrb.mxu3 %v4153_v8  ;;  %2155 = vmatpush.bf16.msra.mxu0 %v4157_v56  ;;  %v4361_v8 = vor.u32 %v5148_v60, %v4360_v47  ;;  %v4365_v56 = vor.u32 %v5140_v0, %v4362_v1  ;;  %v4040_v47 = vld [vmem:[%s6089_s28 + $0x30] sm:$0xf]  ;;  %v5060_v0 = vld [vmem:[%s6089_s28 + $0x34] sm:$0xf] }
 0x672   : > { %2169 = vmatpush.bf16.msra.mxu1 %v4161_v11  ;;  %2183 = vmatpush.bf16.msra.mxu2 %v4165_v12  ;;  %v4369_v11 = vor.u32 %v5149_v4, %v4368_v2  ;;  %v4373_v12 = vor.u32 %v5141_v5, %v4370_v6  ;;  %v5068_v60 = vld [vmem:[%s6089_s28 + $0x6c] sm:$0xf0]  ;;  %v4042_v1 = vld [vmem:[%s6089_s28 + $0x70] sm:$0xf0]  ;;  %v4048_v2 = vld [vmem:[%s6089_s28 + $0x38] sm:$0xf] }
 0x673   : > { %v5069_v4 = vld [vmem:[%s6089_s28 + $0x74] sm:$0xf0]  ;;  %v5061_v5 = vld [vmem:[%s6089_s28 + $0x3c] sm:$0xf] }
 0x674   : > { %v4050_v6 = vld [vmem:[%s6089_s28 + $0x78] sm:$0xf0]  ;;  %v4049_v9 = vor.u32 %v5069_v4, %v4048_v2  ;;  %v5232_v2 = vld [vmem:[%s6093_s21 + $0x190] sm:$0xff] }
 0x675   : > { %2142 = vmatpush.bf16.msrb.mxu3 %v4089_v21  ;;  %2156 = vmatpush.bf16.msra.mxu0 %v4093_v22  ;;  %v4301_v21 = vor.u32 %v5124_v13, %v4298_v14  ;;  %v4232_v22 = vld [vmem:[%s6089_s28 + $0x1b0] sm:$0xf]  ;;  %v4053_v10 = vor.u32 %v5061_v5, %v4050_v6  ;;  %v5189_v13 = vld [vmem:[%s6093_s21 + $0x38] sm:$0xff]  ;;  %v5223_v6 = vld [vmem:[%s6093_s21 + $0x148] sm:$0xff] }
 0x676   : > { %2170 = vmatpush.bf16.msra.mxu1 %v4097_v27  ;;  %2184 = vmatpush.bf16.msra.mxu2 %v4101_v28  ;;  %v5108_v27 = vld [vmem:[%s6089_s28 + $0x1b4] sm:$0xf]  ;;  %v4233_v33 = vor.u32 %v5116_v24, %v4232_v22  ;;  %v5213_v14 = vld [vmem:[%s6093_s21 + $0xf8] sm:$0xff]  ;;  %v5187_v22 = vld [vmem:[%s6093_s21 + $0x28] sm:$0xff] }
 0x677   : > { %v4234_v28 = vld [vmem:[%s6089_s28 + $0x1f0] sm:$0xf0]  ;;  %v5211_v24 = vld [vmem:[%s6093_s21 + $0xe8] sm:$0xff] }
 0x678   : > { %v4237_v34 = vor.u32 %v5108_v27, %v4234_v28  ;;  %v5210_v27 = vld [vmem:[%s6093_s21 + $0xe0] sm:$0xff]  ;;  %v5193_v28 = vld [vmem:[%s6093_s21 + $0x58] sm:$0xff]  ;;  %v5216_v4 = vld [vmem:[%s6093_s21 + $0x110] sm:$0xff] }
 0x679   : > { %2143 = vmatpush.bf16.msrb.mxu3 %v4025_v38  ;;  %2157 = vmatpush.bf16.msra.mxu0 %v4029_v39  ;;  %v4245_v38 = vor.u32 %v5109_v31, %v4242_v32  ;;  %v5092_v39 = vld [vmem:[%s6089_s28 + $0x134] sm:$0xf]  ;;  %v5209_v31 = vld [vmem:[%s6093_s21 + $0xd8] sm:$0xff] }
 0x67a   : > { %2171 = vmatpush.bf16.msra.mxu1 %v4033_v44  ;;  %2185 = vmatpush.bf16.msra.mxu2 %v4037_v45  ;;  %v5093_v44 = vld [vmem:[%s6089_s28 + $0x13c] sm:$0xf]  ;;  %v5192_v32 = vld [vmem:[%s6093_s21 + $0x50] sm:$0xff] }
 0x67b   : > { %v4178_v45 = vld [vmem:[%s6089_s28 + $0x178] sm:$0xf0]  ;;  %v5240_v5 = vld [vmem:[%s6093_s21 + $0x1d0] sm:$0xff] }
 0x67c   : > { %2144 = vmatmul.bf16.vlgmr.msrb.gmra.mxu3 %v6368_v7  ;;  %2158 = vmatmul.bf16.vlgmr.msra.gmra.mxu0 %v6368_v7 }
 0x67d   : > { %2192 = vmatpush.bf16.msra.mxu3 %v4489_v46  ;;  %2206 = vmatpush.bf16.msrb.mxu0 %v4493_v20  ;;  %v4169_v46 = vor.u32 %v5100_v36, %v4168_v35  ;;  %v4173_v20 = vor.u32 %v5092_v39, %v4170_v40  ;;  %v5208_v35 = vld [vmem:[%s6093_s21 + $0xd0] sm:$0xff]  ;;  %v5191_v36 = vld [vmem:[%s6093_s21 + $0x48] sm:$0xff]  ;;  %v5190_v40 = vld [vmem:[%s6093_s21 + $0x40] sm:$0xff] }
 0x67e   : > { %2220 = vmatpush.bf16.msrb.mxu1 %v4497_v50  ;;  %2234 = vmatpush.bf16.msrb.mxu2 %v4501_v51  ;;  %v4177_v50 = vor.u32 %v5101_v43, %v4176_v41  ;;  %v4181_v51 = vor.u32 %v5093_v44, %v4178_v45  ;;  %v5207_v39 = vld [vmem:[%s6093_s21 + $0xc8] sm:$0xff]  ;;  %v5198_v41 = vld [vmem:[%s6093_s21 + $0x80] sm:$0xff]  ;;  %v5229_v43 = vld [vmem:[%s6093_s21 + $0x178] sm:$0xff] }
 0x67f   : > { %2172 = vmatmul.bf16.vlgmr.msra.gmra.mxu1 %v6368_v7  ;;  %2186 = vmatmul.bf16.vlgmr.msra.gmra.mxu2 %v6368_v7  ;;  %v5237_v44 = vld [vmem:[%s6093_s21 + $0x1b8] sm:$0xff]  ;;  %v5182_v45 = vld [vmem:[%s6093_s21] sm:$0xff] }
 0x681   : > { %2193 = vmatpush.bf16.msra.mxu3 %v4425_v58  ;;  %2207 = vmatpush.bf16.msrb.mxu0 %v4429_v59  ;;  %v4105_v58 = vor.u32 %v5084_v49, %v4104_v48  ;;  %v4109_v59 = vor.u32 %v5076_v52, %v4106_v23  ;;  %v5245_v48 = vld [vmem:[%s6093_s21 + $0x1f8] sm:$0xff]  ;;  %v5228_v49 = vld [vmem:[%s6093_s21 + $0x170] sm:$0xff]  ;;  %v5227_v23 = vld [vmem:[%s6093_s21 + $0x168] sm:$0xff] }
 0x682   : > { %2221 = vmatpush.bf16.msrb.mxu1 %v4433_v61  ;;  %2235 = vmatpush.bf16.msrb.mxu2 %v4437_v62  ;;  %v4113_v61 = vor.u32 %v5085_v54, %v4112_v53  ;;  %v4117_v62 = vor.u32 %v5077_v55, %v4114_v57  ;;  %v5244_v52 = vld [vmem:[%s6093_s21 + $0x1f0] sm:$0xff]  ;;  %v5235_v53 = vld [vmem:[%s6093_s21 + $0x1a8] sm:$0xff]  ;;  %v5226_v57 = vld [vmem:[%s6093_s21 + $0x160] sm:$0xff] }
 0x683   : > { %v5219_v54 = vld [vmem:[%s6093_s21 + $0x128] sm:$0xff] }
 0x684   : > { %v5243_v55 = vld [vmem:[%s6093_s21 + $0x1e8] sm:$0xff] }
 0x685   : > { %2194 = vmatpush.bf16.msra.mxu3 %v4361_v8  ;;  %2208 = vmatpush.bf16.msrb.mxu0 %v4365_v56  ;;  %v4041_v8 = vor.u32 %v5068_v60, %v4040_v47  ;;  %v4045_v56 = vor.u32 %v5060_v0, %v4042_v1  ;;  %v5242_v47 = vld [vmem:[%s6093_s21 + $0x1e0] sm:$0xff]  ;;  %v5225_v60 = vld [vmem:[%s6093_s21 + $0x158] sm:$0xff]  ;;  %v5224_v1 = vld [vmem:[%s6093_s21 + $0x150] sm:$0xff] }
 0x686   : > { %2222 = vmatpush.bf16.msrb.mxu1 %v4369_v11  ;;  %2236 = vmatpush.bf16.msrb.mxu2 %v4373_v12  ;;  %v5197_v11 = vld [vmem:[%s6093_s21 + $0x78] sm:$0xff] }
 0x687   : > { %v5205_v12 = vld [vmem:[%s6093_s21 + $0xb8] sm:$0xff] }
 0x688   : > { %v5241_v0 = vld [vmem:[%s6093_s21 + $0x1d8] sm:$0xff] }
 0x689   : > { %2195 = vmatpush.bf16.msra.mxu3 %v4297_v19  ;;  %2209 = vmatpush.bf16.msrb.mxu0 %v4301_v21  ;;  %v5195_v19 = vld [vmem:[%s6093_s21 + $0x68] sm:$0xff] }
 0x68a   : > { %2223 = vmatpush.bf16.msrb.mxu1 %v4305_v25  ;;  %2237 = vmatpush.bf16.msrb.mxu2 %v4309_v26  ;;  %v5203_v21 = vld [vmem:[%s6093_s21 + $0xa8] sm:$0xff]  ;;  %v5202_v25 = vld [vmem:[%s6093_s21 + $0xa0] sm:$0xff] }
 0x68b   : > { %v5186_v26 = vld [vmem:[%s6093_s21 + $0x20] sm:$0xff] }
 0x68d   : > { %2196 = vmatpush.bf16.msra.mxu3 %v4233_v33  ;;  %2210 = vmatpush.bf16.msrb.mxu0 %v4237_v34  ;;  %v5200_v33 = vld [vmem:[%s6093_s21 + $0x90] sm:$0xff] }
 0x68e   : > { %2224 = vmatpush.bf16.msrb.mxu1 %v4241_v37  ;;  %2238 = vmatpush.bf16.msrb.mxu2 %v4245_v38  ;;  %v5184_v34 = vld [vmem:[%s6093_s21 + $0x10] sm:$0xff]  ;;  %v5199_v37 = vld [vmem:[%s6093_s21 + $0x88] sm:$0xff] }
 0x68f   : > { %v5183_v38 = vld [vmem:[%s6093_s21 + $0x8] sm:$0xff] }
 0x691   : > { %2197 = vmatpush.bf16.msra.mxu3 %v4169_v46  ;;  %2211 = vmatpush.bf16.msrb.mxu0 %v4173_v20  ;;  %v5206_v46 = vld [vmem:[%s6093_s21 + $0xc0] sm:$0xff]  ;;  %v5221_v20 = vld [vmem:[%s6093_s21 + $0x138] sm:$0xff] }
 0x692   : > { %2225 = vmatpush.bf16.msrb.mxu1 %v4177_v50  ;;  %2239 = vmatpush.bf16.msrb.mxu2 %v4181_v51  ;;  %v5236_v50 = vld [vmem:[%s6093_s21 + $0x1b0] sm:$0xff] }
 0x693   : > { %v5220_v51 = vld [vmem:[%s6093_s21 + $0x130] sm:$0xff] }
 0x695   : > { %2198 = vmatpush.bf16.msra.mxu3 %v4105_v58  ;;  %2212 = vmatpush.bf16.msrb.mxu0 %v4109_v59  ;;  %v5234_v58 = vld [vmem:[%s6093_s21 + $0x1a0] sm:$0xff] }
 0x696   : > { %2226 = vmatpush.bf16.msrb.mxu1 %v4113_v61  ;;  %2240 = vmatpush.bf16.msrb.mxu2 %v4117_v62  ;;  %v5218_v59 = vld [vmem:[%s6093_s21 + $0x120] sm:$0xff]  ;;  %v5233_v61 = vld [vmem:[%s6093_s21 + $0x198] sm:$0xff] }
 0x697   : > { %v5217_v62 = vld [vmem:[%s6093_s21 + $0x118] sm:$0xff] }
 0x699   : > { %2199 = vmatpush.bf16.msra.mxu3 %v4041_v8  ;;  %2213 = vmatpush.bf16.msrb.mxu0 %v4045_v56  ;;  %v5231_v8 = vld [vmem:[%s6093_s21 + $0x188] sm:$0xff] }
 0x69a   : > { %2227 = vmatpush.bf16.msrb.mxu1 %v4049_v9  ;;  %2241 = vmatpush.bf16.msrb.mxu2 %v4053_v10  ;;  %v5215_v56 = vld [vmem:[%s6093_s21 + $0x108] sm:$0xff]  ;;  %v5222_v10 = vld [vmem:[%s6093_s21 + $0x140] sm:$0xff] }
 0x69b   : > { %v5239_v9 = vld [vmem:[%s6093_s21 + $0x1c8] sm:$0xff] }
 0x69c   : > { %2200 = vmatmul.bf16.vlgmr.msra.gmra.mxu3 %v6368_v7  ;;  %2214 = vmatmul.bf16.vlgmr.msrb.gmra.mxu0 %v6368_v7 }
 0x69d   : > { %3335 = vmatpush.bf16.msra.mxu0 %v5197_v11  ;;  %2228 = vmatmul.bf16.vlgmr.msrb.gmra.mxu1 %v6368_v7  ;;  %v5230_v11 = vld [vmem:[%s6093_s21 + $0x180] sm:$0xff] }
 0x69e   : > { %3349 = vmatpush.bf16.msra.mxu1 %v5205_v12  ;;  %2242 = vmatmul.bf16.vlgmr.msrb.gmra.mxu2 %v6368_v7  ;;  %v5194_v7 = vld [vmem:[%s6093_s21 + $0x60] sm:$0xff] }
 0x69f   : > { %3321 = vmatpush.bf16.msrb.mxu3 %v5189_v13  ;;  %3363 = vmatpush.bf16.msra.mxu2 %v5213_v14  ;;  %v5214_v12 = vld [vmem:[%s6093_s21 + $0x100] sm:$0xff] }
 0x6a0   : > { %v5238_v13 = vld [vmem:[%s6093_s21 + $0x1c0] sm:$0xff] }
 0x6a1   : > { %3336 = vmatpush.bf16.msra.mxu0 %v5196_v15  ;;  %v6571_v14 = vld [vmem:[%s6091_s30] sm:$0xff] }
 0x6a2   : > { %3350 = vmatpush.bf16.msra.mxu1 %v5204_v16 }
 0x6a3   : > { %3322 = vmatpush.bf16.msrb.mxu3 %v5188_v17  ;;  %3364 = vmatpush.bf16.msra.mxu2 %v5212_v18  ;;  %v1353_v17 = vperm.slane %v6571_v14, 1  ;;  %v1354_v18 = vperm.slane %v6571_v14, 2 }
 0x6a5   : > { %3337 = vmatpush.bf16.msra.mxu0 %v5195_v19 }
 0x6a6   : > { %3351 = vmatpush.bf16.msra.mxu1 %v5203_v21 }
 0x6a7   : > { %3323 = vmatpush.bf16.msrb.mxu3 %v5187_v22  ;;  %3365 = vmatpush.bf16.msra.mxu2 %v5211_v24 }
 0x6a9   : > { %3338 = vmatpush.bf16.msra.mxu0 %v5194_v7 }
 0x6aa   : > { %3352 = vmatpush.bf16.msra.mxu1 %v5202_v25  ;;  %v1352_v25 = vperm.slane %v6571_v14, 0 }
 0x6ab   : > { %3324 = vmatpush.bf16.msrb.mxu3 %v5186_v26  ;;  %3366 = vmatpush.bf16.msra.mxu2 %v5210_v27 }
 0x6ad   : > { %3339 = vmatpush.bf16.msra.mxu0 %v5193_v28  ;;  %v1355_v28 = vperm.slane %v6571_v14, 3 }
 0x6ae   : > { %3353 = vmatpush.bf16.msra.mxu1 %v5201_v29 }
 0x6af   : > { %3325 = vmatpush.bf16.msrb.mxu3 %v5185_v30  ;;  %3367 = vmatpush.bf16.msra.mxu2 %v5209_v31 }
 0x6b1   : > { %3340 = vmatpush.bf16.msra.mxu0 %v5192_v32 }
 0x6b2   : > { %3354 = vmatpush.bf16.msra.mxu1 %v5200_v33 }
 0x6b3   : > { %3326 = vmatpush.bf16.msrb.mxu3 %v5184_v34  ;;  %3368 = vmatpush.bf16.msra.mxu2 %v5208_v35  ;;  %v5261_v34 = vld [vmem:[%s6093_s21 + $0x278] sm:$0xff] }
 0x6b5   : > { %3341 = vmatpush.bf16.msra.mxu0 %v5191_v36 }
 0x6b6   : > { %3355 = vmatpush.bf16.msra.mxu1 %v5199_v37  ;;  %v5269_v37 = vld [vmem:[%s6093_s21 + $0x2b8] sm:$0xff] }
 0x6b7   : > { %3327 = vmatpush.bf16.msrb.mxu3 %v5183_v38  ;;  %3369 = vmatpush.bf16.msra.mxu2 %v5207_v39 }
 0x6b9   : > { %3342 = vmatpush.bf16.msra.mxu0 %v5190_v40 }
 0x6ba   : > { %3356 = vmatpush.bf16.msra.mxu1 %v5198_v41 }
 0x6bb   : > { %3328 = vmatpush.bf16.msrb.mxu3 %v5182_v45  ;;  %3370 = vmatpush.bf16.msra.mxu2 %v5206_v46  ;;  %v5260_v46 = vld [vmem:[%s6093_s21 + $0x270] sm:$0xff] }
 0x6bd   : > { %3391 = vmatpush.bf16.msrb.mxu0 %v5229_v43 }
 0x6be   : > { %3405 = vmatpush.bf16.msrb.mxu1 %v5237_v44 }
 0x6bf   : > { %3377 = vmatpush.bf16.msra.mxu3 %v5221_v20  ;;  %3419 = vmatpush.bf16.msrb.mxu2 %v5245_v48 }
 0x6c1   : > { %3392 = vmatpush.bf16.msrb.mxu0 %v5228_v49 }
 0x6c2   : > { %3406 = vmatpush.bf16.msrb.mxu1 %v5236_v50  ;;  %v5268_v50 = vld [vmem:[%s6093_s21 + $0x2b0] sm:$0xff] }
 0x6c3   : > { %3378 = vmatpush.bf16.msra.mxu3 %v5220_v51  ;;  %3420 = vmatpush.bf16.msrb.mxu2 %v5244_v52 }
 0x6c5   : > { %3393 = vmatpush.bf16.msrb.mxu0 %v5227_v23  ;;  %v5253_v23 = vld [vmem:[%s6093_s21 + $0x238] sm:$0xff] }
 0x6c6   : > { %3407 = vmatpush.bf16.msrb.mxu1 %v5235_v53 }
 0x6c7   : > { %3379 = vmatpush.bf16.msra.mxu3 %v5219_v54  ;;  %3421 = vmatpush.bf16.msrb.mxu2 %v5243_v55  ;;  %v1357_v54 = vperm.slane %v6571_v14, 5  ;;  %v5277_v55 = vld [vmem:[%s6093_s21 + $0x2f8] sm:$0xff] }
 0x6c9   : > { %3394 = vmatpush.bf16.msrb.mxu0 %v5226_v57 }
 0x6ca   : > { %3408 = vmatpush.bf16.msrb.mxu1 %v5234_v58  ;;  %v1358_v58 = vperm.slane %v6571_v14, 6 }
 0x6cb   : > { %3380 = vmatpush.bf16.msra.mxu3 %v5218_v59  ;;  %3422 = vmatpush.bf16.msrb.mxu2 %v5242_v47  ;;  %v5259_v59 = vld [vmem:[%s6093_s21 + $0x268] sm:$0xff] }
 0x6cc   : > { %v5267_v47 = vld [vmem:[%s6093_s21 + $0x2a8] sm:$0xff] }
 0x6cd   : > { %3395 = vmatpush.bf16.msrb.mxu0 %v5225_v60 }
 0x6ce   : > { %3409 = vmatpush.bf16.msrb.mxu1 %v5233_v61  ;;  %v5252_v61 = vld [vmem:[%s6093_s21 + $0x230] sm:$0xff] }
 0x6cf   : > { %3381 = vmatpush.bf16.msra.mxu3 %v5217_v62  ;;  %3423 = vmatpush.bf16.msrb.mxu2 %v5241_v0 }
 0x6d1   : > { %3396 = vmatpush.bf16.msrb.mxu0 %v5224_v1  ;;  %v5276_v1 = vld [vmem:[%s6093_s21 + $0x2f0] sm:$0xff] }
 0x6d2   : > { %3410 = vmatpush.bf16.msrb.mxu1 %v5232_v2 }
 0x6d3   : > { %3382 = vmatpush.bf16.msra.mxu3 %v5216_v4  ;;  %3424 = vmatpush.bf16.msrb.mxu2 %v5240_v5  ;;  %v5258_v5 = vld [vmem:[%s6093_s21 + $0x260] sm:$0xff] }
 0x6d5   : > { %3397 = vmatpush.bf16.msrb.mxu0 %v5223_v6  ;;  %v1356_v6 = vperm.slane %v6571_v14, 4 }
 0x6d6   : > { %3411 = vmatpush.bf16.msrb.mxu1 %v5231_v8 }
 0x6d7   : > { %3383 = vmatpush.bf16.msra.mxu3 %v5215_v56  ;;  %3425 = vmatpush.bf16.msrb.mxu2 %v5239_v9  ;;  %v5266_v9 = vld [vmem:[%s6093_s21 + $0x2a0] sm:$0xff] }
 0x6d8   : > { %v2047_v15 = vpop.f32.mrf.mxu0 }
 0x6d9   : > { %3398 = vmatpush.bf16.msrb.mxu0 %v5222_v10  ;;  %v2061_v16 = vpop.f32.mrf.mxu1  ;;  %v2048_v21 = vadd.f32 %v2047_v15, %v1353_v17  ;;  %v1359_v10 = vperm.slane %v6571_v14, 7 }
 0x6da   : > { %3412 = vmatpush.bf16.msrb.mxu1 %v5230_v11  ;;  %v2062_v24 = vadd.f32 %v2061_v16, %v1354_v18  ;;  %v5275_v16 = vld [vmem:[%s6093_s21 + $0x2e8] sm:$0xff] }
 0x6db   : > { %3384 = vmatpush.bf16.msra.mxu3 %v5214_v12  ;;  %3426 = vmatpush.bf16.msrb.mxu2 %v5238_v13  ;;  %v2249_v30 = vmax.f32 %v2048_v21, 0.0  ;;  %v5251_v12 = vld [vmem:[%s6093_s21 + $0x228] sm:$0xff] }
 0x6dc   : > { %v2250_v32 = vmax.f32 %v2062_v24, 0.0  ;;  %v5265_v24 = vld [vmem:[%s6093_s21 + $0x298] sm:$0xff] }
 0x6de   : > { %v2033_v19 = vpop.f32.mrf.mxu3 }
 0x6df   : > { %v2075_v22 = vpop.f32.mrf.mxu2  ;;  %v2034_v35 = vadd.f32 %v2033_v19, %v1352_v25  ;;  %v5257_v19 = vld [vmem:[%s6093_s21 + $0x258] sm:$0xff] }
 0x6e0   : > { %v2049_v7 = vpop.f32.mrf.mxu0  ;;  %v2076_v38 = vadd.f32 %v2075_v22, %v1355_v28 }
 0x6e1   : > { %v2050_v26 = vadd.f32 %v2049_v7, %v1353_v17  ;;  %v2063_v27 = vpop.f32.mrf.mxu1  ;;  %v2248_v20 = vmax.f32 %v2034_v35, 0.0 }
 0x6e2   : > { %v2064_v29 = vadd.f32 %v2063_v27, %v1354_v18  ;;  %v2251_v51 = vmax.f32 %v2076_v38, 0.0 }
 0x6e3   : > { %v2265_v31 = vmax.f32 %v2050_v26, 0.0  ;;  %v5250_v26 = vld [vmem:[%s6093_s21 + $0x220] sm:$0xff] }
 0x6e4   : > { %v2266_v33 = vmax.f32 %v2064_v29, 0.0  ;;  %v5274_v29 = vld [vmem:[%s6093_s21 + $0x2e0] sm:$0xff] }
 0x6e5   : > { %v2281_v36 = vpack.c.bf16 %v2265_v31, %v2249_v30  ;;  %v5256_v31 = vld [vmem:[%s6093_s21 + $0x250] sm:$0xff] }
 0x6e6   : > { %v2282_v39 = vpack.c.bf16 %v2266_v33, %v2250_v32  ;;  %v2035_v40 = vpop.f32.mrf.mxu3 }
 0x6e7   : > { %v2036_v41 = vadd.f32 %v2035_v40, %v1352_v25  ;;  %v2077_v43 = vpop.f32.mrf.mxu2  ;;  %3343 = vmatmul.bf16.vlgmr.msra.gmra.mxu0 %v2281_v36 }
 0x6e8   : > { %v2078_v44 = vadd.f32 %v2077_v43, %v1355_v28  ;;  %3357 = vmatmul.bf16.vlgmr.msra.gmra.mxu1 %v2282_v39  ;;  %3447 = vmatpush.bf16.msra.mxu0 %v5261_v34  ;;  %v2103_v45 = vpop.f32.mrf.mxu0  ;;  %v5264_v34 = vld [vmem:[%s6093_s21 + $0x290] sm:$0xff]  ;;  %v5249_v39 = vld [vmem:[%s6093_s21 + $0x218] sm:$0xff] }
 0x6e9   : > { %v2264_v48 = vmax.f32 %v2036_v41, 0.0  ;;  %3461 = vmatpush.bf16.msra.mxu1 %v5269_v37  ;;  %v2117_v49 = vpop.f32.mrf.mxu1  ;;  %v2104_v62 = vadd.f32 %v2103_v45, %v1357_v54  ;;  %v6602_v37 = vld [vmem:[%s6091_s30 + $0x8] sm:$0xff] }
 0x6ea   : > { %v2267_v52 = vmax.f32 %v2078_v44, 0.0  ;;  %v2118_v2 = vadd.f32 %v2117_v49, %v1358_v58  ;;  %v5273_v43 = vld [vmem:[%s6093_s21 + $0x2d8] sm:$0xff]  ;;  %v5255_v45 = vld [vmem:[%s6093_s21 + $0x248] sm:$0xff]  ;;  %v5248_v49 = vld [vmem:[%s6093_s21 + $0x210] sm:$0xff] }
 0x6eb   : > { %v2280_v53 = vpack.c.bf16 %v2264_v48, %v2248_v20  ;;  %v2253_v13 = vmax.f32 %v2104_v62, 0.0  ;;  %v5263_v20 = vld [vmem:[%s6093_s21 + $0x288] sm:$0xff]  ;;  %v1362_v48 = vperm.slane %v6602_v37, 2 }
 0x6ec   : > { %v2283_v57 = vpack.c.bf16 %v2267_v52, %v2251_v51  ;;  %3448 = vmatpush.bf16.msra.mxu0 %v5260_v46  ;;  %v2254_v17 = vmax.f32 %v2118_v2, 0.0  ;;  %v1361_v46 = vperm.slane %v6602_v37, 1  ;;  %v5254_v52 = vld [vmem:[%s6093_s21 + $0x240] sm:$0xff] }
 0x6ed   : > { %3462 = vmatpush.bf16.msra.mxu1 %v5268_v50  ;;  %3329 = vmatmul.bf16.vlgmr.msrb.gmra.mxu3 %v2280_v53  ;;  %v5272_v50 = vld [vmem:[%s6093_s21 + $0x2d0] sm:$0xff] }
 0x6ee   : > { %3371 = vmatmul.bf16.vlgmr.msra.gmra.mxu2 %v2283_v57  ;;  %3433 = vmatpush.bf16.msrb.mxu3 %v5253_v23  ;;  %v2089_v60 = vpop.f32.mrf.mxu3 }
 0x6ef   : > { %3475 = vmatpush.bf16.msra.mxu2 %v5277_v55  ;;  %v2131_v0 = vpop.f32.mrf.mxu2  ;;  %v2090_v21 = vadd.f32 %v2089_v60, %v1356_v6  ;;  %v5293_v55 = vld [vmem:[%s6093_s21 + $0x378] sm:$0xff]  ;;  %v1360_v60 = vperm.slane %v6602_v37, 0 }
 0x6f0   : > { %3449 = vmatpush.bf16.msra.mxu0 %v5259_v59  ;;  %v2105_v4 = vpop.f32.mrf.mxu0  ;;  %v2132_v7 = vadd.f32 %v2131_v0, %v1359_v10  ;;  %v5301_v59 = vld [vmem:[%s6093_s21 + $0x3b8] sm:$0xff]  ;;  %v5271_v0 = vld [vmem:[%s6093_s21 + $0x2c8] sm:$0xff] }
 0x6f1   : > { %3463 = vmatpush.bf16.msra.mxu1 %v5267_v47  ;;  %v2106_v8 = vadd.f32 %v2105_v4, %v1357_v54  ;;  %v2119_v56 = vpop.f32.mrf.mxu1  ;;  %v2252_v32 = vmax.f32 %v2090_v21, 0.0  ;;  %v5262_v54 = vld [vmem:[%s6093_s21 + $0x280] sm:$0xff]  ;;  %v5247_v47 = vld [vmem:[%s6093_s21 + $0x208] sm:$0xff] }
 0x6f2   : > { %v2120_v11 = vadd.f32 %v2119_v56, %v1358_v58  ;;  %3434 = vmatpush.bf16.msrb.mxu3 %v5252_v61  ;;  %v2255_v35 = vmax.f32 %v2132_v7, 0.0  ;;  %v5292_v56 = vld [vmem:[%s6093_s21 + $0x370] sm:$0xff]  ;;  %v5291_v7 = vld [vmem:[%s6093_s21 + $0x368] sm:$0xff] }
 0x6f3   : > { %v2269_v15 = vmax.f32 %v2106_v8, 0.0  ;;  %3476 = vmatpush.bf16.msra.mxu2 %v5276_v1  ;;  %v1363_v1 = vperm.slane %v6602_v37, 3 }
 0x6f4   : > { %v2270_v18 = vmax.f32 %v2120_v11, 0.0  ;;  %3450 = vmatpush.bf16.msra.mxu0 %v5258_v5  ;;  %v5300_v11 = vld [vmem:[%s6093_s21 + $0x3b0] sm:$0xff] }
 0x6f5   : > { %v2285_v22 = vpack.c.bf16 %v2269_v15, %v2253_v13  ;;  %3464 = vmatpush.bf16.msra.mxu1 %v5266_v9 }
 0x6f6   : > { %v2286_v14 = vpack.c.bf16 %v2270_v18, %v2254_v17  ;;  %3435 = vmatpush.bf16.msrb.mxu3 %v5251_v12  ;;  %v2091_v25 = vpop.f32.mrf.mxu3  ;;  %v5246_v12 = vld [vmem:[%s6093_s21 + $0x200] sm:$0xff]  ;;  %v5285_v18 = vld [vmem:[%s6093_s21 + $0x338] sm:$0xff] }
 0x6f7   : > { %3477 = vmatpush.bf16.msra.mxu2 %v5275_v16  ;;  %v2092_v27 = vadd.f32 %v2091_v25, %v1356_v6  ;;  %v2133_v28 = vpop.f32.mrf.mxu2  ;;  %3399 = vmatmul.bf16.vlgmr.msrb.gmra.mxu0 %v2285_v22  ;;  %v5270_v17 = vld [vmem:[%s6093_s21 + $0x2c0] sm:$0xff]  ;;  %v5309_v22 = vld [vmem:[%s6093_s21 + $0x3f8] sm:$0xff] }
 0x6f8   : > { %v2134_v30 = vadd.f32 %v2133_v28, %v1359_v10  ;;  %3413 = vmatmul.bf16.vlgmr.msrb.gmra.mxu1 %v2286_v14  ;;  %3451 = vmatpush.bf16.msra.mxu0 %v5257_v19 }
 0x6f9   : > { %v2268_v33 = vmax.f32 %v2092_v27, 0.0  ;;  %3465 = vmatpush.bf16.msra.mxu1 %v5265_v24  ;;  %v2159_v38 = vpop.f32.mrf.mxu0 }
 0x6fa   : > { %v2271_v36 = vmax.f32 %v2134_v30, 0.0  ;;  %3436 = vmatpush.bf16.msrb.mxu3 %v5250_v26  ;;  %v2160_v23 = vadd.f32 %v2159_v38, %v1361_v46  ;;  %v5299_v26 = vld [vmem:[%s6093_s21 + $0x3a8] sm:$0xff]  ;;  %v5289_v38 = vld [vmem:[%s6093_s21 + $0x358] sm:$0xff] }
 0x6fb   : > { %v2284_v40 = vpack.c.bf16 %v2268_v33, %v2252_v32  ;;  %3478 = vmatpush.bf16.msra.mxu2 %v5274_v29  ;;  %v5284_v29 = vld [vmem:[%s6093_s21 + $0x330] sm:$0xff]  ;;  %v5290_v33 = vld [vmem:[%s6093_s21 + $0x360] sm:$0xff] }
 0x6fc   : > { %v2173_v41 = vpop.f32.mrf.mxu1  ;;  %v2287_v44 = vpack.c.bf16 %v2271_v36, %v2255_v35  ;;  %3452 = vmatpush.bf16.msra.mxu0 %v5256_v31  ;;  %v2257_v4 = vmax.f32 %v2160_v23, 0.0  ;;  %v5308_v31 = vld [vmem:[%s6093_s21 + $0x3f0] sm:$0xff]  ;;  %v5283_v35 = vld [vmem:[%s6093_s21 + $0x328] sm:$0xff] }
 0x6fd   : > { %3466 = vmatpush.bf16.msra.mxu1 %v5264_v34  ;;  %3385 = vmatmul.bf16.vlgmr.msra.gmra.mxu3 %v2284_v40  ;;  %v2174_v57 = vadd.f32 %v2173_v41, %v1362_v48  ;;  %v5298_v34 = vld [vmem:[%s6093_s21 + $0x3a0] sm:$0xff]  ;;  %v5307_v36 = vld [vmem:[%s6093_s21 + $0x3e8] sm:$0xff]  ;;  %v5280_v23 = vld [vmem:[%s6093_s21 + $0x310] sm:$0xff] }
 0x6fe   : > { %3427 = vmatmul.bf16.vlgmr.msrb.gmra.mxu2 %v2287_v44  ;;  %3437 = vmatpush.bf16.msrb.mxu3 %v5249_v39  ;;  %v5297_v39 = vld [vmem:[%s6093_s21 + $0x398] sm:$0xff]  ;;  %v5282_v40 = vld [vmem:[%s6093_s21 + $0x320] sm:$0xff] }
 0x6ff   : > { %3479 = vmatpush.bf16.msra.mxu2 %v5273_v43  ;;  %v2145_v51 = vpop.f32.mrf.mxu3  ;;  %v2258_v6 = vmax.f32 %v2174_v57, 0.0  ;;  %v5306_v41 = vld [vmem:[%s6093_s21 + $0x3e0] sm:$0xff]  ;;  %v5288_v43 = vld [vmem:[%s6093_s21 + $0x350] sm:$0xff] }
 0x700   : > { %3453 = vmatpush.bf16.msra.mxu0 %v5255_v45  ;;  %v2146_v9 = vadd.f32 %v2145_v51, %v1360_v60  ;;  %v5296_v45 = vld [vmem:[%s6093_s21 + $0x390] sm:$0xff]  ;;  %v1366_v51 = vperm.slane %v6602_v37, 6 }
 0x701   : > { %3467 = vmatpush.bf16.msra.mxu1 %v5263_v20  ;;  %v2161_v58 = vpop.f32.mrf.mxu0  ;;  %v5281_v20 = vld [vmem:[%s6093_s21 + $0x318] sm:$0xff] }
 0x702   : > { %v2187_v53 = vpop.f32.mrf.mxu2  ;;  %3438 = vmatpush.bf16.msrb.mxu3 %v5248_v49  ;;  %v2162_v61 = vadd.f32 %v2161_v58, %v1361_v46  ;;  %v2256_v14 = vmax.f32 %v2146_v9, 0.0  ;;  %v1365_v49 = vperm.slane %v6602_v37, 5  ;;  %v5286_v58 = vld [vmem:[%s6093_s21 + $0x340] sm:$0xff] }
 0x703   : > { %3480 = vmatpush.bf16.msra.mxu2 %v5272_v50  ;;  %v2188_v13 = vadd.f32 %v2187_v53, %v1363_v1  ;;  %v5287_v50 = vld [vmem:[%s6093_s21 + $0x348] sm:$0xff] }
 0x704   : > { %v2175_v62 = vpop.f32.mrf.mxu1  ;;  %3454 = vmatpush.bf16.msra.mxu0 %v5254_v52  ;;  %v2273_v5 = vmax.f32 %v2162_v61, 0.0  ;;  %v5295_v52 = vld [vmem:[%s6093_s21 + $0x388] sm:$0xff]  ;;  %v1364_v61 = vperm.slane %v6602_v37, 4 }
 0x705   : > { %v2176_v2 = vadd.f32 %v2175_v62, %v1362_v48  ;;  %3468 = vmatpush.bf16.msra.mxu1 %v5262_v54  ;;  %v2259_v27 = vmax.f32 %v2188_v13, 0.0  ;;  %v5305_v48 = vld [vmem:[%s6093_s21 + $0x3d8] sm:$0xff]  ;;  %v5304_v54 = vld [vmem:[%s6093_s21 + $0x3d0] sm:$0xff] }
 0x706   : > { %3439 = vmatpush.bf16.msrb.mxu3 %v5247_v47  ;;  %v2289_v10 = vpack.c.bf16 %v2273_v5, %v2257_v4  ;;  %v5303_v5 = vld [vmem:[%s6093_s21 + $0x3c8] sm:$0xff] }
 0x707   : > { %v2274_v8 = vmax.f32 %v2176_v2, 0.0  ;;  %3481 = vmatpush.bf16.msra.mxu2 %v5271_v0  ;;  %v2147_v16 = vpop.f32.mrf.mxu3  ;;  %v1367_v2 = vperm.slane %v6602_v37, 7 }
 0x708   : > { %3503 = vmatpush.bf16.msrb.mxu0 %v5293_v55  ;;  %v2148_v19 = vadd.f32 %v2147_v16, %v1360_v60  ;;  %v5294_v60 = vld [vmem:[%s6093_s21 + $0x380] sm:$0xff] }
 0x709   : > { %3517 = vmatpush.bf16.msrb.mxu1 %v5301_v59  ;;  %v2290_v15 = vpack.c.bf16 %v2274_v8, %v2258_v6  ;;  %3455 = vmatmul.bf16.vlgmr.msra.gmra.mxu0 %v2289_v10 }
 0x70a   : > { %v2189_v21 = vpop.f32.mrf.mxu2  ;;  %v2272_v25 = vmax.f32 %v2148_v19, 0.0  ;;  %3440 = vmatpush.bf16.msrb.mxu3 %v5246_v12  ;;  %v5278_v12 = vld [vmem:[%s6093_s21 + $0x300] sm:$0xff] }
 0x70b   : > { %v2190_v24 = vadd.f32 %v2189_v21, %v1363_v1  ;;  %3469 = vmatmul.bf16.vlgmr.msra.gmra.mxu1 %v2290_v15  ;;  %3482 = vmatpush.bf16.msra.mxu2 %v5270_v17  ;;  %v5279_v1 = vld [vmem:[%s6093_s21 + $0x308] sm:$0xff]  ;;  %v5302_v17 = vld [vmem:[%s6093_s21 + $0x3c0] sm:$0xff] }
 0x70c   : > { %3504 = vmatpush.bf16.msrb.mxu0 %v5292_v56  ;;  %v2288_v30 = vpack.c.bf16 %v2272_v25, %v2256_v14 }
 0x70d   : > { %3518 = vmatpush.bf16.msrb.mxu1 %v5300_v11  ;;  %v2275_v28 = vmax.f32 %v2190_v24, 0.0 }
 0x70e   : > { %3489 = vmatpush.bf16.msra.mxu3 %v5285_v18 }
 0x70f   : > { %3531 = vmatpush.bf16.msrb.mxu2 %v5309_v22  ;;  %v2291_v32 = vpack.c.bf16 %v2275_v28, %v2259_v27  ;;  %3441 = vmatmul.bf16.vlgmr.msrb.gmra.mxu3 %v2288_v30 }
 0x710   : > { %3505 = vmatpush.bf16.msrb.mxu0 %v5291_v7 }
 0x711   : > { %3519 = vmatpush.bf16.msrb.mxu1 %v5299_v26  ;;  %3483 = vmatmul.bf16.vlgmr.msra.gmra.mxu2 %v2291_v32 }
 0x712   : > { %3490 = vmatpush.bf16.msra.mxu3 %v5284_v29 }
 0x713   : > { %3532 = vmatpush.bf16.msrb.mxu2 %v5308_v31 }
 0x714   : > { %3506 = vmatpush.bf16.msrb.mxu0 %v5290_v33  ;;  %v5421_v33 = vld [vmem:[%s6095_s18 + $0x3] ss:$0 sm:$0xff] }
 0x715   : > { %3520 = vmatpush.bf16.msrb.mxu1 %v5298_v34 }
 0x716   : > { %3491 = vmatpush.bf16.msra.mxu3 %v5283_v35 }
 0x717   : > { %3533 = vmatpush.bf16.msrb.mxu2 %v5307_v36 }
 0x718   : > { %3507 = vmatpush.bf16.msrb.mxu0 %v5289_v38 }
 0x719   : > { %v2215_v44 = vpop.f32.mrf.mxu0  ;;  %3521 = vmatpush.bf16.msrb.mxu1 %v5297_v39 }
 0x71a   : > { %v2229_v46 = vpop.f32.mrf.mxu1  ;;  %3492 = vmatpush.bf16.msra.mxu3 %v5282_v40  ;;  %v2216_v55 = vadd.f32 %v2215_v44, %v1365_v49 }
 0x71b   : > { %3534 = vmatpush.bf16.msrb.mxu2 %v5306_v41  ;;  %v2230_v59 = vadd.f32 %v2229_v46, %v1366_v51 }
 0x71c   : > { %3508 = vmatpush.bf16.msrb.mxu0 %v5288_v43  ;;  %v2261_v6 = vmax.f32 %v2216_v55, 0.0 }
 0x71d   : > { %3522 = vmatpush.bf16.msrb.mxu1 %v5296_v45  ;;  %v2262_v56 = vmax.f32 %v2230_v59, 0.0 }
 0x71e   : > { %3493 = vmatpush.bf16.msra.mxu3 %v5281_v20 }
 0x71f   : > { %v2201_v53 = vpop.f32.mrf.mxu3  ;;  %3535 = vmatpush.bf16.msrb.mxu2 %v5305_v48 }
 0x720   : > { %3509 = vmatpush.bf16.msrb.mxu0 %v5287_v50  ;;  %v2202_v10 = vadd.f32 %v2201_v53, %v1364_v61 }
 0x721   : > { %v2243_v57 = vpop.f32.mrf.mxu2  ;;  %v2217_v47 = vpop.f32.mrf.mxu0  ;;  %3523 = vmatpush.bf16.msrb.mxu1 %v5295_v52 }
 0x722   : > { %v2218_v62 = vadd.f32 %v2217_v47, %v1365_v49  ;;  %v2231_v0 = vpop.f32.mrf.mxu1  ;;  %3494 = vmatpush.bf16.msra.mxu3 %v5280_v23  ;;  %v2244_v13 = vadd.f32 %v2243_v57, %v1367_v2  ;;  %v2260_v21 = vmax.f32 %v2202_v10, 0.0 }
 0x723   : > { %v2232_v4 = vadd.f32 %v2231_v0, %v1366_v51  ;;  %3536 = vmatpush.bf16.msrb.mxu2 %v5304_v54 }
 0x724   : > { %v2277_v8 = vmax.f32 %v2218_v62, 0.0  ;;  %3510 = vmatpush.bf16.msrb.mxu0 %v5286_v58  ;;  %v2263_v24 = vmax.f32 %v2244_v13, 0.0 }
 0x725   : > { %v2278_v9 = vmax.f32 %v2232_v4, 0.0  ;;  %3524 = vmatpush.bf16.msrb.mxu1 %v5294_v60 }
 0x726   : > { %v2293_v11 = vpack.c.bf16 %v2277_v8, %v2261_v6  ;;  %3495 = vmatpush.bf16.msra.mxu3 %v5279_v1 }
 0x727   : > { %v2294_v15 = vpack.c.bf16 %v2278_v9, %v2262_v56  ;;  %v2203_v16 = vpop.f32.mrf.mxu3  ;;  %3537 = vmatpush.bf16.msrb.mxu2 %v5303_v5 }
 0x728   : > { %v2204_v37 = vadd.f32 %v2203_v16, %v1364_v61  ;;  %3511 = vmatmul.bf16.vlgmr.msrb.gmra.mxu0 %v2293_v11 }
 0x729   : > { %v2245_v18 = vpop.f32.mrf.mxu2  ;;  %3525 = vmatmul.bf16.vlgmr.msrb.gmra.mxu1 %v2294_v15 }
 0x72a   : > { %v2246_v19 = vadd.f32 %v2245_v18, %v1367_v2  ;;  %v2276_v22 = vmax.f32 %v2204_v37, 0.0  ;;  %3496 = vmatpush.bf16.msra.mxu3 %v5278_v12 }
 0x72b   : > { %3538 = vmatpush.bf16.msrb.mxu2 %v5302_v17 }
 0x72c   : > { %v2279_v7 = vmax.f32 %v2246_v19, 0.0  ;;  %v2292_v14 = vpack.c.bf16 %v2276_v22, %v2260_v21 }
 0x72e   : > { %v2295_v25 = vpack.c.bf16 %v2279_v7, %v2263_v24  ;;  %3497 = vmatmul.bf16.vlgmr.msra.gmra.mxu3 %v2292_v14 }
 0x730   : > { %3539 = vmatmul.bf16.vlgmr.msrb.gmra.mxu2 %v2295_v25 }
 0x764   : > { %v3344_v26 = vpop.f32.mrf.mxu0 }
 0x765   : > { %v3358_v28 = vpop.f32.mrf.mxu1 }
 0x76c   : > { %v3346_v30 = vpop.f32.mrf.mxu0 }
 0x76d   : > { %v3360_v32 = vpop.f32.mrf.mxu1 }
 0x770   : > { %v3330_v27 = vpop.f32.mrf.mxu3 }
 0x771   : > { %v3372_v29 = vpop.f32.mrf.mxu2  ;;  %v3331_v35 = vadd.f32 %v5421_v33, %v3330_v27 }
 0x773   : > { %v3345_v39 = vadd.f32 %v3344_v26, %v3331_v35 }
 0x774   : > { %v3400_v36 = vpop.f32.mrf.mxu0 }
 0x775   : > { %v3414_v40 = vpop.f32.mrf.mxu1  ;;  %v3359_v43 = vadd.f32 %v3358_v28, %v3345_v39 }
 0x777   : > { %v3373_v45 = vadd.f32 %v3372_v29, %v3359_v43 }
 0x778   : > { %v3332_v31 = vpop.f32.mrf.mxu3 }
 0x779   : > { %v3374_v34 = vpop.f32.mrf.mxu2  ;;  %v3333_v44 = vadd.f32 %v5421_v33, %v3332_v31 }
 0x77b   : > { %v3347_v46 = vadd.f32 %v3346_v30, %v3333_v44 }
 0x77c   : > { %v3402_v20 = vpop.f32.mrf.mxu0 }
 0x77d   : > { %v3416_v50 = vpop.f32.mrf.mxu1  ;;  %v3361_v51 = vadd.f32 %v3360_v32, %v3347_v46 }
 0x77f   : > { %v3375_v53 = vadd.f32 %v3374_v34, %v3361_v51 }
 0x780   : > { %v3386_v38 = vpop.f32.mrf.mxu3 }
 0x781   : > { %v3428_v41 = vpop.f32.mrf.mxu2  ;;  %v3387_v49 = vadd.f32 %v3386_v38, %v3373_v45 }
 0x783   : > { %v3401_v23 = vadd.f32 %v3400_v36, %v3387_v49 }
 0x785   : > { %v3415_v54 = vadd.f32 %v3414_v40, %v3401_v23 }
 0x786   : > { %v3456_v57 = vpop.f32.mrf.mxu0 }
 0x787   : > { %v3429_v47 = vadd.f32 %v3428_v41, %v3415_v54 }
 0x788   : > { %v3388_v48 = vpop.f32.mrf.mxu3  ;;  %v3470_v59 = vpop.f32.mrf.mxu1 }
 0x789   : > { %v3430_v52 = vpop.f32.mrf.mxu2  ;;  %v3389_v55 = vadd.f32 %v3388_v48, %v3375_v53 }
 0x78b   : > { %v3403_v60 = vadd.f32 %v3402_v20, %v3389_v55 }
 0x78d   : > { %v3417_v0 = vadd.f32 %v3416_v50, %v3403_v60 }
 0x78e   : > { %v3458_v2 = vpop.f32.mrf.mxu0 }
 0x78f   : > { %v3431_v5 = vadd.f32 %v3430_v52, %v3417_v0 }
 0x790   : > { %v3472_v6 = vpop.f32.mrf.mxu1 }
 0x792   : > { %v3442_v58 = vpop.f32.mrf.mxu3 }
 0x793   : > { %v3443_v62 = vadd.f32 %v3442_v58, %v3429_v47 }
 0x794   : > { %v3484_v61 = vpop.f32.mrf.mxu2 }
 0x795   : > { %v3457_v1 = vadd.f32 %v3456_v57, %v3443_v62  ;;  %v5422_v57 = vld [vmem:[%s6095_s18 + $0x4] ss:$0 sm:$0xff] }
 0x797   : > { %v3471_v8 = vadd.f32 %v3470_v59, %v3457_v1 }
 0x799   : > { %v3485_v10 = vadd.f32 %v3484_v61, %v3471_v8 }
 0x79a   : > { %v3444_v4 = vpop.f32.mrf.mxu3 }
 0x79b   : > { %v3445_v56 = vadd.f32 %v3444_v4, %v3431_v5 }
 0x79c   : > { %v3486_v9 = vpop.f32.mrf.mxu2 }
 0x79d   : > { %v3459_v11 = vadd.f32 %v3458_v2, %v3445_v56 }
 0x79f   : > { %v3473_v17 = vadd.f32 %v3472_v6, %v3459_v11 }
 0x7a1   : > { %v3487_v21 = vadd.f32 %v3486_v9, %v3473_v17 }
 0x7a5   : > { %v3512_v12 = vpop.f32.mrf.mxu0 }
 0x7a6   : > { %v3526_v16 = vpop.f32.mrf.mxu1 }
 0x7ad   : > { %v3514_v25 = vpop.f32.mrf.mxu0 }
 0x7ae   : > { %v3528_v27 = vpop.f32.mrf.mxu1 }
 0x7b1   : > { %v3498_v13 = vpop.f32.mrf.mxu3 }
 0x7b2   : > { %v3499_v15 = vadd.f32 %v3498_v13, %v3485_v10 }
 0x7b3   : > { %v3540_v18 = vpop.f32.mrf.mxu2 }
 0x7b4   : > { %v3513_v37 = vadd.f32 %v3512_v12, %v3499_v15 }
 0x7b6   : > { %v3527_v19 = vadd.f32 %v3526_v16, %v3513_v37 }
 0x7b8   : > { %v3541_v22 = vadd.f32 %v3540_v18, %v3527_v19 }
 0x7b9   : > { %v3500_v24 = vpop.f32.mrf.mxu3 }
 0x7ba   : > { %v3545_v7 = vadd.f32 %v3541_v22, %v6361_v42  ;;  %v3501_v14 = vadd.f32 %v3500_v24, %v3487_v21 }
 0x7bb   : > { %v3542_v29 = vpop.f32.mrf.mxu2 }
 0x7bc   : > { %v3515_v26 = vadd.f32 %v3514_v25, %v3501_v14  ;;  %3547 = vadd.xlane.f32.xlu0 %v3545_v7  ;;  %v3553_v32 = vmul.f32 %v3545_v7, %v3545_v7 }
 0x7be   : > { %v3529_v28 = vadd.f32 %v3528_v27, %v3515_v26 }
 0x7c0   : > { %v3543_v30 = vadd.f32 %v3542_v29, %v3529_v28 }
 0x7c2   : > { %v3546_v31 = vadd.f32 %v3543_v30, %v6359_v3 }
 0x7c4   : > { %3549 = vadd.xlane.f32.xlu2 %v3546_v31  ;;  %3555 = vadd.xlane.f32.xlu0 %v3553_v32  ;;  %v3554_v33 = vmul.f32 %v3546_v31, %v3546_v31 }
 0x7cc   : > { %3557 = vadd.xlane.f32.xlu2 %v3554_v33 }
 0x82f   : > { %v3548_v34 = vpop.xlane.xlu0 %3547 }
 0x830   : > { %v3551_v35 = vmul.f32 %v3548_v34, %v6323_v63 }
 0x832   : > { %v3561_v38 = vmul.f32 %v3551_v35, %v3551_v35  ;;  %v3587_v55 = vsub.f32 %v3545_v7, %v3551_v35 }
 0x837   : > { %v3550_v36 = vpop.xlane.xlu2 %3549  ;;  %v3556_v42 = vpop.xlane.xlu0 %3555 }
 0x838   : > { %v3559_v39 = vmul.f32 %v3556_v42, %v6323_v63  ;;  %v3552_v41 = vmul.f32 %v3550_v36, %v6323_v63 }
 0x83a   : > { %v3563_v40 = vsub.f32 %v3559_v39, %v3561_v38  ;;  %v3562_v3 = vmul.f32 %v3552_v41, %v3552_v41  ;;  %v3588_v2 = vsub.f32 %v3546_v31, %v3552_v41 }
 0x83c   : > { %v3565_v43 = vadd.f32 1e-05, %v3563_v40 }
 0x83e   : > { %5446 = vrsqrt.f32 %v3565_v43  ;;  %vm3573_vm10 = vweird.f32 %v3565_v43 }
 0x83f   : > { %v3558_v44 = vpop.xlane.xlu2 %3557 }
 0x840   : > { %v3560_v45 = vmul.f32 %v3558_v44, %v6323_v63  ;;  %v5423_v63 = vld [vmem:[%s6095_s18 + $0x5] ss:$0 sm:$0xff] }
 0x842   : > { %v3564_v46 = vsub.f32 %v3560_v45, %v3562_v3 }
 0x844   : > { %v5447_v20 = vpop.eup %5446  ;;  %v3566_v48 = vadd.f32 1e-05, %v3564_v46 }
 0x845   : > { %v3568_v49 = vmul.f32 %v5447_v20, %v3565_v43  ;;  %vm3574_vm9 = vweird.f32 %v5447_v20 }
 0x846   : > { %5448 = vrsqrt.f32 %v3566_v48  ;;  %vm3575_vm11 = vmor %vm3573_vm10, %vm3574_vm9  ;;  %vm3583_vm13 = vweird.f32 %v3566_v48 }
 0x847   : > { %v3569_v50 = vmul.f32 %v5447_v20, %v3568_v49 }
 0x849   : > { %v3570_v51 = vmul.f32 0.5, %v3569_v50 }
 0x84b   : > { %v3571_v52 = vsub.f32 1.5, %v3570_v51 }
 0x84c   : > { %v5449_v23 = vpop.eup %5448 }
 0x84d   : > { %v3572_v53 = vmul.f32 %v5447_v20, %v3571_v52  ;;  %v3578_v54 = vmul.f32 %v5449_v23, %v3566_v48  ;;  %vm3584_vm12 = vweird.f32 %v5449_v23 }
 0x84e   : > { %vm3585_vm14 = vmor %vm3583_vm13, %vm3584_vm12 }
 0x84f   : > { %v3576_v58 = vsel %vm3575_vm11, %v5447_v20, %v3572_v53  ;;  %v3579_v59 = vmul.f32 %v5449_v23, %v3578_v54 }
 0x850   : > { %v3589_v47 = vmul.f32 %v3587_v55, %v3576_v58 }
 0x851   : > { %v3580_v60 = vmul.f32 0.5, %v3579_v59 }
 0x852   : > { %v3592_v61 = vmul.f32 %v5422_v57, %v3589_v47 }
 0x853   : > { %v3581_v62 = vsub.f32 1.5, %v3580_v60 }
 0x854   : > { %v3595_v0 = vadd.f32 %v5423_v63, %v3592_v61 }
 0x855   : > { %v3582_v1 = vmul.f32 %v5449_v23, %v3581_v62 }
 0x856   : > { %3597 = vst [vmem:[#allocation2] sm:$0xff] %v3595_v0 }
 0x857   : > { %v3586_v4 = vsel %vm3585_vm14, %v5449_v23, %v3582_v1 }
 0x858   : > { %v3590_v5 = vmul.f32 %v3588_v2, %v3586_v4 }
 0x85a   : > { %v3593_v6 = vmul.f32 %v5422_v57, %v3590_v5  ;;  %3602 = sbr.rel (%p5014_p8) target bundleno = 2145 (0x861), region = 100 }
 0x85c   : > { %v3596_v8 = vadd.f32 %v5423_v63, %v3593_v6 }
 0x85e   : > { %3598 = vst [vmem:[#allocation2 + $0x8] sm:$0xff] %v3596_v8 }
 0x85f   : > { %3603 = vst [vmem:[#allocation16] sm:$0xff] %v3595_v0 }
 0x860   : > { %3604 = vst [vmem:[#allocation16 + $0x8] sm:$0xff] %v3596_v8 }
 0x861 PF: > { %p5369_p9 = scmp.eq.s32.totalorder %s5877_s0, 1  ;;  %s5792_s19 = smov [#allocation16]  }
 0x862   : > { %s3610_s11 = sshll.u32 %s5792_s19, 4  ;;  %s6729_s30 = sld [smem:[#allocation30_spill]]  ;;  %s3611_s11 = int_to_ptr.vmem [resolvable:$true] %s3610_s11 }
 0x863   : > { %s5793_s18 = smov 128   ;;  %s5794_s6 = smov 8  }
 0x868   : > { %s3612_s21 = sshll.u32 %s6729_s30, 4  ;;  %s3613_s21 = int_to_ptr.hbm [resolvable:$true] %s3612_s21 }
 0x869   : > { %5335 = dma.vmem_to_hbm [thread:$0]  (%p5369_p9), %s3611_s11, 256, %s3613_s21, [#allocation7], %s5793_s18, %s5793_s18, %s5794_s6  }
 0x86a   : > { %5761 = dma.done.wait (%p5369_p9), [#allocation7], 256  }
 0x86b   : > { %5763 = vsyncadd (%p5369_p9), [#allocation7], 4294967040 }
 0x86c PF: > { %s6730_s24 = sld [smem:[#allocation23_spill]]  ;;  %s6733_s21 = smov %s5770_s22 }
 0x86d   : > { %s6731_s25 = sld [smem:[#allocation22_spill]] }
 0x86e   : > { %s6732_s23 = sld [smem:[#allocation24_spill]] }
 0x872   : > { %p29_p10 = scmp.ge.s32.totalorder %s6730_s24, 4  }
 0x873   : > { %s6734_s22 = smov %s6731_s25 }
 0x874   :  { %31 = sbr.rel (!%p29_p10) target bundleno = 15 (0xf), region = 186 }
 0x879   :  { %3629 = vsyncpa [#allocation6], 1 }
 0x87a   :  { %3631 = vsyncpa [#allocation6 + $0x1], 1 }
 0x87b   :  { %3632 = vsyncpa [#allocation9], 1 }
 0x87c   :  { %3633 = vsyncpa [#allocation7], 1 }
 0x87d   :  { %3635 = vsyncpa [#allocation7 + $0x1], 1 }

</bundles_post_ra>
